<compile_context>
chip_gen: v7x
topology: tpu7x:2x2x1
jax: 0.10.0
libtpu: 0.0.40
codegen_flags: <defaults>
</compile_context>

<pallas_src>
import jax
import jax.numpy as jnp
from jax import lax
from jax.experimental import pallas as pl
from jax.experimental.pallas import tpu as pltpu

# ---- model dimensions (implied by the PyTorch module) ----
C_IN, C_OUT, K = 1, 10, 5
H_IN = W_IN = 60                      # 60x60 input -> conv 56x56 -> pool 28x28 -> flatten 7840
H_CONV = W_CONV = H_IN - K + 1        # 56
H_POOL = W_POOL = H_CONV // 2         # 28
PI_PAD = 32                           # pooled-row count padded to a multiple of 8 (sublane aligned)
KROW = K * 64                         # 320: im2row columns, tap di lives at [di*64, di*64+60)
LANES = C_OUT * W_POOL                # 280: conv/pool lane layout c*28 + pj
FLAT = C_OUT * H_POOL * W_POOL        # 7840
HID = 64
WIDE = PI_PAD * HID                   # 2048: wide FC1 columns pi*64 + n (pi in [0,32))
N_CLS = 2
OUT_PAD = 128                         # lane-dense padded logits width


# ---------------- fused kernel: conv + relu + maxpool + fc1 + relu + fc2 ----------------
def fused_kernel(xe_ref, xo_ref, wbe_ref, wbo_ref, brow_ref, w1_ref, mask_ref,
                 b1_ref, w2_ref, b2_ref, out_ref):
    tb = xe_ref.shape[0]
    xe = xe_ref[...].reshape(tb * PI_PAD, KROW)      # (tb*32, 320) bf16, even conv rows
    xo = xo_ref[...].reshape(tb * PI_PAD, KROW)      # (tb*32, 320) bf16, odd  conv rows
    wbe = wbe_ref[...]                               # (320, 280) bf16, even conv cols
    wbo = wbo_ref[...]                               # (320, 280) bf16, odd  conv cols

    # ---- conv as 4 bf16 MXU matmuls (row/col parity pre-split), f32 accumulation ----
    cee = jnp.dot(xe, wbe, preferred_element_type=jnp.float32)
    ceo = jnp.dot(xe, wbo, preferred_element_type=jnp.float32)
    coe = jnp.dot(xo, wbe, preferred_element_type=jnp.float32)
    coo = jnp.dot(xo, wbo, preferred_element_type=jnp.float32)

    # ---- 2x2 max-pool == elementwise max of the 4 parity slabs; bias + ReLU commute with max ----
    cmax = jnp.maximum(jnp.maximum(cee, ceo), jnp.maximum(coe, coo))
    pooled = jnp.maximum(cmax + brow_ref[...], 0.0)                  # (tb*32, 280) f32

    # ---- FC1 (7840 -> 64): one wide bf16 matmul + hoisted-constant block-diag extraction ----
    g = jnp.dot(pooled.astype(jnp.bfloat16), w1_ref[...],
                preferred_element_type=jnp.float32)                  # (tb*32, 2048)
    g3 = g.reshape(tb, PI_PAD, WIDE) * mask_ref[...]                 # keep only diag pi-block per row
    gsum = jnp.sum(g3, axis=1)                                       # (tb, 2048): per-image row sum
    # fold the 32 blocks of 64 lanes with a lane roll-reduce (XLU) instead of a matvec
    for s in (1024, 512, 256, 128, 64):
        gsum = gsum + pltpu.roll(gsum, shift=s, axis=1)
    h = jnp.maximum(gsum[:, :HID] + b1_ref[...], 0.0)                # (tb, 64)

    # ---- FC2 into a lane-dense 128-wide padded slab ----
    logits = jnp.dot(h, w2_ref[...], preferred_element_type=jnp.float32) + b2_ref[...]
    out_ref[...] = logits.reshape(tb, 1, OUT_PAD)


# ---------------- wrapper-side constant / input preparation ----------------
def _im2row_parity(x2, b_pad):
    """x2: (B, 60, 60) f32 -> (xe, xo) each (b_pad, 32, 320) bf16 with
    xe[b, pi, di*64+k] = x2[b, 2*pi+di, k]   (even conv rows)
    xo[b, pi, di*64+k] = x2[b, 2*pi+1+di, k] (odd conv rows), zero-padded elsewhere."""
    B = x2.shape[0]
    pi = jnp.arange(H_POOL)
    di = jnp.arange(K)
    rows_e = 2 * pi[:, None] + di[None, :]          # (28, 5)
    rows_o = rows_e + 1

    def expand(rows):
        l = x2[:, rows, :]                          # (B, 28, 5, 60)
        l = jnp.pad(l, ((0, b_pad - B), (0, PI_PAD - H_POOL), (0, 0), (0, 64 - W_IN)))
        return l.reshape(b_pad, PI_PAD, KROW).astype(jnp.bfloat16)

    return expand(rows_e), expand(rows_o)


def _banded_conv_weights(conv_w):
    """WB[di*64+k, c*28+pj] = w[c, di, k - col(pj)] if 0 <= k-col < K else 0 (col = 2*pj or 2*pj+1)."""
    w = conv_w.reshape(C_OUT, K, K).astype(jnp.float32)
    r = jnp.arange(KROW)
    di_r = r // 64
    k_r = r % 64

    def band(cols):                                  # cols: (28,) output columns of one parity
        dj = k_r[:, None] - cols[None, :]            # (320, 28)
        valid = (dj >= 0) & (dj < K) & (k_r[:, None] < W_IN)
        taps = w[:, di_r[:, None], jnp.clip(dj, 0, K - 1)]           # (10, 320, 28)
        taps = jnp.where(valid[None], taps, 0.0)
        return taps.transpose(1, 0, 2).reshape(KROW, LANES)          # (320, 280)

    cols_e = 2 * jnp.arange(W_POOL)
    return band(cols_e).astype(jnp.bfloat16), band(cols_e + 1).astype(jnp.bfloat16)


def _fc1_wide(fc1_w):
    """w1w[c*28+pj, pi*64+n] = fc1_w[n, c*784 + pi*28 + pj]; columns for pi in [28,32) are zero."""
    w1 = fc1_w.reshape(HID, C_OUT, H_POOL, W_POOL)                   # [n, c, pi, pj]
    w1 = w1.transpose(1, 3, 2, 0).reshape(LANES, H_POOL * HID)       # (280, 1792)
    w1 = jnp.pad(w1, ((0, 0), (0, WIDE - H_POOL * HID)))             # (280, 2048)
    return w1.astype(jnp.bfloat16)


def _blockdiag_mask():
    """mask[pi', pi*64+n] = 1.0 iff pi' == pi   (shape (32, 2048), hoisted constant)."""
    pi_r = jnp.arange(PI_PAD)[:, None]
    pi_c = jnp.arange(WIDE)[None, :] // HID
    return (pi_r == pi_c).astype(jnp.float32)


@jax.jit
def simple_model_v2_forward(x, params):
    conv_w, conv_b, fc1_w, fc1_b, fc2_w, fc2_b = params
    B = x.shape[0]

    # Batch tile: keep the grid >= 2 steps when B >= 2 (both v7x TensorCores busy),
    # up to 8 images per step to amortize grid overhead and fill MXU rows.
    if B >= 16:
        tb = 8
    else:
        tb = max(1, B // 2)
    b_pad = -(-B // tb) * tb
    grid = b_pad // tb

    x2 = x.reshape(B, H_IN, W_IN).astype(jnp.float32)
    xe, xo = _im2row_parity(x2, b_pad)

    wbe, wbo = _banded_conv_weights(conv_w)
    brow = jnp.repeat(conv_b.astype(jnp.float32), W_POOL).reshape(1, LANES)
    w1w = _fc1_wide(fc1_w)
    mask = _blockdiag_mask()
    b1r = fc1_b.reshape(1, HID).astype(jnp.float32)
    w2p = jnp.pad(fc2_w.T.astype(jnp.float32), ((0, 0), (0, OUT_PAD - N_CLS)))
    b2p = jnp.pad(fc2_b.astype(jnp.float32), (0, OUT_PAD - N_CLS)).reshape(1, OUT_PAD)

    out = pl.pallas_call(
        fused_kernel,
        out_shape=jax.ShapeDtypeStruct((b_pad, 1, OUT_PAD), jnp.float32),
        grid=(grid,),
        in_specs=[
            pl.BlockSpec((tb, PI_PAD, KROW), lambda i: (i, 0, 0)),   # im2row, even conv rows (bf16)
            pl.BlockSpec((tb, PI_PAD, KROW), lambda i: (i, 0, 0)),   # im2row, odd  conv rows (bf16)
            pl.BlockSpec((KROW, LANES), lambda i: (0, 0)),           # banded conv W, even cols (bf16)
            pl.BlockSpec((KROW, LANES), lambda i: (0, 0)),           # banded conv W, odd  cols (bf16)
            pl.BlockSpec((1, LANES), lambda i: (0, 0)),              # conv bias row
            pl.BlockSpec((LANES, WIDE), lambda i: (0, 0)),           # fc1 wide weights (bf16)
            pl.BlockSpec((PI_PAD, WIDE), lambda i: (0, 0)),          # block-diag mask (hoisted const)
            pl.BlockSpec((1, HID), lambda i: (0, 0)),                # fc1 bias
            pl.BlockSpec((HID, OUT_PAD), lambda i: (0, 0)),          # fc2 weights (padded)
            pl.BlockSpec((1, OUT_PAD), lambda i: (0, 0)),            # fc2 bias (padded)
        ],
        out_specs=pl.BlockSpec((tb, 1, OUT_PAD), lambda i: (i, 0, 0)),
        compiler_params=pltpu.CompilerParams(
            dimension_semantics=("parallel",),
            vmem_limit_bytes=32 * 1024 * 1024),
    )(xe, xo, wbe, wbo, brow, w1w, mask, b1r, w2p, b2p)

    return out[:B, 0, :N_CLS]


# ---------------- deterministic parameter init (PyTorch-style uniform bounds) ----------------
def init_params(key):
    ks = jax.random.split(key, 6)

    def unif(k, shape, fan_in):
        bound = 1.0 / jnp.sqrt(jnp.float32(fan_in))
        return jax.random.uniform(k, shape, jnp.float32, -bound, bound)

    conv_w = unif(ks[0], (C_OUT, C_IN, K, K), C_IN * K * K)
    conv_b = unif(ks[1], (C_OUT,), C_IN * K * K)
    fc1_w = unif(ks[2], (HID, FLAT), FLAT)
    fc1_b = unif(ks[3], (HID,), FLAT)
    fc2_w = unif(ks[4], (N_CLS, HID), HID)
    fc2_b = unif(ks[5], (N_CLS,), HID)
    return conv_w, conv_b, fc1_w, fc1_b, fc2_w, fc2_b


# ---------------- pure-JAX reference for validation ----------------
def reference_forward(x, params):
    conv_w, conv_b, fc1_w, fc1_b, fc2_w, fc2_b = params
    y = lax.conv_general_dilated(
        x, conv_w, (1, 1), 'VALID',
        dimension_numbers=('NCHW', 'OIHW', 'NCHW'),
        precision=lax.Precision.HIGHEST)
    y = y + conv_b[None, :, None, None]
    y = jnp.maximum(y, 0.0)
    y = lax.reduce_window(y, -jnp.inf, lax.max,
                          (1, 1, 2, 2), (1, 1, 2, 2), 'VALID')
    y = y.reshape(x.shape[0], -1)
    y = jnp.maximum(jnp.dot(y, fc1_w.T, precision=lax.Precision.HIGHEST) + fc1_b, 0.0)
    return jnp.dot(y, fc2_w.T, precision=lax.Precision.HIGHEST) + fc2_b


if __name__ == "__main__":
    key = jax.random.PRNGKey(0)
    kx, kp = jax.random.split(key)
    x = jax.random.normal(kx, (2, C_IN, H_IN, W_IN), jnp.float32)
    params = init_params(kp)

    out = simple_model_v2_forward(x, params)
    out = jax.block_until_ready(out)

    ref = reference_forward(x, params)
    assert out.shape == (2, N_CLS), out.shape
    assert jnp.allclose(out, ref, rtol=2e-2, atol=2e-2), (out, ref)
    print("KERNEL_OK")
</pallas_src>

<mosaic_0001>
module attributes {stable_mosaic.version = 11 : i64} {
  func.func @fused_kernel(%arg0: i32, %arg1: memref<1x32x320xbf16, #tpu.memory_space<vmem>>, %arg2: memref<1x32x320xbf16, #tpu.memory_space<vmem>>, %arg3: memref<320x280xbf16, #tpu.memory_space<vmem>>, %arg4: memref<320x280xbf16, #tpu.memory_space<vmem>>, %arg5: memref<1x280xf32, #tpu.memory_space<vmem>>, %arg6: memref<280x2048xbf16, #tpu.memory_space<vmem>>, %arg7: memref<32x2048xf32, #tpu.memory_space<vmem>>, %arg8: memref<1x64xf32, #tpu.memory_space<vmem>>, %arg9: memref<64x128xf32, #tpu.memory_space<vmem>>, %arg10: memref<1x128xf32, #tpu.memory_space<vmem>>, %arg11: memref<1x1x128xf32, #tpu.memory_space<vmem>>) attributes {dimension_semantics = [#tpu.dimension_semantics<parallel>], iteration_bounds = array<i64: 2>, scalar_prefetch = 0 : i64, scratch_operands = 0 : i64, tpu.core_type = #tpu.core_type<tc>, window_params = [{transform_indices = @transform_0, window_bounds = array<i64: 1, 32, 320>}, {transform_indices = @transform_1, window_bounds = array<i64: 1, 32, 320>}, {pipeline_mode = #tpu.pipeline_mode<synchronous>, transform_indices = @transform_2, window_bounds = array<i64: 320, 280>}, {pipeline_mode = #tpu.pipeline_mode<synchronous>, transform_indices = @transform_3, window_bounds = array<i64: 320, 280>}, {pipeline_mode = #tpu.pipeline_mode<synchronous>, transform_indices = @transform_4, window_bounds = array<i64: 1, 280>}, {pipeline_mode = #tpu.pipeline_mode<synchronous>, transform_indices = @transform_5, window_bounds = array<i64: 280, 2048>}, {pipeline_mode = #tpu.pipeline_mode<synchronous>, transform_indices = @transform_6, window_bounds = array<i64: 32, 2048>}, {pipeline_mode = #tpu.pipeline_mode<synchronous>, transform_indices = @transform_7, window_bounds = array<i64: 1, 64>}, {pipeline_mode = #tpu.pipeline_mode<synchronous>, transform_indices = @transform_8, window_bounds = array<i64: 64, 128>}, {pipeline_mode = #tpu.pipeline_mode<synchronous>, transform_indices = @transform_9, window_bounds = array<i64: 1, 128>}, {transform_indices = @transform_10, window_bounds = array<i64: 1, 1, 128>}]} {
    %c0 = arith.constant 0 : index
    %c0_0 = arith.constant 0 : index
    %c0_1 = arith.constant 0 : index
    %0 = vector.load %arg1[%c0, %c0_0, %c0_1] : memref<1x32x320xbf16, #tpu.memory_space<vmem>>, vector<1x32x320xbf16>
    %1 = vector.shape_cast %0 : vector<1x32x320xbf16> to vector<32x320xbf16>
    %c0_2 = arith.constant 0 : index
    %c0_3 = arith.constant 0 : index
    %c0_4 = arith.constant 0 : index
    %2 = vector.load %arg2[%c0_2, %c0_3, %c0_4] : memref<1x32x320xbf16, #tpu.memory_space<vmem>>, vector<1x32x320xbf16>
    %3 = vector.shape_cast %2 : vector<1x32x320xbf16> to vector<32x320xbf16>
    %c0_5 = arith.constant 0 : index
    %c0_6 = arith.constant 0 : index
    %4 = vector.load %arg3[%c0_5, %c0_6] : memref<320x280xbf16, #tpu.memory_space<vmem>>, vector<320x280xbf16>
    %c0_7 = arith.constant 0 : index
    %c0_8 = arith.constant 0 : index
    %5 = vector.load %arg4[%c0_7, %c0_8] : memref<320x280xbf16, #tpu.memory_space<vmem>>, vector<320x280xbf16>
    %cst = arith.constant dense<0.000000e+00> : vector<32x280xf32>
    %6 = tpu.matmul %1, %4, %cst {dimension_numbers = #tpu.dot_dimension_numbers<[1], [0], [0], [1], [0, 0, 1, 1], [], []>} : vector<32x320xbf16>, vector<320x280xbf16>, vector<32x280xf32> -> vector<32x280xf32>
    %cst_9 = arith.constant dense<0.000000e+00> : vector<32x280xf32>
    %7 = tpu.matmul %1, %5, %cst_9 {dimension_numbers = #tpu.dot_dimension_numbers<[1], [0], [0], [1], [0, 0, 1, 1], [], []>} : vector<32x320xbf16>, vector<320x280xbf16>, vector<32x280xf32> -> vector<32x280xf32>
    %cst_10 = arith.constant dense<0.000000e+00> : vector<32x280xf32>
    %8 = tpu.matmul %3, %4, %cst_10 {dimension_numbers = #tpu.dot_dimension_numbers<[1], [0], [0], [1], [0, 0, 1, 1], [], []>} : vector<32x320xbf16>, vector<320x280xbf16>, vector<32x280xf32> -> vector<32x280xf32>
    %cst_11 = arith.constant dense<0.000000e+00> : vector<32x280xf32>
    %9 = tpu.matmul %3, %5, %cst_11 {dimension_numbers = #tpu.dot_dimension_numbers<[1], [0], [0], [1], [0, 0, 1, 1], [], []>} : vector<32x320xbf16>, vector<320x280xbf16>, vector<32x280xf32> -> vector<32x280xf32>
    %10 = arith.maximumf %6, %7 : vector<32x280xf32>
    %11 = arith.maximumf %8, %9 : vector<32x280xf32>
    %12 = arith.maximumf %10, %11 : vector<32x280xf32>
    %c0_12 = arith.constant 0 : index
    %c0_13 = arith.constant 0 : index
    %13 = vector.load %arg5[%c0_12, %c0_13] : memref<1x280xf32, #tpu.memory_space<vmem>>, vector<1x280xf32>
    %14 = vector.broadcast %13 : vector<1x280xf32> to vector<32x280xf32>
    %15 = arith.addf %12, %14 : vector<32x280xf32>
    %cst_14 = arith.constant 0.000000e+00 : f32
    %16 = vector.broadcast %cst_14 : f32 to vector<32x280xf32>
    %17 = arith.maximumf %15, %16 : vector<32x280xf32>
    %18 = arith.truncf %17 : vector<32x280xf32> to vector<32x280xbf16>
    %c0_15 = arith.constant 0 : index
    %c0_16 = arith.constant 0 : index
    %19 = vector.load %arg6[%c0_15, %c0_16] : memref<280x2048xbf16, #tpu.memory_space<vmem>>, vector<280x2048xbf16>
    %cst_17 = arith.constant dense<0.000000e+00> : vector<32x2048xf32>
    %20 = tpu.matmul %18, %19, %cst_17 {dimension_numbers = #tpu.dot_dimension_numbers<[1], [0], [0], [1], [0, 0, 1, 1], [], []>} : vector<32x280xbf16>, vector<280x2048xbf16>, vector<32x2048xf32> -> vector<32x2048xf32>
    %21 = vector.shape_cast %20 : vector<32x2048xf32> to vector<1x32x2048xf32>
    %c0_18 = arith.constant 0 : index
    %c0_19 = arith.constant 0 : index
    %22 = vector.load %arg7[%c0_18, %c0_19] : memref<32x2048xf32, #tpu.memory_space<vmem>>, vector<32x2048xf32>
    %23 = vector.shape_cast %22 : vector<32x2048xf32> to vector<1x32x2048xf32>
    %24 = arith.mulf %21, %23 : vector<1x32x2048xf32>
    %cst_20 = arith.constant dense<0.000000e+00> : vector<1x2048xf32>
    %25 = vector.multi_reduction <add>, %24, %cst_20 [1] : vector<1x32x2048xf32> to vector<1x2048xf32>
    %c1024_i32 = arith.constant 1024 : i32
    %26 = tpu.dynamic_rotate %25 by %c1024_i32 dim 1 : vector<1x2048xf32>, i32 -> vector<1x2048xf32>
    %27 = arith.addf %25, %26 : vector<1x2048xf32>
    %c512_i32 = arith.constant 512 : i32
    %28 = tpu.dynamic_rotate %27 by %c512_i32 dim 1 : vector<1x2048xf32>, i32 -> vector<1x2048xf32>
    %29 = arith.addf %27, %28 : vector<1x2048xf32>
    %c256_i32 = arith.constant 256 : i32
    %30 = tpu.dynamic_rotate %29 by %c256_i32 dim 1 : vector<1x2048xf32>, i32 -> vector<1x2048xf32>
    %31 = arith.addf %29, %30 : vector<1x2048xf32>
    %c128_i32 = arith.constant 128 : i32
    %32 = tpu.dynamic_rotate %31 by %c128_i32 dim 1 : vector<1x2048xf32>, i32 -> vector<1x2048xf32>
    %33 = arith.addf %31, %32 : vector<1x2048xf32>
    %c64_i32 = arith.constant 64 : i32
    %34 = tpu.dynamic_rotate %33 by %c64_i32 dim 1 : vector<1x2048xf32>, i32 -> vector<1x2048xf32>
    %35 = arith.addf %33, %34 : vector<1x2048xf32>
    %36 = vector.extract_strided_slice %35 {offsets = [0, 0], sizes = [1, 64], strides = [1, 1]} : vector<1x2048xf32> to vector<1x64xf32>
    %c0_21 = arith.constant 0 : index
    %c0_22 = arith.constant 0 : index
    %37 = vector.load %arg8[%c0_21, %c0_22] : memref<1x64xf32, #tpu.memory_space<vmem>>, vector<1x64xf32>
    %38 = arith.addf %36, %37 : vector<1x64xf32>
    %cst_23 = arith.constant 0.000000e+00 : f32
    %39 = vector.broadcast %cst_23 : f32 to vector<1x64xf32>
    %40 = arith.maximumf %38, %39 : vector<1x64xf32>
    %c0_24 = arith.constant 0 : index
    %c0_25 = arith.constant 0 : index
    %41 = vector.load %arg9[%c0_24, %c0_25] : memref<64x128xf32, #tpu.memory_space<vmem>>, vector<64x128xf32>
    %cst_26 = arith.constant dense<0.000000e+00> : vector<1x128xf32>
    %42 = tpu.matmul %40, %41, %cst_26 {dimension_numbers = #tpu.dot_dimension_numbers<[1], [0], [0], [1], [0, 0, 1, 1], [], []>} : vector<1x64xf32>, vector<64x128xf32>, vector<1x128xf32> -> vector<1x128xf32>
    %c0_27 = arith.constant 0 : index
    %c0_28 = arith.constant 0 : index
    %43 = vector.load %arg10[%c0_27, %c0_28] : memref<1x128xf32, #tpu.memory_space<vmem>>, vector<1x128xf32>
    %44 = arith.addf %42, %43 : vector<1x128xf32>
    %45 = vector.shape_cast %44 : vector<1x128xf32> to vector<1x1x128xf32>
    %c0_29 = arith.constant 0 : index
    %c0_30 = arith.constant 0 : index
    %c0_31 = arith.constant 0 : index
    %46 = vector.load %arg11[%c0_29, %c0_30, %c0_31] : memref<1x1x128xf32, #tpu.memory_space<vmem>>, vector<1x1x128xf32>
    tpu.vector_store %arg11[%c0_29, %c0_30, %c0_31], %45 {strides = array<i32>} : memref<1x1x128xf32, #tpu.memory_space<vmem>>, vector<1x1x128xf32>,
    return
  }
  func.func @transform_0(%arg0: i32) -> (i32, i32, i32) {
    %c0_i32 = arith.constant 0 : i32
    %c0_i32_0 = arith.constant 0 : i32
    %c0_i32_1 = arith.constant 0 : i32
    return %arg0, %c0_i32, %c0_i32_0 : i32, i32, i32
  }
  func.func @transform_1(%arg0: i32) -> (i32, i32, i32) {
    %c0_i32 = arith.constant 0 : i32
    %c0_i32_0 = arith.constant 0 : i32
    %c0_i32_1 = arith.constant 0 : i32
    return %arg0, %c0_i32, %c0_i32_0 : i32, i32, i32
  }
  func.func @transform_2(%arg0: i32) -> (i32, i32) {
    %c0_i32 = arith.constant 0 : i32
    %c0_i32_0 = arith.constant 0 : i32
    %c0_i32_1 = arith.constant 0 : i32
    return %c0_i32, %c0_i32_0 : i32, i32
  }
  func.func @transform_3(%arg0: i32) -> (i32, i32) {
    %c0_i32 = arith.constant 0 : i32
    %c0_i32_0 = arith.constant 0 : i32
    %c0_i32_1 = arith.constant 0 : i32
    return %c0_i32, %c0_i32_0 : i32, i32
  }
  func.func @transform_4(%arg0: i32) -> (i32, i32) {
    %c0_i32 = arith.constant 0 : i32
    %c0_i32_0 = arith.constant 0 : i32
    %c0_i32_1 = arith.constant 0 : i32
    return %c0_i32, %c0_i32_0 : i32, i32
  }
  func.func @transform_5(%arg0: i32) -> (i32, i32) {
    %c0_i32 = arith.constant 0 : i32
    %c0_i32_0 = arith.constant 0 : i32
    %c0_i32_1 = arith.constant 0 : i32
    return %c0_i32, %c0_i32_0 : i32, i32
  }
  func.func @transform_6(%arg0: i32) -> (i32, i32) {
    %c0_i32 = arith.constant 0 : i32
    %c0_i32_0 = arith.constant 0 : i32
    %c0_i32_1 = arith.constant 0 : i32
    return %c0_i32, %c0_i32_0 : i32, i32
  }
  func.func @transform_7(%arg0: i32) -> (i32, i32) {
    %c0_i32 = arith.constant 0 : i32
    %c0_i32_0 = arith.constant 0 : i32
    %c0_i32_1 = arith.constant 0 : i32
    return %c0_i32, %c0_i32_0 : i32, i32
  }
  func.func @transform_8(%arg0: i32) -> (i32, i32) {
    %c0_i32 = arith.constant 0 : i32
    %c0_i32_0 = arith.constant 0 : i32
    %c0_i32_1 = arith.constant 0 : i32
    return %c0_i32, %c0_i32_0 : i32, i32
  }
  func.func @transform_9(%arg0: i32) -> (i32, i32) {
    %c0_i32 = arith.constant 0 : i32
    %c0_i32_0 = arith.constant 0 : i32
    %c0_i32_1 = arith.constant 0 : i32
    return %c0_i32, %c0_i32_0 : i32, i32
  }
  func.func @transform_10(%arg0: i32) -> (i32, i32, i32) {
    %c0_i32 = arith.constant 0 : i32
    %c0_i32_0 = arith.constant 0 : i32
    %c0_i32_1 = arith.constant 0 : i32
    return %arg0, %c0_i32, %c0_i32_0 : i32, i32, i32
  }
}

</mosaic_0001>

<bundles_post_ra>
// kernel: simple_model_v2_forward.1
= control target key start
LH: loop header
LB: loop body
LE: loop exit
PB: predicated region body
PF: predicated region fallthrough
CT: control target
= control target key end

     0   :  { %15 = vsyncpa [#allocation3], 0  ;;  %s8858_s0 = inlined_call_operand.vmem [shape: bf16[2,32,320], index: 0, kind: input, shape index: {}]   ;;  %s8859_s1 = inlined_call_operand.vmem [shape: bf16[2,32,320], index: 1, kind: input, shape index: {}]   ;;  %s8860_s2 = inlined_call_operand.vmem [shape: bf16[320,280], index: 2, kind: input, shape index: {}]   ;;  %s8861_s3 = inlined_call_operand.vmem [shape: bf16[320,280], index: 3, kind: input, shape index: {}]   ;;  %s8862_s4 = inlined_call_operand.vmem [shape: f32[1,280], index: 4, kind: input, shape index: {}]   ;;  %s8863_s5 = inlined_call_operand.vmem [shape: bf16[280,2048], index: 5, kind: input, shape index: {}]   ;;  %s8864_s6 = inlined_call_operand.vmem [shape: f32[32,2048], index: 6, kind: input, shape index: {}]   ;;  %s8865_s7 = inlined_call_operand.vmem [shape: f32[1,64], index: 7, kind: input, shape index: {}]   ;;  %s8866_s8 = inlined_call_operand.vmem [shape: f32[64,128], index: 8, kind: input, shape index: {}]   ;;  %s8867_s9 = inlined_call_operand.vmem [shape: f32[1,128], index: 9, kind: input, shape index: {}]   ;;  %s8868_s10 = inlined_call_operand.hbm [shape: f32[2,1,128], index: 10, kind: output, shape index: {}]  }
   0x1   :  { %17 = vsyncpa [#allocation3 + $0x1], 0  ;;  %s6360_s13 = smov 0   ;;  %s6362_s14 = smov 0  }
   0x2   :  { %s6364_s15 = smov 0   ;;  %s6366_s16 = smov 0  }
   0x3 LB: > { %s6381_s17 = sadd.s32 4294967295, %s6297_s16   ;;  %s5208_s18 = sadd.s32 4294967294, %s6297_s16   ;;  %s6297_s16 = sphi %s6366_s16, %s9082_s16   ;;  %s6293_s15 = sphi %s6364_s15, %s9081_s15   ;;  %s6289_s14 = sphi %s6362_s14, %s9080_s14   ;;  %s6285_s13 = sphi %s6360_s13, %s9079_s13  }
   0x4   : > { %s6385_s19 = sadd.s32 1, %s6297_s16   ;;  %s250_s20 = sadd.s32 1, %s6293_s15 }
   0x5   : > { %s247_s21 = ssub.s32 %s6297_s16, %s6385_s19  ;;  %p260_p0 = scmp.ne.s32.totalorder %s6293_s15, %s6289_s14 }
   0x6   : > { %p248_p1 = scmp.eq.s32.totalorder %s247_s21, 0  ;;  %p261_p2 = scmp.eq.s32.totalorder %s6381_s17, 1 }
   0x7   : > { %p266_p3 = scmp.ne.s32.totalorder %s6289_s14, %s6285_s13  ;;  %p267_p4 = scmp.eq.s32.totalorder %s5208_s18, 1 }
   0x8   : > { %s6396_s22 = scalar_select %p248_p1, %s6293_s15, %s250_s20  }
   0x9   : > { %p6398_p5 = por %p261_p2, %p260_p0  ;;  %p6402_p6 = por %p267_p4, %p266_p3 }
   0xa   : > { %p5211_p7 = scmp.ge.s32.totalorder %s6297_s16, 1  ;;  %p325_p8 = scmp.lt.s32.totalorder %s6297_s16, 3 }
   0xc   : > { %p326_p9 = pnand %p5211_p7, %p325_p8 }
   0xe   : > { %329 = sbr.rel (%p326_p9) target bundleno = 1360 (0x550), region = 60 }
  0x15   : > { %v6411_v0 = vld [vmem:[%s8860_s2 + $0x4] ss:$12 sps:$4 sm:$0xff]   ;;  %v6416_v1 = vld [vmem:[%s8860_s2 + $0xc8] ss:$12 sps:$4 sm:$0xff]   ;;  %v6422_v2 = vld [vmem:[%s8860_s2] ss:$12 sps:$4 sm:$0xff]  }
  0x16   : > { %911 = vmatprep.subr.bf16.mxu0 %v6411_v0  ;;  %5678 = vmatprep.subr.bf16.mxu1 %v6416_v1  ;;  %v6428_v3 = vld [vmem:[%s8860_s2 + $0x8] ss:$12 sps:$4 sm:$0xff]   ;;  %v6440_v5 = vld [vmem:[%s8860_s2 + $0xe0] ss:$12 sps:$4 sm:$0xff]   ;;  %v6445_v6 = vld [vmem:[%s8860_s2 + $0x18] ss:$12 sps:$4 sm:$0xff]  }
  0x17   : > { %912 = vmatpush1.bf16.msra.mxu0 %v6422_v2  ;;  %v6434_v4 = vld [vmem:[%s8860_s2 + $0x1c] ss:$12 sps:$4 sm:$0xff]   ;;  %5679 = vmatpush3.bf16.msra.mxu1 %v6428_v3  ;;  %v6451_v7 = vld [vmem:[%s8860_s2 + $0x20] ss:$12 sps:$4 sm:$0xff]   ;;  %v6463_v9 = vld [vmem:[%s8860_s2 + $0xf8] ss:$12 sps:$4 sm:$0xff]  }
  0x18   : > { %913 = vmatprep.subr.bf16.mxu0 %v6434_v4  ;;  %5680 = vmatprep.subr.bf16.mxu1 %v6440_v5  ;;  %v6457_v8 = vld [vmem:[%s8860_s2 + $0x34] ss:$12 sps:$4 sm:$0xff]   ;;  %v6468_v10 = vld [vmem:[%s8860_s2 + $0x30] ss:$12 sps:$4 sm:$0xff]   ;;  %v6475_v11 = vld [vmem:[%s8860_s2 + $0x38] ss:$12 sps:$4 sm:$0xff]  }
  0x19   : > { %v6481_v12 = vld [vmem:[%s8860_s2 + $0x4c] ss:$12 sps:$4 sm:$0xff]   ;;  %p367_p10 = scmp.lt.s32.totalorder %s6381_s17, 1  ;;  %v6487_v13 = vld [vmem:[%s8860_s2 + $0x110] ss:$12 sps:$4 sm:$0xff]   ;;  %vm904_vm0 = vcmask 523264  }
  0x1a   : > { %v6493_v14 = vld [vmem:[%s8860_s2 + $0x48] ss:$12 sps:$4 sm:$0xff]   ;;  %v6500_v15 = vld [vmem:[%s8860_s2 + $0x50] ss:$12 sps:$4 sm:$0xff]   ;;  %v6516_v18 = vld [vmem:[%s8860_s2 + $0x60] ss:$12 sps:$4 sm:$0xff]  }
  0x1b   : > { %914 = vmatpush1.bf16.msra.mxu0 %v6445_v6  ;;  %5681 = vmatpush3.bf16.msra.mxu1 %v6451_v7  ;;  %v6506_v16 = vld [vmem:[%s8860_s2 + $0x64] ss:$12 sps:$4 sm:$0xff]   ;;  %v6511_v17 = vld [vmem:[%s8860_s2 + $0x128] ss:$12 sps:$4 sm:$0xff]   ;;  %s6525_s12 = scalar_select %p367_p10, %s6381_s17, 1  ;;  %vm3853_vm1 = vcmask 1043456  }
  0x1c   : > { %915 = vmatprep.subr.bf16.mxu0 %v6457_v8  ;;  %5682 = vmatprep.subr.bf16.mxu1 %v6463_v9  ;;  %v6522_v19 = vld [vmem:[%s8860_s2 + $0x68] ss:$12 sps:$4 sm:$0xff]   ;;  %v6538_v21 = vld [vmem:[%s8860_s2 + $0x140] ss:$12 sps:$4 sm:$0xff]   ;;  %v6543_v22 = vld [vmem:[%s8860_s2 + $0x78] ss:$12 sps:$4 sm:$0xff]  }
  0x1d   : > { %v6532_v20 = vld [vmem:[%s8860_s2 + $0x7c] ss:$12 sps:$4 sm:$0xff]   ;;  %v6549_v23 = vld [vmem:[%s8860_s2 + $0x80] ss:$12 sps:$4 sm:$0xff]   ;;  %s5998_s30 = smul.u32 48, %s6525_s12  ;;  %vm3846_vm2 = vcmask 195584  }
  0x1e   : > { %v6557_v24 = vld [vmem:[%s8860_s2 + $0x94] ss:$12 sps:$4 sm:$0xff]   ;;  %v6563_v25 = vld [vmem:[%s8860_s2 + $0x158] ss:$12 sps:$4 sm:$0xff]   ;;  %v6569_v26 = vld [vmem:[%s8860_s2 + $0x90] ss:$12 sps:$4 sm:$0xff]  }
  0x1f   : > { %916 = vmatpush1.bf16.msra.mxu0 %v6468_v10  ;;  %5683 = vmatpush3.bf16.msra.mxu1 %v6475_v11  ;;  %s6576_s29 = scalar_lea.vmem %s8858_s0, %s5998_s30  ;;  %v6583_v27 = vld [vmem:[%s8860_s2 + $0x98] ss:$12 sps:$4 sm:$0xff]   ;;  %v6594_v29 = vld [vmem:[%s8860_s2 + $0x170] ss:$12 sps:$4 sm:$0xff]   ;;  %v6603_v31 = vld [vmem:[%s8860_s2 + $0xa8] ss:$12 sps:$4 sm:$0xff]   ;;  %s7045_s21 = scalar_lea.vmem %s8859_s1, %s5998_s30 }
  0x20   : > { %917 = vmatprep.subr.bf16.mxu0 %v6481_v12  ;;  %5684 = vmatprep.subr.bf16.mxu1 %v6487_v13  ;;  %v6588_v28 = vld [vmem:[%s8860_s2 + $0xac] ss:$12 sps:$4 sm:$0xff]   ;;  %v6597_v30 = vld [vmem:[%s6576_s29 + $0x4] ss:$12 sps:$4 sm:$0xff]   ;;  %v6622_v34 = vld [vmem:[%s8860_s2 + $0x188] ss:$12 sps:$4 sm:$0xff]  }
  0x21   : > { %v6608_v32 = vld [vmem:[%s8860_s2 + $0xb0] ss:$12 sps:$4 sm:$0xff]   ;;  %1049 = vmatprep.mubr.bf16.mxu1 %v6597_v30  ;;  %943 = vmatprep.mubr.bf16.mxu0 %v6597_v30  ;;  %v6627_v35 = vld [vmem:[%s6576_s29] ss:$12 sps:$4 sm:$0xff]   ;;  %v6655_v40 = vld [vmem:[%s8860_s2 + $0xd8] ss:$12 sps:$4 sm:$0xff]  }
  0x22   : > { %v6615_v33 = vld [vmem:[%s8860_s2 + $0xc4] ss:$12 sps:$4 sm:$0xff]   ;;  %v6632_v36 = vld [vmem:[%s8860_s2 + $0xc0] ss:$12 sps:$4 sm:$0xff]   ;;  %v6639_v37 = vld [vmem:[%s8860_s2 + $0xdc] ss:$12 sps:$4 sm:$0xff]  }
  0x23   : > { %918 = vmatpush1.bf16.msra.mxu0 %v6493_v14  ;;  %5685 = vmatpush3.bf16.msra.mxu1 %v6500_v15  ;;  %v6645_v38 = vld [vmem:[%s8860_s2 + $0x1a0] ss:$12 sps:$4 sm:$0xff]   ;;  %v6648_v39 = vld [vmem:[%s6576_s29 + $0x1c] ss:$12 sps:$4 sm:$0xff]   ;;  %v6669_v42 = vld [vmem:[%s8860_s2 + $0x1b8] ss:$12 sps:$4 sm:$0xff]  }
  0x24   : > { %919 = vmatprep.subr.bf16.mxu0 %v6506_v16  ;;  %5686 = vmatprep.subr.bf16.mxu1 %v6511_v17  ;;  %v6662_v41 = vld [vmem:[%s8860_s2 + $0xf4] ss:$12 sps:$4 sm:$0xff]   ;;  %v6672_v43 = vld [vmem:[%s6576_s29 + $0x18] ss:$12 sps:$4 sm:$0xff]   ;;  %v6678_v44 = vld [vmem:[%s8860_s2 + $0xf0] ss:$12 sps:$4 sm:$0xff]  }
  0x25   : > { %v6685_v45 = vld [vmem:[%s8860_s2 + $0x10c] ss:$12 sps:$4 sm:$0xff]   ;;  %v6691_v46 = vld [vmem:[%s8860_s2 + $0x1d0] ss:$12 sps:$4 sm:$0xff]   ;;  %v6694_v47 = vld [vmem:[%s6576_s29 + $0x8] ss:$12 sps:$4 sm:$0xff]  }
  0x26   : > { %v6701_v48 = vld [vmem:[%s8860_s2 + $0x108] ss:$12 sps:$4 sm:$0xff]   ;;  %v6708_v49 = vld [vmem:[%s8860_s2 + $0x124] ss:$12 sps:$4 sm:$0xff]   ;;  %v6719_v51 = vld [vmem:[%s6576_s29 + $0x20] ss:$12 sps:$4 sm:$0xff]  }
  0x27   : > { %920 = vmatpush1.bf16.msra.mxu0 %v6516_v18  ;;  %5687 = vmatpush3.bf16.msra.mxu1 %v6522_v19  ;;  %v6716_v50 = vld [vmem:[%s8861_s3 + $0x4] ss:$12 sps:$4 sm:$0xff]   ;;  %v6725_v52 = vld [vmem:[%s8861_s3] ss:$12 sps:$4 sm:$0xff]   ;;  %v6737_v54 = vld [vmem:[%s8860_s2 + $0x13c] ss:$12 sps:$4 sm:$0xff]  }
  0x28   : > { %921 = vmatprep.subr.bf16.mxu0 %v6532_v20  ;;  %5688 = vmatprep.subr.bf16.mxu1 %v6538_v21  ;;  %v6730_v53 = vld [vmem:[%s8860_s2 + $0x120] ss:$12 sps:$4 sm:$0xff]   ;;  %v6743_v55 = vld [vmem:[%s8861_s3 + $0x1c] ss:$12 sps:$4 sm:$0xff]   ;;  %v6751_v56 = vld [vmem:[%s8860_s2 + $0x138] ss:$12 sps:$4 sm:$0xff]  }
  0x29   : > { %8937 = vst [vmem:[#allocation5_spill] sm:$0xff] %v6751_v56  ;;  %v6758_v57 = vld [vmem:[%s8861_s3 + $0x18] ss:$12 sps:$4 sm:$0xff]   ;;  %v6763_v58 = vld [vmem:[%s8860_s2 + $0x154] ss:$12 sps:$4 sm:$0xff]   ;;  %vm6301_vm3 = vmmov 0  }
  0x2a   : > { %8938 = vst [vmem:[#allocation6_spill] sm:$0xff] %v6758_v57  ;;  %8939 = vst [vmem:[#allocation7_spill] sm:$0xff] %v6763_v58  ;;  %v6769_v59 = vld [vmem:[%s8861_s3 + $0x34] ss:$12 sps:$4 sm:$0xff]   ;;  %v6776_v60 = vld [vmem:[%s8860_s2 + $0x150] ss:$12 sps:$4 sm:$0xff]  }
  0x2b   : > { %922 = vmatpush1.bf16.msra.mxu0 %v6543_v22  ;;  %5689 = vmatpush3.bf16.msra.mxu1 %v6549_v23  ;;  %8940 = vst [vmem:[#allocation8_spill] sm:$0xff] %v6769_v59  ;;  %8941 = vst [vmem:[#allocation9_spill] sm:$0xff] %v6776_v60  ;;  %v6783_v61 = vld [vmem:[%s8861_s3 + $0x30] ss:$12 sps:$4 sm:$0xff]   ;;  %v6788_v62 = vld [vmem:[%s8860_s2 + $0x16c] ss:$12 sps:$4 sm:$0xff]  }
  0x2c   : > { %923 = vmatprep.subr.bf16.mxu0 %v6557_v24  ;;  %5690 = vmatprep.subr.bf16.mxu1 %v6563_v25  ;;  %8942 = vst [vmem:[#allocation10_spill] sm:$0xff] %v6783_v61  ;;  %8943 = vst [vmem:[#allocation11_spill] sm:$0xff] %v6788_v62  ;;  %v6794_v63 = vld [vmem:[%s8861_s3 + $0x4c] ss:$12 sps:$4 sm:$0xff]   ;;  %s6303_s11 = smov 64   ;;  %s365_s29 = sand.u32 1, %s6289_s14  }
  0x2d   : > { %8944 = vst [vmem:[#allocation12_spill] sm:$0xff] %v6794_v63  ;;  %s5675_s27 = sshll.u32 %s6381_s17, 4  ;;  %s366_s12 = scalar_lea.vmem [#allocation2], %s365_s29 }
  0x2e   : > { %s5141_s28 = sshll.u32 %s366_s12, 4  ;;  %s5129_s18 = scalar_lea.sflag [#allocation3], %s365_s29  ;;  %s8818_s28 = int_to_ptr.vmem [resolvable:$true] %s5141_s28 }
  0x2f   : > { %924 = vmatpush1.bf16.msra.mxu0 %v6569_v26  ;;  %5691 = vmatpush3.bf16.msra.mxu1 %v6583_v27  ;;  %s6235_s20 = scalar_lea.vmem %s8818_s28, 16  ;;  %s6304_s17 = smov [#allocation2]  }
  0x30   : > { %925 = vmatprep.subr.bf16.mxu0 %v6588_v28  ;;  %5692 = vmatprep.subr.bf16.mxu1 %v6594_v29  ;;  %p6236_p11 = scmp.ne.s32.totalorder %s8818_s28, %s6235_s20  ;;  %s6239_s25 = sshll.u32 %s6304_s17, 4  ;;  %s6240_s25 = int_to_ptr.vmem [resolvable:$false] %s6239_s25 }
  0x31   : > { %s6241_s26 = scalar_lea.vmem %s6240_s25, 32  ;;  %p6242_p0 = scmp.lt.s32.totalorder %s8818_s28, %s6240_s25 }
  0x32   : > { %p6237_p12 = pnand %p6236_p11, %p6398_p5  ;;  %p6243_p1 = scmp.lt.s32.totalorder %s6241_s26, %s6235_s20 }
  0x33   : > { %926 = vmatpush1.bf16.msra.mxu0 %v6603_v31  ;;  %5693 = vmatpush3.bf16.msra.mxu1 %v6608_v32 }
  0x34   : > { %927 = vmatprep.subr.bf16.mxu0 %v6615_v33  ;;  %5823 = vmatprep.subr.bf16.mxu1 %v6622_v34  ;;  %p6238_p13 = pneg %p6237_p12  ;;  %p6244_p2 = por %p6243_p1, %p6242_p0 }
  0x36   : > { %1050 = vmatmul.mubr.bf16.vlgmr.msra.gmra.mrb[0].mxu1 %v6627_v35  ;;  %p6245_p3 = pnand %p6244_p2, %p6238_p13 }
  0x37   : > { %928 = vmatpush1.bf16.msra.mxu0 %v6632_v36  ;;  %5824 = vmatpush3.bf16.msra.mxu1 %v6622_v34 }
  0x38   : > { %929 = vmatprep.subr.bf16.mxu0 %v6639_v37  ;;  %5825 = vmatprep.subr.bf16.mxu1 %v6645_v38 }
  0x39   : > { %1057 = vmatprep.mubr.bf16.mxu1 %v6648_v39 }
  0x3b   : > { %930 = vmatpush1.bf16.msra.mxu0 %v6655_v40  ;;  %5826 = vmatpush3.bf16.msra.mxu1 %v6645_v38 }
  0x3c   : > { %931 = vmatprep.subr.bf16.mxu0 %v6662_v41  ;;  %5827 = vmatprep.subr.bf16.mxu1 %v6669_v42 }
  0x3e   : > { %1058 = vmatmul.mubr.bf16.gmra.mrb[4].mxu1 %v6672_v43 }
  0x3f   : > { %932 = vmatpush1.bf16.msra.mxu0 %v6678_v44  ;;  %5828 = vmatpush3.bf16.msra.mxu1 %v6669_v42 }
  0x40   : > { %933 = vmatprep.subr.bf16.mxu0 %v6685_v45  ;;  %5829 = vmatprep.subr.bf16.mxu1 %v6691_v46 }
  0x41   : > { %5831 = vmatprep.mubr.msk.bf16.mxu1 %vm904_vm0, %v6694_v47 }
  0x43   : > { %934 = vmatpush1.bf16.msra.mxu0 %v6701_v48  ;;  %5830 = vmatpush3.bf16.msra.mxu1 %v6691_v46 }
  0x44   : > { %935 = vmatprep.subr.bf16.mxu0 %v6708_v49  ;;  %1435 = vmatprep.subr.bf16.mxu1 %v6716_v50 }
  0x46   : > { %5832 = vmatmul.mubr.msk.bf16.vlgmr.msra.gmra.mrb[8].mxu1 %vm904_vm0, %v6719_v51 }
  0x47   : > { %936 = vmatpush1.bf16.msra.mxu0 %v6730_v53  ;;  %1436 = vmatpush1.bf16.msra.mxu1 %v6725_v52 }
  0x48   : > { %937 = vmatprep.subr.bf16.mxu0 %v6737_v54  ;;  %1437 = vmatprep.subr.bf16.mxu1 %v6743_v55 }
  0x49   : > { %1467 = vmatprep.mubr.bf16.mxu1 %v6597_v30 }
  0x4b   : > { %938 = vmatpush1.bf16.msra.mxu0 %v6751_v56  ;;  %1438 = vmatpush1.bf16.msra.mxu1 %v6758_v57  ;;  %v6812_v57 = vld [vmem:[%s8860_s2 + $0x184] ss:$12 sps:$4 sm:$0xff]  }
  0x4c   : > { %939 = vmatprep.subr.bf16.mxu0 %v6763_v58  ;;  %1439 = vmatprep.subr.bf16.mxu1 %v6769_v59  ;;  %v6800_v58 = vld [vmem:[%s8860_s2 + $0x168] ss:$12 sps:$4 sm:$0xff]   ;;  %8947 = vst [vmem:[#allocation15_spill] sm:$0xff] %v6812_v57  ;;  %v6918_v56 = vld [vmem:[%s8861_s3 + $0xc4] ss:$12 sps:$4 sm:$0xff]  }
  0x4d   : > { %8945 = vst [vmem:[#allocation13_spill] sm:$0xff] %v6800_v58  ;;  %v6807_v59 = vld [vmem:[%s8861_s3 + $0x48] ss:$12 sps:$4 sm:$0xff]   ;;  %8964 = vst [vmem:[#allocation32_spill] sm:$0xff] %v6918_v56 }
  0x4e   : > { %8946 = vst [vmem:[#allocation14_spill] sm:$0xff] %v6807_v59 }
  0x4f   : > { %940 = vmatpush1.bf16.msra.mxu0 %v6776_v60  ;;  %1440 = vmatpush1.bf16.msra.mxu1 %v6783_v61  ;;  %v6818_v60 = vld [vmem:[%s8861_s3 + $0x64] ss:$12 sps:$4 sm:$0xff]   ;;  %v6829_v61 = vld [vmem:[%s8861_s3 + $0x60] ss:$12 sps:$4 sm:$0xff]  }
  0x50   : > { %941 = vmatprep.subr.bf16.mxu0 %v6788_v62  ;;  %1441 = vmatprep.subr.bf16.mxu1 %v6794_v63  ;;  %8948 = vst [vmem:[#allocation16_spill] sm:$0xff] %v6818_v60  ;;  %v6823_v62 = vld [vmem:[%s8860_s2 + $0x180] ss:$12 sps:$4 sm:$0xff]   ;;  %8950 = vst [vmem:[#allocation18_spill] sm:$0xff] %v6829_v61  ;;  %v6836_v63 = vld [vmem:[%s8860_s2 + $0x19c] ss:$12 sps:$4 sm:$0xff]  }
  0x51   : > { %8949 = vst [vmem:[#allocation17_spill] sm:$0xff] %v6823_v62  ;;  %8951 = vst [vmem:[#allocation19_spill] sm:$0xff] %v6836_v63 }
  0x53   : > { %942 = vmatpush1.bf16.msra.mxu0 %v6800_v58  ;;  %1442 = vmatpush1.bf16.msra.mxu1 %v6807_v59  ;;  %v6842_v58 = vld [vmem:[%s8861_s3 + $0x7c] ss:$12 sps:$4 sm:$0xff]   ;;  %v6868_v59 = vld [vmem:[%s8861_s3 + $0x94] ss:$12 sps:$4 sm:$0xff]  }
  0x54   : > { %964 = vmatprep.subr.bf16.mxu0 %v6812_v57  ;;  %1443 = vmatprep.subr.bf16.mxu1 %v6818_v60  ;;  %8952 = vst [vmem:[#allocation20_spill] sm:$0xff] %v6842_v58  ;;  %v6849_v57 = vld [vmem:[%s8860_s2 + $0x198] ss:$12 sps:$4 sm:$0xff]   ;;  %8956 = vst [vmem:[#allocation24_spill] sm:$0xff] %v6868_v59 }
  0x55   : > { %8953 = vst [vmem:[#allocation21_spill] sm:$0xff] %v6849_v57  ;;  %v6857_v60 = vld [vmem:[%s8861_s3 + $0x78] ss:$12 sps:$4 sm:$0xff]  }
  0x56   : > { %944 = vmatmul.mubr.bf16.vlgmr.msra.gmra.mrb[0].mxu0 %v6627_v35  ;;  %8954 = vst [vmem:[#allocation22_spill] sm:$0xff] %v6857_v60 }
  0x57   : > { %965 = vmatpush1.bf16.msra.mxu0 %v6823_v62  ;;  %953 = vmatprep.mubr.bf16.mxu0 %v6648_v39  ;;  %v6862_v62 = vld [vmem:[%s8860_s2 + $0x1b4] ss:$12 sps:$4 sm:$0xff]  }
  0x58   : > { %1444 = vmatpush1.bf16.msra.mxu1 %v6829_v61  ;;  %966 = vmatprep.subr.bf16.mxu0 %v6836_v63  ;;  %8955 = vst [vmem:[#allocation23_spill] sm:$0xff] %v6862_v62  ;;  %v6873_v63 = vld [vmem:[%s8860_s2 + $0x1b0] ss:$12 sps:$4 sm:$0xff]  }
  0x59   : > { %1445 = vmatprep.subr.bf16.mxu1 %v6842_v58  ;;  %8957 = vst [vmem:[#allocation25_spill] sm:$0xff] %v6873_v63  ;;  %v6879_v61 = vld [vmem:[%s8861_s3 + $0x90] ss:$12 sps:$4 sm:$0xff]   ;;  %v6886_v58 = vld [vmem:[%s8860_s2 + $0x1cc] ss:$12 sps:$4 sm:$0xff]  }
  0x5a   : > { %8958 = vst [vmem:[#allocation26_spill] sm:$0xff] %v6879_v61  ;;  %8959 = vst [vmem:[#allocation27_spill] sm:$0xff] %v6886_v58 }
  0x5b   : > { %967 = vmatpush1.bf16.msra.mxu0 %v6849_v57  ;;  %v6892_v57 = vld [vmem:[%s8861_s3 + $0xac] ss:$12 sps:$4 sm:$0xff]  }
  0x5c   : > { %1446 = vmatpush1.bf16.msra.mxu1 %v6857_v60  ;;  %968 = vmatprep.subr.bf16.mxu0 %v6862_v62  ;;  %8960 = vst [vmem:[#allocation28_spill] sm:$0xff] %v6892_v57  ;;  %v6899_v62 = vld [vmem:[%s8860_s2 + $0x1c8] ss:$12 sps:$4 sm:$0xff]  }
  0x5d   : > { %1447 = vmatprep.subr.bf16.mxu1 %v6868_v59  ;;  %8961 = vst [vmem:[#allocation29_spill] sm:$0xff] %v6899_v62  ;;  %v6904_v60 = vld [vmem:[%s8861_s3 + $0xa8] ss:$12 sps:$4 sm:$0xff]   ;;  %v8890_v59 = vmov 0  }
  0x5e   : > { %954 = vmatmul.mubr.bf16.gmra.mrb[4].mxu0 %v6672_v43  ;;  %8962 = vst [vmem:[#allocation30_spill] sm:$0xff] %v6904_v60 }
  0x5f   : > { %969 = vmatpush1.bf16.msra.mxu0 %v6873_v63  ;;  %996 = vmatprep.mubr.bf16.mxu0 %v8890_v59  ;;  %v6912_v63 = vld [vmem:[%s8861_s3 + $0xc8] ss:$12 sps:$4 sm:$0xff]   ;;  %v6923_v59 = vld [vmem:[%s8861_s3 + $0xc0] ss:$12 sps:$4 sm:$0xff]  }
  0x60   : > { %1448 = vmatpush1.bf16.msra.mxu1 %v6879_v61  ;;  %970 = vmatprep.subr.bf16.mxu0 %v6886_v58  ;;  %8963 = vst [vmem:[#allocation31_spill] sm:$0xff] %v6912_v63  ;;  %8965 = vst [vmem:[#allocation33_spill] sm:$0xff] %v6923_v59  ;;  %v6929_v58 = vld [vmem:[%s8861_s3 + $0x8] ss:$12 sps:$4 sm:$0xff]   ;;  %v6963_v61 = vld [vmem:[%s8861_s3 + $0xf8] ss:$12 sps:$4 sm:$0xff]  }
  0x61   : > { %1449 = vmatprep.subr.bf16.mxu1 %v6892_v57  ;;  %8966 = vst [vmem:[#allocation34_spill] sm:$0xff] %v6929_v58  ;;  %v6936_v57 = vld [vmem:[%s8861_s3 + $0xe0] ss:$12 sps:$4 sm:$0xff]   ;;  %8972 = vst [vmem:[#allocation39_spill] sm:$0xff] %v6963_v61 }
  0x62   : > { %8967 = vst [vmem:[#allocation35_spill] sm:$0xff] %v6936_v57 }
  0x63   : > { %971 = vmatpush1.bf16.msra.mxu0 %v6899_v62  ;;  %v6942_v62 = vld [vmem:[%s8861_s3 + $0xdc] ss:$12 sps:$4 sm:$0xff]  }
  0x64   : > { %1450 = vmatpush1.bf16.msra.mxu1 %v6904_v60  ;;  %5712 = vmatprep.subr.bf16.mxu0 %v6912_v63  ;;  %8968 = vst [vmem:[#allocation36_spill] sm:$0xff] %v6942_v62  ;;  %v6949_v60 = vld [vmem:[%s8861_s3 + $0xd8] ss:$12 sps:$4 sm:$0xff]   ;;  %v6955_v63 = vld [vmem:[%s8861_s3 + $0x20] ss:$12 sps:$4 sm:$0xff]  }
  0x65   : > { %1451 = vmatprep.subr.bf16.mxu1 %v6918_v56  ;;  %8969 = vst [vmem:[#allocation37_spill] sm:$0xff] %v6949_v60  ;;  %8970 = vst [vmem:[#allocation38_spill] sm:$0xff] %v6955_v63  ;;  %v8971_v56 = vmov 0  }
  0x66   : > { %5280 = vmatmul.mubr.msk.bf16.vlgmr.msra.gmra.mrb[0].mxu0 %vm904_vm0, %v6694_v47 }
  0x67   : > { %5713 = vmatpush3.bf16.msra.mxu0 %v6929_v58  ;;  %1006 = vmatprep.mubr.bf16.mxu0 %v8971_v56  ;;  %v6969_v58 = vld [vmem:[%s8861_s3 + $0xf4] ss:$12 sps:$4 sm:$0xff]  }
  0x68   : > { %1452 = vmatpush1.bf16.msra.mxu1 %v6923_v59  ;;  %5714 = vmatprep.subr.bf16.mxu0 %v6936_v57  ;;  %8973 = vst [vmem:[#allocation40_spill] sm:$0xff] %v6969_v58  ;;  %v6975_v59 = vld [vmem:[%s8861_s3 + $0x38] ss:$12 sps:$4 sm:$0xff]   ;;  %v6981_v57 = vld [vmem:[%s8861_s3 + $0xf0] ss:$12 sps:$4 sm:$0xff]  }
  0x69   : > { %1453 = vmatprep.subr.bf16.mxu1 %v6942_v62  ;;  %8974 = vst [vmem:[#allocation41_spill] sm:$0xff] %v6975_v59  ;;  %v6987_v62 = vld [vmem:[%s8861_s3 + $0x110] ss:$12 sps:$4 sm:$0xff]  }
  0x6a   : > { %8975 = vst [vmem:[#allocation42_spill] sm:$0xff] %v6987_v62 }
  0x6b   : > { %5715 = vmatpush3.bf16.msra.mxu0 %v6955_v63  ;;  %v6993_v63 = vld [vmem:[%s8861_s3 + $0x10c] ss:$12 sps:$4 sm:$0xff]  }
  0x6c   : > { %1454 = vmatpush1.bf16.msra.mxu1 %v6949_v60  ;;  %5716 = vmatprep.subr.bf16.mxu0 %v6963_v61  ;;  %8976 = vst [vmem:[#allocation43_spill] sm:$0xff] %v6993_v63  ;;  %v7000_v61 = vld [vmem:[%s8861_s3 + $0x108] ss:$12 sps:$4 sm:$0xff]  }
  0x6d   : > { %1455 = vmatprep.subr.bf16.mxu1 %v6969_v58  ;;  %8977 = vst [vmem:[#allocation44_spill] sm:$0xff] %v7000_v61  ;;  %v7006_v58 = vld [vmem:[%s8861_s3 + $0x50] ss:$12 sps:$4 sm:$0xff]   ;;  %v7014_v60 = vld [vmem:[%s8861_s3 + $0x128] ss:$12 sps:$4 sm:$0xff]  }
  0x6e   : > { %5281 = vmatmul.mubr.msk.bf16.gmra.mrb[4].mxu0 %vm904_vm0, %v6719_v51  ;;  %8978 = vst [vmem:[#allocation45_spill] sm:$0xff] %v7006_v58  ;;  %8979 = vst [vmem:[#allocation46_spill] sm:$0xff] %v7014_v60 }
  0x6f   : > { %5717 = vmatpush3.bf16.msra.mxu0 %v6975_v59  ;;  %1573 = vmatprep.mubr.bf16.mxu0 %v6597_v30  ;;  %v7020_v59 = vld [vmem:[%s8861_s3 + $0x124] ss:$12 sps:$4 sm:$0xff]   ;;  %v7026_v30 = vld [vmem:[%s8861_s3 + $0x120] ss:$12 sps:$4 sm:$0xff]  }
  0x70   : > { %1456 = vmatpush1.bf16.msra.mxu1 %v6981_v57  ;;  %5718 = vmatprep.subr.bf16.mxu0 %v6987_v62  ;;  %8980 = vst [vmem:[#allocation47_spill] sm:$0xff] %v7020_v59  ;;  %8981 = vst [vmem:[#allocation48_spill] sm:$0xff] %v7026_v30  ;;  %v7031_v62 = vld [vmem:[%s8861_s3 + $0x68] ss:$12 sps:$4 sm:$0xff]  }
  0x71   : > { %1457 = vmatprep.subr.bf16.mxu1 %v6993_v63  ;;  %8982 = vst [vmem:[#allocation49_spill] sm:$0xff] %v7031_v62  ;;  %v7038_v63 = vld [vmem:[%s8861_s3 + $0x140] ss:$12 sps:$4 sm:$0xff]  }
  0x72   : > { %8983 = vst [vmem:[#allocation50_spill] sm:$0xff] %v7038_v63 }
  0x73   : > { %5719 = vmatpush3.bf16.msra.mxu0 %v7006_v58  ;;  %v7051_v58 = vld [vmem:[%s8861_s3 + $0x13c] ss:$12 sps:$4 sm:$0xff]  }
  0x74   : > { %1458 = vmatpush1.bf16.msra.mxu1 %v7000_v61  ;;  %5720 = vmatprep.subr.bf16.mxu0 %v7014_v60  ;;  %8984 = vst [vmem:[#allocation51_spill] sm:$0xff] %v7051_v58  ;;  %v7057_v60 = vld [vmem:[%s8861_s3 + $0x138] ss:$12 sps:$4 sm:$0xff]   ;;  %v7062_v61 = vld [vmem:[%s8861_s3 + $0x80] ss:$12 sps:$4 sm:$0xff]  }
  0x75   : > { %1459 = vmatprep.subr.bf16.mxu1 %v7020_v59  ;;  %8985 = vst [vmem:[#allocation52_spill] sm:$0xff] %v7057_v60  ;;  %8986 = vst [vmem:[#allocation53_spill] sm:$0xff] %v7062_v61  ;;  %v7069_v59 = vld [vmem:[%s8861_s3 + $0x158] ss:$12 sps:$4 sm:$0xff]  }
  0x76   : > { %8987 = vst [vmem:[#allocation54_spill] sm:$0xff] %v7069_v59 }
  0x77   : > { %5721 = vmatpush3.bf16.msra.mxu0 %v7031_v62  ;;  %v7075_v62 = vld [vmem:[%s8861_s3 + $0x154] ss:$12 sps:$4 sm:$0xff]  }
  0x78   : > { %1460 = vmatpush1.bf16.msra.mxu1 %v7026_v30  ;;  %5722 = vmatprep.subr.bf16.mxu0 %v7038_v63  ;;  %8988 = vst [vmem:[#allocation55_spill] sm:$0xff] %v7075_v62  ;;  %v7081_v30 = vld [vmem:[%s8861_s3 + $0x98] ss:$12 sps:$4 sm:$0xff]   ;;  %v7087_v63 = vld [vmem:[%s8861_s3 + $0x150] ss:$12 sps:$4 sm:$0xff]  }
  0x79   : > { %1461 = vmatprep.subr.bf16.mxu1 %v7051_v58  ;;  %8989 = vst [vmem:[#allocation56_spill] sm:$0xff] %v7081_v30  ;;  %v7093_v58 = vld [vmem:[%s8861_s3 + $0x170] ss:$12 sps:$4 sm:$0xff]  }
  0x7a   : > { %8990 = vst [vmem:[#allocation57_spill] sm:$0xff] %v7093_v58 }
  0x7b   : > { %5723 = vmatpush3.bf16.msra.mxu0 %v7062_v61  ;;  %v7099_v61 = vld [vmem:[%s8861_s3 + $0x16c] ss:$12 sps:$4 sm:$0xff]  }
  0x7c   : > { %1462 = vmatpush1.bf16.msra.mxu1 %v7057_v60  ;;  %5724 = vmatprep.subr.bf16.mxu0 %v7069_v59  ;;  %8991 = vst [vmem:[#allocation58_spill] sm:$0xff] %v7099_v61  ;;  %v7105_v60 = vld [vmem:[%s8861_s3 + $0xb0] ss:$12 sps:$4 sm:$0xff]   ;;  %v7111_v59 = vld [vmem:[%s8861_s3 + $0x168] ss:$12 sps:$4 sm:$0xff]  }
  0x7d   : > { %1463 = vmatprep.subr.bf16.mxu1 %v7075_v62  ;;  %8992 = vst [vmem:[#allocation59_spill] sm:$0xff] %v7105_v60  ;;  %8993 = vst [vmem:[#allocation60_spill] sm:$0xff] %v7111_v59  ;;  %v7117_v62 = vld [vmem:[%s8861_s3 + $0x188] ss:$12 sps:$4 sm:$0xff]  }
  0x7f   : > { %5725 = vmatpush3.bf16.msra.mxu0 %v7081_v30  ;;  %v7123_v30 = vld [vmem:[%s8861_s3 + $0x184] ss:$12 sps:$4 sm:$0xff]  }
  0x80   : > { %1464 = vmatpush1.bf16.msra.mxu1 %v7087_v63  ;;  %5726 = vmatprep.subr.bf16.mxu0 %v7093_v58  ;;  %8994 = vst [vmem:[#allocation61_spill] sm:$0xff] %v7123_v30  ;;  %v7130_v58 = vld [vmem:[%s8861_s3 + $0x180] ss:$12 sps:$4 sm:$0xff]  }
  0x81   : > { %1465 = vmatprep.subr.bf16.mxu1 %v7099_v61  ;;  %8995 = vst [vmem:[#allocation62_spill] sm:$0xff] %v7130_v58  ;;  %v7136_v61 = vld [vmem:[%s8861_s3 + $0x1a0] ss:$12 sps:$4 sm:$0xff]  }
  0x83   : > { %5727 = vmatpush3.bf16.msra.mxu0 %v7105_v60  ;;  %v7142_v60 = vld [vmem:[%s8861_s3 + $0x19c] ss:$12 sps:$4 sm:$0xff]  }
  0x84   : > { %1466 = vmatpush1.bf16.msra.mxu1 %v7111_v59  ;;  %5835 = vmatprep.subr.bf16.mxu0 %v7117_v62  ;;  %8996 = vst [vmem:[#allocation63_spill] sm:$0xff] %v7142_v60  ;;  %v7151_v59 = vld [vmem:[%s8861_s3 + $0x198] ss:$12 sps:$4 sm:$0xff]  }
  0x85   : > { %1488 = vmatprep.subr.bf16.mxu1 %v7123_v30  ;;  %8997 = vst [vmem:[#allocation64_spill] sm:$0xff] %v7151_v59  ;;  %v7157_v30 = vld [vmem:[%s8861_s3 + $0x1b8] ss:$12 sps:$4 sm:$0xff]  }
  0x86   : > { %1574 = vmatmul.mubr.bf16.vlgmr.msra.gmra.mrb[8].mxu0 %v6627_v35 }
  0x87   : > { %1468 = vmatmul.mubr.bf16.vlgmr.msra.gmra.mrb[12].mxu1 %v6627_v35  ;;  %5836 = vmatpush3.bf16.msra.mxu0 %v7117_v62  ;;  %v7164_v35 = vld [vmem:[%s8861_s3 + $0x1b4] ss:$12 sps:$4 sm:$0xff]  }
  0x88   : > { %1489 = vmatpush1.bf16.msra.mxu1 %v7130_v58  ;;  %5837 = vmatprep.subr.bf16.mxu0 %v7136_v61  ;;  %v7172_v58 = vld [vmem:[%s8861_s3 + $0x1b0] ss:$12 sps:$4 sm:$0xff]  }
  0x89   : > { %1490 = vmatprep.subr.bf16.mxu1 %v7142_v60  ;;  %1477 = vmatprep.mubr.bf16.mxu1 %v6648_v39  ;;  %v7178_v60 = vld [vmem:[%s8861_s3 + $0x1d0] ss:$12 sps:$4 sm:$0xff]  }
  0x8a   : > { %1581 = vmatprep.mubr.bf16.mxu0 %v6648_v39  ;;  %v7184_v39 = vld [vmem:[%s8861_s3 + $0x1cc] ss:$12 sps:$4 sm:$0xff]  }
  0x8b   : > { %5838 = vmatpush3.bf16.msra.mxu0 %v7136_v61 }
  0x8c   : > { %1491 = vmatpush1.bf16.msra.mxu1 %v7151_v59  ;;  %5839 = vmatprep.subr.bf16.mxu0 %v7157_v30  ;;  %v7193_v59 = vld [vmem:[%s8861_s3 + $0x1c8] ss:$12 sps:$4 sm:$0xff]  }
  0x8d   : > { %1492 = vmatprep.subr.bf16.mxu1 %v7164_v35 }
  0x8e   : > { %1582 = vmatmul.mubr.bf16.gmra.mrb[12].mxu0 %v6672_v43 }
  0x8f   : > { %1478 = vmatmul.mubr.bf16.gmra.mrb[16].mxu1 %v6672_v43  ;;  %5840 = vmatpush3.bf16.msra.mxu0 %v7157_v30  ;;  %v7212_v43 = vld [vmem:[%s7045_s21 + $0x4] ss:$12 sps:$4 sm:$0xff]  }
  0x90   : > { %1493 = vmatpush1.bf16.msra.mxu1 %v7172_v58  ;;  %5841 = vmatprep.subr.bf16.mxu0 %v7178_v60 }
  0x91   : > { %1494 = vmatprep.subr.bf16.mxu1 %v7184_v39  ;;  %1520 = vmatprep.mubr.bf16.mxu1 %v8971_v56 }
  0x92   : > { %5843 = vmatprep.mubr.msk.bf16.mxu0 %vm904_vm0, %v6694_v47 }
  0x93   : > { %5842 = vmatpush3.bf16.msra.mxu0 %v7178_v60 }
  0x94   : > { %1495 = vmatpush1.bf16.msra.mxu1 %v7193_v59  ;;  %1675 = vmatprep.subr.bf16.mxu0 %v6411_v0  ;;  %v7246_v0 = vld [vmem:[%s7045_s21] ss:$12 sps:$4 sm:$0xff]  }
  0x95   : > { %5746 = vmatprep.subr.bf16.mxu1 %v6416_v1  ;;  %v7252_v1 = vld [vmem:[%s7045_s21 + $0x1c] ss:$12 sps:$4 sm:$0xff]  }
  0x96   : > { %5844 = vmatmul.mubr.msk.bf16.vlgmr.msra.gmra.mrb[16].mxu0 %vm904_vm0, %v6719_v51 }
  0x97   : > { %5344 = vmatmul.mubr.msk.bf16.vlgmr.msra.gmra.mrb[12].mxu1 %vm904_vm0, %v6694_v47  ;;  %1676 = vmatpush1.bf16.msra.mxu0 %v6422_v2  ;;  %v7262_v2 = vld [vmem:[%s7045_s21 + $0x18] ss:$12 sps:$4 sm:$0xff]  }
  0x98   : > { %5747 = vmatpush3.bf16.msra.mxu1 %v6428_v3  ;;  %1677 = vmatprep.subr.bf16.mxu0 %v6434_v4  ;;  %v7268_v3 = vld [vmem:[%s7045_s21 + $0x8] ss:$12 sps:$4 sm:$0xff]   ;;  %v7279_v4 = vld [vmem:[%s7045_s21 + $0x20] ss:$12 sps:$4 sm:$0xff]  }
  0x99   : > { %5748 = vmatprep.subr.bf16.mxu1 %v6440_v5  ;;  %1530 = vmatprep.mubr.bf16.mxu1 %v8971_v56  ;;  %v8998_v5 = vld [vmem:[#allocation5_spill] sm:$0xff]  ;;  %v9036_v47 = vld [vmem:[#allocation43_spill] sm:$0xff] }
  0x9a   : > { %1707 = vmatprep.mubr.bf16.mxu0 %v7212_v43 }
  0x9b   : > { %1678 = vmatpush1.bf16.msra.mxu0 %v6445_v6  ;;  %v8999_v6 = vld [vmem:[#allocation6_spill] sm:$0xff] }
  0x9c   : > { %5749 = vmatpush3.bf16.msra.mxu1 %v6451_v7  ;;  %1679 = vmatprep.subr.bf16.mxu0 %v6457_v8  ;;  %v9000_v7 = vld [vmem:[#allocation7_spill] sm:$0xff]  ;;  %v9001_v8 = vld [vmem:[#allocation8_spill] sm:$0xff] }
  0x9d   : > { %5750 = vmatprep.subr.bf16.mxu1 %v6463_v9  ;;  %v9002_v9 = vld [vmem:[#allocation9_spill] sm:$0xff] }
  0x9f   : > { %5345 = vmatmul.mubr.msk.bf16.gmra.mrb[16].mxu1 %vm904_vm0, %v6719_v51  ;;  %1680 = vmatpush1.bf16.msra.mxu0 %v6468_v10  ;;  %v9003_v10 = vld [vmem:[#allocation10_spill] sm:$0xff]  ;;  %v9040_v51 = vld [vmem:[#allocation47_spill] sm:$0xff] }
  0xa0   : > { %5751 = vmatpush3.bf16.msra.mxu1 %v6475_v11  ;;  %1681 = vmatprep.subr.bf16.mxu0 %v6481_v12  ;;  %v9004_v11 = vld [vmem:[#allocation11_spill] sm:$0xff]  ;;  %v9005_v12 = vld [vmem:[#allocation12_spill] sm:$0xff] }
  0xa1   : > { %5752 = vmatprep.subr.bf16.mxu1 %v6487_v13  ;;  %1813 = vmatprep.mubr.bf16.mxu1 %v7212_v43  ;;  %v9006_v13 = vld [vmem:[#allocation13_spill] sm:$0xff] }
  0xa3   : > { %1682 = vmatpush1.bf16.msra.mxu0 %v6493_v14  ;;  %v9007_v14 = vld [vmem:[#allocation14_spill] sm:$0xff] }
  0xa4   : > { %5753 = vmatpush3.bf16.msra.mxu1 %v6500_v15  ;;  %1683 = vmatprep.subr.bf16.mxu0 %v6506_v16  ;;  %v9008_v15 = vld [vmem:[#allocation15_spill] sm:$0xff]  ;;  %v9009_v16 = vld [vmem:[#allocation16_spill] sm:$0xff] }
  0xa5   : > { %5754 = vmatprep.subr.bf16.mxu1 %v6511_v17  ;;  %v9010_v17 = vld [vmem:[#allocation17_spill] sm:$0xff] }
  0xa7   : > { %1684 = vmatpush1.bf16.msra.mxu0 %v6516_v18  ;;  %v9011_v18 = vld [vmem:[#allocation18_spill] sm:$0xff] }
  0xa8   : > { %5755 = vmatpush3.bf16.msra.mxu1 %v6522_v19  ;;  %1685 = vmatprep.subr.bf16.mxu0 %v6532_v20  ;;  %v9012_v19 = vld [vmem:[#allocation19_spill] sm:$0xff]  ;;  %v9013_v20 = vld [vmem:[#allocation20_spill] sm:$0xff] }
  0xa9   : > { %5756 = vmatprep.subr.bf16.mxu1 %v6538_v21  ;;  %v9014_v21 = vld [vmem:[#allocation21_spill] sm:$0xff] }
  0xab   : > { %1686 = vmatpush1.bf16.msra.mxu0 %v6543_v22  ;;  %v9015_v22 = vld [vmem:[#allocation22_spill] sm:$0xff] }
  0xac   : > { %5757 = vmatpush3.bf16.msra.mxu1 %v6549_v23  ;;  %1687 = vmatprep.subr.bf16.mxu0 %v6557_v24  ;;  %v9016_v23 = vld [vmem:[#allocation23_spill] sm:$0xff]  ;;  %v9017_v24 = vld [vmem:[#allocation24_spill] sm:$0xff] }
  0xad   : > { %5758 = vmatprep.subr.bf16.mxu1 %v6563_v25  ;;  %v9018_v25 = vld [vmem:[#allocation25_spill] sm:$0xff] }
  0xaf   : > { %1688 = vmatpush1.bf16.msra.mxu0 %v6569_v26  ;;  %v9019_v26 = vld [vmem:[#allocation26_spill] sm:$0xff] }
  0xb0   : > { %5759 = vmatpush3.bf16.msra.mxu1 %v6583_v27  ;;  %1689 = vmatprep.subr.bf16.mxu0 %v6588_v28  ;;  %v9020_v27 = vld [vmem:[#allocation27_spill] sm:$0xff]  ;;  %v9021_v28 = vld [vmem:[#allocation28_spill] sm:$0xff] }
  0xb1   : > { %5760 = vmatprep.subr.bf16.mxu1 %v6594_v29  ;;  %v9022_v29 = vld [vmem:[#allocation29_spill] sm:$0xff] }
  0xb3   : > { %1690 = vmatpush1.bf16.msra.mxu0 %v6603_v31  ;;  %v9023_v31 = vld [vmem:[#allocation30_spill] sm:$0xff] }
  0xb4   : > { %5761 = vmatpush3.bf16.msra.mxu1 %v6608_v32  ;;  %1691 = vmatprep.subr.bf16.mxu0 %v6615_v33  ;;  %v9024_v32 = vld [vmem:[#allocation31_spill] sm:$0xff]  ;;  %v9025_v33 = vld [vmem:[#allocation32_spill] sm:$0xff] }
  0xb5   : > { %5847 = vmatprep.subr.bf16.mxu1 %v6622_v34 }
  0xb7   : > { %1814 = vmatmul.mubr.bf16.vlgmr.msra.gmra.mrb[20].mxu1 %v7246_v0  ;;  %1692 = vmatpush1.bf16.msra.mxu0 %v6632_v36  ;;  %v9027_v36 = vld [vmem:[#allocation33_spill] sm:$0xff] }
  0xb8   : > { %5848 = vmatpush3.bf16.msra.mxu1 %v6622_v34  ;;  %1693 = vmatprep.subr.bf16.mxu0 %v6639_v37  ;;  %v9026_v34 = vld [vmem:[#allocation34_spill] sm:$0xff]  ;;  %v9028_v37 = vld [vmem:[#allocation35_spill] sm:$0xff] }
  0xb9   : > { %5849 = vmatprep.subr.bf16.mxu1 %v6645_v38  ;;  %1821 = vmatprep.mubr.bf16.mxu1 %v7252_v1 }
  0xbb   : > { %1694 = vmatpush1.bf16.msra.mxu0 %v6655_v40  ;;  %v9030_v40 = vld [vmem:[#allocation38_spill] sm:$0xff] }
  0xbc   : > { %5850 = vmatpush3.bf16.msra.mxu1 %v6645_v38  ;;  %1695 = vmatprep.subr.bf16.mxu0 %v6662_v41  ;;  %v9029_v38 = vld [vmem:[#allocation36_spill] sm:$0xff]  ;;  %v9031_v41 = vld [vmem:[#allocation37_spill] sm:$0xff] }
  0xbd   : > { %5851 = vmatprep.subr.bf16.mxu1 %v6669_v42 }
  0xbf   : > { %1822 = vmatmul.mubr.bf16.gmra.mrb[24].mxu1 %v7262_v2  ;;  %1696 = vmatpush1.bf16.msra.mxu0 %v6678_v44  ;;  %v9033_v44 = vld [vmem:[#allocation40_spill] sm:$0xff] }
  0xc0   : > { %5852 = vmatpush3.bf16.msra.mxu1 %v6669_v42  ;;  %1697 = vmatprep.subr.bf16.mxu0 %v6685_v45  ;;  %v9032_v42 = vld [vmem:[#allocation39_spill] sm:$0xff]  ;;  %v9034_v45 = vld [vmem:[#allocation41_spill] sm:$0xff] }
  0xc1   : > { %5853 = vmatprep.subr.bf16.mxu1 %v6691_v46  ;;  %5855 = vmatprep.mubr.msk.bf16.mxu1 %vm904_vm0, %v7268_v3 }
  0xc3   : > { %1698 = vmatpush1.bf16.msra.mxu0 %v6701_v48  ;;  %v9037_v48 = vld [vmem:[#allocation45_spill] sm:$0xff] }
  0xc4   : > { %5854 = vmatpush3.bf16.msra.mxu1 %v6691_v46  ;;  %1699 = vmatprep.subr.bf16.mxu0 %v6708_v49  ;;  %v9035_v46 = vld [vmem:[#allocation42_spill] sm:$0xff]  ;;  %v9038_v49 = vld [vmem:[#allocation44_spill] sm:$0xff] }
  0xc5   : > { %1879 = vmatprep.subr.bf16.mxu1 %v6716_v50  ;;  %v9039_v50 = vld [vmem:[#allocation46_spill] sm:$0xff] }
  0xc7   : > { %5856 = vmatmul.mubr.msk.bf16.vlgmr.msra.gmra.mrb[28].mxu1 %vm904_vm0, %v7279_v4  ;;  %1700 = vmatpush1.bf16.msra.mxu0 %v6730_v53  ;;  %v9042_v53 = vld [vmem:[#allocation48_spill] sm:$0xff] }
  0xc8   : > { %1880 = vmatpush1.bf16.msra.mxu1 %v6725_v52  ;;  %1701 = vmatprep.subr.bf16.mxu0 %v6737_v54  ;;  %v9041_v52 = vld [vmem:[#allocation49_spill] sm:$0xff]  ;;  %v9043_v54 = vld [vmem:[#allocation50_spill] sm:$0xff] }
  0xc9   : > { %1881 = vmatprep.subr.bf16.mxu1 %v6743_v55  ;;  %1911 = vmatprep.mubr.bf16.mxu1 %v7212_v43  ;;  %v9044_v55 = vld [vmem:[#allocation51_spill] sm:$0xff] }
  0xcb   : > { %1702 = vmatpush1.bf16.msra.mxu0 %v8998_v5  ;;  %v9047_v5 = vld [vmem:[#allocation54_spill] sm:$0xff] }
  0xcc   : > { %1882 = vmatpush1.bf16.msra.mxu1 %v8999_v6  ;;  %1703 = vmatprep.subr.bf16.mxu0 %v9000_v7  ;;  %v9048_v6 = vld [vmem:[#allocation55_spill] sm:$0xff]  ;;  %v9049_v7 = vld [vmem:[#allocation56_spill] sm:$0xff] }
  0xcd   : > { %1883 = vmatprep.subr.bf16.mxu1 %v9001_v8  ;;  %v9050_v8 = vld [vmem:[#allocation57_spill] sm:$0xff] }
  0xcf   : > { %1704 = vmatpush1.bf16.msra.mxu0 %v9002_v9  ;;  %v9051_v9 = vld [vmem:[#allocation58_spill] sm:$0xff] }
  0xd0   : > { %1884 = vmatpush1.bf16.msra.mxu1 %v9003_v10  ;;  %1705 = vmatprep.subr.bf16.mxu0 %v9004_v11  ;;  %v9052_v10 = vld [vmem:[#allocation59_spill] sm:$0xff]  ;;  %v9053_v11 = vld [vmem:[#allocation60_spill] sm:$0xff] }
  0xd1   : > { %1885 = vmatprep.subr.bf16.mxu1 %v9005_v12  ;;  %v9054_v12 = vld [vmem:[#allocation61_spill] sm:$0xff] }
  0xd3   : > { %1706 = vmatpush1.bf16.msra.mxu0 %v9006_v13  ;;  %v9055_v13 = vld [vmem:[#allocation62_spill] sm:$0xff] }
  0xd4   : > { %1886 = vmatpush1.bf16.msra.mxu1 %v9007_v14  ;;  %1728 = vmatprep.subr.bf16.mxu0 %v9008_v15 }
  0xd5   : > { %1887 = vmatprep.subr.bf16.mxu1 %v9009_v16 }
  0xd6   : > { %1708 = vmatmul.mubr.bf16.vlgmr.msra.gmra.mrb[20].mxu0 %v7246_v0 }
  0xd7   : > { %1729 = vmatpush1.bf16.msra.mxu0 %v9010_v17  ;;  %1717 = vmatprep.mubr.bf16.mxu0 %v7252_v1 }
  0xd8   : > { %1888 = vmatpush1.bf16.msra.mxu1 %v9011_v18  ;;  %1730 = vmatprep.subr.bf16.mxu0 %v9012_v19  ;;  %v9057_v18 = vld [vmem:[#allocation64_spill] sm:$0xff] }
  0xd9   : > { %1889 = vmatprep.subr.bf16.mxu1 %v9013_v20 }
  0xdb   : > { %1731 = vmatpush1.bf16.msra.mxu0 %v9014_v21 }
  0xdc   : > { %1890 = vmatpush1.bf16.msra.mxu1 %v9015_v22  ;;  %1732 = vmatprep.subr.bf16.mxu0 %v9016_v23 }
  0xdd   : > { %1891 = vmatprep.subr.bf16.mxu1 %v9017_v24  ;;  %v2166_v24 = vld [vmem:[%s8863_s5] sm:$0xff] }
  0xde   : > { %1718 = vmatmul.mubr.bf16.gmra.mrb[24].mxu0 %v7262_v2 }
  0xdf   : > { %1733 = vmatpush1.bf16.msra.mxu0 %v9018_v25  ;;  %1760 = vmatprep.mubr.bf16.mxu0 %v8971_v56  ;;  %v2167_v25 = vld [vmem:[%s8863_s5 + $0x8] sm:$0xff] }
  0xe0   : > { %1892 = vmatpush1.bf16.msra.mxu1 %v9019_v26  ;;  %1734 = vmatprep.subr.bf16.mxu0 %v9020_v27 }
  0xe1   : > { %1893 = vmatprep.subr.bf16.mxu1 %v9021_v28  ;;  %v2175_v28 = vld [vmem:[%s8863_s5 + $0x48] sm:$0xff] }
  0xe3   : > { %1735 = vmatpush1.bf16.msra.mxu0 %v9022_v29  ;;  %v5364_v29 = vcombine.low %v2167_v25, %v2175_v28 }
  0xe4   : > { %1894 = vmatpush1.bf16.msra.mxu1 %v9023_v31  ;;  %5780 = vmatprep.subr.bf16.mxu0 %v9024_v32  ;;  %v5365_v31 = vcombine.high %v2167_v25, %v2175_v28  ;;  %v2279_v28 = vld [vmem:[%s8863_s5 + $0x388] sm:$0xff] }
  0xe5   : > { %1895 = vmatprep.subr.bf16.mxu1 %v9025_v33 }
  0xe6   : > { %5354 = vmatmul.mubr.msk.bf16.vlgmr.msra.gmra.mrb[20].mxu0 %vm904_vm0, %v7268_v3 }
  0xe7   : > { %5781 = vmatpush3.bf16.msra.mxu0 %v9026_v34  ;;  %1770 = vmatprep.mubr.bf16.mxu0 %v8971_v56  ;;  %v2190_v34 = vld [vmem:[%s8863_s5 + $0xc0] sm:$0xff] }
  0xe8   : > { %1896 = vmatpush1.bf16.msra.mxu1 %v9027_v36  ;;  %5782 = vmatprep.subr.bf16.mxu0 %v9028_v37  ;;  %v2183_v36 = vld [vmem:[%s8863_s5 + $0x88] sm:$0xff] }
  0xe9   : > { %1897 = vmatprep.subr.bf16.mxu1 %v9029_v38 }
  0xeb   : > { %5783 = vmatpush3.bf16.msra.mxu0 %v9030_v40  ;;  %v2191_v40 = vld [vmem:[%s8863_s5 + $0xc8] sm:$0xff] }
  0xec   : > { %1898 = vmatpush1.bf16.msra.mxu1 %v9031_v41  ;;  %5784 = vmatprep.subr.bf16.mxu0 %v9032_v42 }
  0xed   : > { %1899 = vmatprep.subr.bf16.mxu1 %v9033_v44  ;;  %v5380_v44 = vcombine.low %v2183_v36, %v2191_v40 }
  0xee   : > { %5355 = vmatmul.mubr.msk.bf16.gmra.mrb[24].mxu0 %vm904_vm0, %v7279_v4 }
  0xef   : > { %5785 = vmatpush3.bf16.msra.mxu0 %v9034_v45  ;;  %2017 = vmatprep.mubr.bf16.mxu0 %v7212_v43  ;;  %v9046_v43 = vld [vmem:[#allocation52_spill] sm:$0xff]  ;;  %v5381_v45 = vcombine.high %v2183_v36, %v2191_v40 }
  0xf0   : > { %1900 = vmatpush1.bf16.msra.mxu1 %v6981_v57  ;;  %5786 = vmatprep.subr.bf16.mxu0 %v9035_v46  ;;  %v9045_v57 = vld [vmem:[#allocation53_spill] sm:$0xff] }
  0xf1   : > { %1901 = vmatprep.subr.bf16.mxu1 %v9036_v47  ;;  %v2198_v46 = vld [vmem:[%s8863_s5 + $0x100] sm:$0xff] }
  0xf2   : > { %v2206_v47 = vld [vmem:[%s8863_s5 + $0x140] sm:$0xff] }
  0xf3   : > { %5787 = vmatpush3.bf16.msra.mxu0 %v9037_v48  ;;  %v2199_v48 = vld [vmem:[%s8863_s5 + $0x108] sm:$0xff]  ;;  %v2302_v40 = vld [vmem:[%s8863_s5 + $0x440] sm:$0xff] }
  0xf4   : > { %1902 = vmatpush1.bf16.msra.mxu1 %v9038_v49  ;;  %5788 = vmatprep.subr.bf16.mxu0 %v9039_v50  ;;  %v5395_v49 = vcombine.high %v2198_v46, %v2206_v47  ;;  %v2207_v50 = vld [vmem:[%s8863_s5 + $0x148] sm:$0xff] }
  0xf5   : > { %1903 = vmatprep.subr.bf16.mxu1 %v9040_v51  ;;  %v5394_v51 = vcombine.low %v2198_v46, %v2206_v47 }
  0xf7   : > { %5789 = vmatpush3.bf16.msra.mxu0 %v9041_v52  ;;  %v5397_v52 = vcombine.high %v2199_v48, %v2207_v50 }
  0xf8   : > { %1904 = vmatpush1.bf16.msra.mxu1 %v9042_v53  ;;  %5790 = vmatprep.subr.bf16.mxu0 %v9043_v54  ;;  %v5396_v53 = vcombine.low %v2199_v48, %v2207_v50  ;;  %v2318_v50 = vld [vmem:[%s8863_s5 + $0x4c0] sm:$0xff] }
  0xf9   : > { %1905 = vmatprep.subr.bf16.mxu1 %v9044_v55 }
  0xfb   : > { %5791 = vmatpush3.bf16.msra.mxu0 %v9045_v57  ;;  %v2214_v57 = vld [vmem:[%s8863_s5 + $0x180] sm:$0xff] }
  0xfc   : > { %1906 = vmatpush1.bf16.msra.mxu1 %v9046_v43  ;;  %5792 = vmatprep.subr.bf16.mxu0 %v9047_v5  ;;  %v2222_v43 = vld [vmem:[%s8863_s5 + $0x1c0] sm:$0xff]  ;;  %v2215_v5 = vld [vmem:[%s8863_s5 + $0x188] sm:$0xff] }
  0xfd   : > { %1907 = vmatprep.subr.bf16.mxu1 %v9048_v6 }
  0xff   : > { %5793 = vmatpush3.bf16.msra.mxu0 %v9049_v7  ;;  %v5411_v7 = vcombine.high %v2214_v57, %v2222_v43 }
 0x100   : > { %1908 = vmatpush1.bf16.msra.mxu1 %v7087_v63  ;;  %5794 = vmatprep.subr.bf16.mxu0 %v9050_v8  ;;  %v9056_v63 = vld [vmem:[#allocation63_spill] sm:$0xff]  ;;  %v2223_v8 = vld [vmem:[%s8863_s5 + $0x1c8] sm:$0xff] }
 0x101   : > { %1909 = vmatprep.subr.bf16.mxu1 %v9051_v9 }
 0x103   : > { %5795 = vmatpush3.bf16.msra.mxu0 %v9052_v10  ;;  %v5410_v10 = vcombine.low %v2214_v57, %v2222_v43 }
 0x104   : > { %1910 = vmatpush1.bf16.msra.mxu1 %v9053_v11  ;;  %5859 = vmatprep.subr.bf16.mxu0 %v7117_v62  ;;  %v5412_v11 = vcombine.low %v2215_v5, %v2223_v8 }
 0x105   : > { %1932 = vmatprep.subr.bf16.mxu1 %v9054_v12  ;;  %v5413_v12 = vcombine.high %v2215_v5, %v2223_v8  ;;  %v2334_v8 = vld [vmem:[%s8863_s5 + $0x540] sm:$0xff] }
 0x106   : > { %2018 = vmatmul.mubr.bf16.vlgmr.msra.gmra.mrb[28].mxu0 %v7246_v0 }
 0x107   : > { %1912 = vmatmul.mubr.bf16.vlgmr.msra.gmra.mrb[32].mxu1 %v7246_v0  ;;  %5860 = vmatpush3.bf16.msra.mxu0 %v7117_v62 }
 0x108   : > { %1933 = vmatpush1.bf16.msra.mxu1 %v9055_v13  ;;  %5861 = vmatprep.subr.bf16.mxu0 %v7136_v61  ;;  %v2230_v13 = vld [vmem:[%s8863_s5 + $0x200] sm:$0xff] }
 0x109   : > { %1934 = vmatprep.subr.bf16.mxu1 %v9056_v63  ;;  %1921 = vmatprep.mubr.bf16.mxu1 %v7252_v1  ;;  %v5694_v14 = vpop.f32.mrb[0].mxu1  ;;  %v2238_v63 = vld [vmem:[%s8863_s5 + $0x240] sm:$0xff] }
 0x10a   : > { %2025 = vmatprep.mubr.bf16.mxu0 %v7252_v1  ;;  %v5695_v15 = vpop.f32.mrb[1].mxu1 }
 0x10b   : > { %5862 = vmatpush3.bf16.msra.mxu0 %v7136_v61  ;;  %v5696_v16 = vadd.f32 %v5695_v15, %v5694_v14  ;;  %v5697_v17 = vpop.f32.mrb[2].mxu1  ;;  %v2231_v14 = vld [vmem:[%s8863_s5 + $0x208] sm:$0xff]  ;;  %v5427_v15 = vcombine.high %v2230_v13, %v2238_v63 }
 0x10c   : > { %1935 = vmatpush1.bf16.msra.mxu1 %v9057_v18  ;;  %5863 = vmatprep.subr.bf16.mxu0 %v7157_v30  ;;  %v5698_v62 = vpop.f32.mrb[3].mxu1  ;;  %v2254_v18 = vld [vmem:[%s8863_s5 + $0x2c0] sm:$0xff] }
 0x10d   : > { %1936 = vmatprep.subr.bf16.mxu1 %v7164_v35  ;;  %v5699_v0 = vadd.f32 %v5698_v62, %v5697_v17  ;;  %v2246_v17 = vld [vmem:[%s8863_s5 + $0x280] sm:$0xff]  ;;  %v5426_v62 = vcombine.low %v2230_v13, %v2238_v63 }
 0x10e   : > { %2026 = vmatmul.mubr.bf16.gmra.mrb[32].mxu0 %v7262_v2 }
 0x10f   : > { %1922 = vmatmul.mubr.bf16.gmra.mrb[36].mxu1 %v7262_v2  ;;  %5864 = vmatpush3.bf16.msra.mxu0 %v7157_v30 }
 0x110   : > { %1937 = vmatpush1.bf16.msra.mxu1 %v7172_v58  ;;  %5865 = vmatprep.subr.bf16.mxu0 %v7178_v60 }
 0x111   : > { %1938 = vmatprep.subr.bf16.mxu1 %v7184_v39  ;;  %1964 = vmatprep.mubr.bf16.mxu1 %v8971_v56  ;;  %v5700_v61 = vpop.f32.mrb[4].mxu1 }
 0x112   : > { %5867 = vmatprep.mubr.msk.bf16.mxu0 %vm904_vm0, %v7268_v3  ;;  %v5701_v35 = vpop.f32.mrb[5].mxu1 }
 0x113   : > { %5866 = vmatpush3.bf16.msra.mxu0 %v7178_v60  ;;  %v5702_v1 = vadd.f32 %v5701_v35, %v5700_v61  ;;  %v5703_v19 = vpop.f32.mrb[6].mxu1  ;;  %v2247_v61 = vld [vmem:[%s8863_s5 + $0x288] sm:$0xff] }
 0x114   : > { %1939 = vmatpush1.bf16.msra.mxu1 %v7193_v59  ;;  %v5704_v30 = vpop.f32.mrb[7].mxu1  ;;  %v2255_v35 = vld [vmem:[%s8863_s5 + $0x2c8] sm:$0xff] }
 0x115   : > { %v5705_v2 = vadd.f32 %v5704_v30, %v5703_v19  ;;  %4008 = vmatprep.subr.bf16.mxu1 %v5365_v31  ;;  %v5443_v19 = vcombine.high %v2246_v17, %v2254_v18  ;;  %v5445_v30 = vcombine.high %v2247_v61, %v2255_v35 }
 0x116   : > { %5868 = vmatmul.mubr.msk.bf16.vlgmr.msra.gmra.mrb[36].mxu0 %vm904_vm0, %v7279_v4 }
 0x117   : > { %5358 = vmatmul.mubr.msk.bf16.vlgmr.msra.gmra.mrb[32].mxu1 %vm904_vm0, %v7268_v3  ;;  %v2174_v3 = vld [vmem:[%s8863_s5 + $0x40] sm:$0xff] }
 0x118   : > { %1974 = vmatprep.mubr.bf16.mxu1 %v8971_v56  ;;  %v5362_v26 = vcombine.low %v2166_v24, %v2174_v3  ;;  %v5363_v27 = vcombine.high %v2166_v24, %v2174_v3  ;;  %4009 = vmatpush1.bf16.msra.mxu1 %v5364_v29  ;;  %v5444_v24 = vcombine.low %v2247_v61, %v2255_v35  ;;  %v2287_v29 = vld [vmem:[%s8863_s5 + $0x3c8] sm:$0xff]  ;;  %v2342_v61 = vld [vmem:[%s8863_s5 + $0x580] sm:$0xff] }
 0x119   : > { %v5833_v58 = vpop.f32.mrb[8].mxu1  ;;  %4010 = vmatprep.subr.bf16.mxu1 %v5381_v45  ;;  %v5477_v36 = vcombine.high %v2279_v28, %v2287_v29  ;;  %v5476_v46 = vcombine.low %v2279_v28, %v2287_v29  ;;  %v2350_v35 = vld [vmem:[%s8863_s5 + $0x5c0] sm:$0xff] }
 0x11a   : > { %v7389_v39 = vadd.f32 %v5833_v58, %v5702_v1  ;;  %v1100_v20 = vpop.f32.mrb[9].mxu1  ;;  %3902 = vmatprep.subr.bf16.mxu0 %v5363_v27  ;;  %v2270_v58 = vld [vmem:[%s8863_s5 + $0x340] sm:$0xff] }
 0x11b   : > { %v7391_v21 = vadd.f32 %v5696_v16, %v1100_v20  ;;  %v5834_v60 = vpop.f32.mrb[10].mxu1  ;;  %3903 = vmatpush1.bf16.msra.mxu0 %v5362_v26  ;;  %v2239_v16 = vld [vmem:[%s8863_s5 + $0x248] sm:$0xff]  ;;  %v2278_v26 = vld [vmem:[%s8863_s5 + $0x380] sm:$0xff] }
 0x11c   : > { %v7393_v22 = vadd.f32 %v5834_v60, %v5705_v2  ;;  %v1103_v59 = vpop.f32.mrb[11].mxu1  ;;  %4011 = vmatpush1.bf16.msra.mxu1 %v5380_v44  ;;  %v5428_v1 = vcombine.low %v2231_v14, %v2239_v16  ;;  %v2262_v2 = vld [vmem:[%s8863_s5 + $0x300] sm:$0xff]  ;;  %v2263_v20 = vld [vmem:[%s8863_s5 + $0x308] sm:$0xff] }
 0x11d   : > { %v7395_v23 = vadd.f32 %v5699_v0, %v1103_v59  ;;  %4012 = vmatprep.subr.bf16.mxu1 %v5397_v52  ;;  %v5429_v0 = vcombine.high %v2231_v14, %v2239_v16  ;;  %v2271_v60 = vld [vmem:[%s8863_s5 + $0x348] sm:$0xff]  ;;  %v5442_v59 = vcombine.low %v2246_v17, %v2254_v18  ;;  %v5459_v3 = vcombine.high %v2262_v2, %v2270_v58  ;;  %v2286_v27 = vld [vmem:[%s8863_s5 + $0x3c0] sm:$0xff] }
 0x11e   : > { %v5461_v25 = vcombine.high %v2263_v20, %v2271_v60  ;;  %v5458_v31 = vcombine.low %v2262_v2, %v2270_v58  ;;  %v2303_v44 = vld [vmem:[%s8863_s5 + $0x448] sm:$0xff]  ;;  %v5474_v45 = vcombine.low %v2278_v26, %v2286_v27  ;;  %v5539_v58 = vcombine.high %v2342_v61, %v2350_v35  ;;  %v2358_v29 = vld [vmem:[%s8863_s5 + $0x600] sm:$0xff] }
 0x11f   : > { %5359 = vmatmul.mubr.msk.bf16.gmra.mrb[36].mxu1 %vm904_vm0, %v7279_v4  ;;  %v2182_v4 = vld [vmem:[%s8863_s5 + $0x80] sm:$0xff]  ;;  %v2319_v52 = vld [vmem:[%s8863_s5 + $0x4c8] sm:$0xff] }
 0x120   : > { %v5379_v38 = vcombine.high %v2182_v4, %v2190_v34  ;;  %v5378_v42 = vcombine.low %v2182_v4, %v2190_v34  ;;  %4013 = vmatpush1.bf16.msra.mxu1 %v5396_v53  ;;  %v5460_v4 = vcombine.low %v2263_v20, %v2271_v60  ;;  %v5475_v34 = vcombine.high %v2278_v26, %v2286_v27 }
 0x121   : > { %4014 = vmatprep.subr.bf16.mxu1 %v5413_v12  ;;  %v2335_v12 = vld [vmem:[%s8863_s5 + $0x548] sm:$0xff] }
 0x122   : > { %3904 = vmatprep.subr.bf16.mxu0 %v5379_v38  ;;  %v2294_v38 = vld [vmem:[%s8863_s5 + $0x400] sm:$0xff] }
 0x123   : > { %3905 = vmatpush1.bf16.msra.mxu0 %v5378_v42  ;;  %v2295_v42 = vld [vmem:[%s8863_s5 + $0x408] sm:$0xff]  ;;  %v5491_v47 = vcombine.high %v2294_v38, %v2302_v40  ;;  %v5490_v53 = vcombine.low %v2294_v38, %v2302_v40 }
 0x124   : > { %3906 = vmatprep.subr.bf16.mxu0 %v5395_v49  ;;  %4015 = vmatpush1.bf16.msra.mxu1 %v5412_v11  ;;  %v5493_v48 = vcombine.high %v2295_v42, %v2303_v44  ;;  %v2310_v49 = vld [vmem:[%s8863_s5 + $0x480] sm:$0xff]  ;;  %v5492_v57 = vcombine.low %v2295_v42, %v2303_v44  ;;  %v2327_v11 = vld [vmem:[%s8863_s5 + $0x508] sm:$0xff] }
 0x125   : > { %4016 = vmatprep.subr.bf16.mxu1 %v5429_v0  ;;  %v5507_v43 = vcombine.high %v2310_v49, %v2318_v50  ;;  %v5506_v63 = vcombine.low %v2310_v49, %v2318_v50  ;;  %v5524_v2 = vcombine.low %v2327_v11, %v2335_v12  ;;  %v2367_v38 = vld [vmem:[%s8863_s5 + $0x648] sm:$0xff]  ;;  %v2382_v49 = vld [vmem:[%s8863_s5 + $0x6c0] sm:$0xff] }
 0x127   : > { %3907 = vmatpush1.bf16.msra.mxu0 %v5394_v51  ;;  %v2311_v51 = vld [vmem:[%s8863_s5 + $0x488] sm:$0xff] }
 0x128   : > { %3908 = vmatprep.subr.bf16.mxu0 %v5411_v7  ;;  %4017 = vmatpush1.bf16.msra.mxu1 %v5428_v1  ;;  %v5509_v5 = vcombine.high %v2311_v51, %v2319_v52  ;;  %v2326_v7 = vld [vmem:[%s8863_s5 + $0x500] sm:$0xff]  ;;  %v5508_v16 = vcombine.low %v2311_v51, %v2319_v52  ;;  %v2343_v1 = vld [vmem:[%s8863_s5 + $0x588] sm:$0xff] }
 0x129   : > { %4018 = vmatprep.subr.bf16.mxu1 %v5445_v30  ;;  %v5523_v17 = vcombine.high %v2326_v7, %v2334_v8  ;;  %v2351_v30 = vld [vmem:[%s8863_s5 + $0x5c8] sm:$0xff] }
 0x12a   : > { %v5541_v20 = vcombine.high %v2343_v1, %v2351_v30  ;;  %v5540_v26 = vcombine.low %v2343_v1, %v2351_v30  ;;  %v2399_v30 = vld [vmem:[%s8863_s5 + $0x748] sm:$0xff] }
 0x12b   : > { %3909 = vmatpush1.bf16.msra.mxu0 %v5410_v10 }
 0x12c   : > { %3910 = vmatprep.subr.bf16.mxu0 %v5427_v15  ;;  %4019 = vmatpush1.bf16.msra.mxu1 %v5444_v24  ;;  %v5538_v24 = vcombine.low %v2342_v61, %v2350_v35 }
 0x12d   : > { %4020 = vmatprep.subr.bf16.mxu1 %v5461_v25 }
 0x12f   : > { %3911 = vmatpush1.bf16.msra.mxu0 %v5426_v62  ;;  %v5525_v62 = vcombine.high %v2327_v11, %v2335_v12  ;;  %v2375_v11 = vld [vmem:[%s8863_s5 + $0x688] sm:$0xff] }
 0x130   : > { %3912 = vmatprep.subr.bf16.mxu0 %v5443_v19  ;;  %4021 = vmatpush1.bf16.msra.mxu1 %v5460_v4  ;;  %v5522_v19 = vcombine.low %v2326_v7, %v2334_v8  ;;  %v2359_v4 = vld [vmem:[%s8863_s5 + $0x608] sm:$0xff] }
 0x131   : > { %4022 = vmatprep.subr.bf16.mxu1 %v5477_v36  ;;  %v5556_v40 = vcombine.low %v2359_v4, %v2367_v38  ;;  %v5557_v42 = vcombine.high %v2359_v4, %v2367_v38  ;;  %v2383_v12 = vld [vmem:[%s8863_s5 + $0x6c8] sm:$0xff] }
 0x132   : > { %v5572_v1 = vcombine.low %v2375_v11, %v2383_v12 }
 0x133   : > { %3913 = vmatpush1.bf16.msra.mxu0 %v5442_v59 }
 0x134   : > { %3914 = vmatprep.subr.bf16.mxu0 %v5459_v3  ;;  %4023 = vmatpush1.bf16.msra.mxu1 %v5476_v46 }
 0x135   : > { %4024 = vmatprep.subr.bf16.mxu1 %v5493_v48  ;;  %v2374_v48 = vld [vmem:[%s8863_s5 + $0x680] sm:$0xff] }
 0x136   : > { %v5570_v35 = vcombine.low %v2374_v48, %v2382_v49 }
 0x137   : > { %3915 = vmatpush1.bf16.msra.mxu0 %v5458_v31  ;;  %v2366_v31 = vld [vmem:[%s8863_s5 + $0x640] sm:$0xff] }
 0x138   : > { %3916 = vmatprep.subr.bf16.mxu0 %v5475_v34  ;;  %4025 = vmatpush1.bf16.msra.mxu1 %v5492_v57  ;;  %v5554_v34 = vcombine.low %v2358_v29, %v2366_v31  ;;  %v5555_v36 = vcombine.high %v2358_v29, %v2366_v31  ;;  %v5571_v57 = vcombine.high %v2374_v48, %v2382_v49  ;;  %v2415_v29 = vld [vmem:[%s8863_s5 + $0x7c8] sm:$0xff]  ;;  %v7663_v48 = vld [vmem:[%s8863_s5 + $0x840] sm:$0xff] }
 0x139   : > { %v7411_v32 = vpop.f32.mrb[0].mxu0  ;;  %4026 = vmatprep.subr.bf16.mxu1 %v5509_v5  ;;  %9058 = vst [vmem:[#allocation5_spill] sm:$0xff] %v7663_v48  ;;  %v7668_v49 = vld [vmem:[%s8863_s5 + $0x808] sm:$0xff] }
 0x13a   : > { %v7413_v33 = vpop.f32.mrb[1].mxu0  ;;  %9059 = vst [vmem:[#allocation6_spill] sm:$0xff] %v7668_v49 }
 0x13b   : > { %v7424_v37 = vpop.f32.mrb[2].mxu0  ;;  %3917 = vmatpush1.bf16.msra.mxu0 %v5474_v45 }
 0x13c   : > { %v7429_v41 = vpop.f32.mrb[3].mxu0  ;;  %3918 = vmatprep.subr.bf16.mxu0 %v5491_v47  ;;  %4027 = vmatpush1.bf16.msra.mxu1 %v5508_v16 }
 0x13d   : > { %4028 = vmatprep.subr.bf16.mxu1 %v5525_v62  ;;  %v2398_v62 = vld [vmem:[%s8863_s5 + $0x740] sm:$0xff] }
 0x13f   : > { %3919 = vmatpush1.bf16.msra.mxu0 %v5490_v53 }
 0x140   : > { %3920 = vmatprep.subr.bf16.mxu0 %v5507_v43  ;;  %4029 = vmatpush1.bf16.msra.mxu1 %v5524_v2 }
 0x141   : > { %v7443_v54 = vpop.f32.mrb[4].mxu0  ;;  %4030 = vmatprep.subr.bf16.mxu1 %v5541_v20 }
 0x142   : > { %v7445_v55 = vpop.f32.mrb[5].mxu0 }
 0x143   : > { %v7456_v6 = vpop.f32.mrb[6].mxu0  ;;  %3921 = vmatpush1.bf16.msra.mxu0 %v5506_v63 }
 0x144   : > { %v7461_v9 = vpop.f32.mrb[7].mxu0  ;;  %3922 = vmatprep.subr.bf16.mxu0 %v5523_v17  ;;  %4031 = vmatpush1.bf16.msra.mxu1 %v5540_v26  ;;  %v2119_v17 = vld [vmem:[%s8862_s4] sm:$0x7] }
 0x145   : > { %4032 = vmatprep.subr.bf16.mxu1 %v5557_v42 }
 0x147   : > { %3923 = vmatpush1.bf16.msra.mxu0 %v5522_v19  ;;  %v5573_v19 = vcombine.high %v2375_v11, %v2383_v12 }
 0x148   : > { %3924 = vmatprep.subr.bf16.mxu0 %v5539_v58  ;;  %4033 = vmatpush1.bf16.msra.mxu1 %v5556_v40 }
 0x149   : > { %4034 = vmatprep.subr.bf16.mxu1 %v5573_v19 }
 0x14b   : > { %3925 = vmatpush1.bf16.msra.mxu0 %v5538_v24  ;;  %v2406_v24 = vld [vmem:[%s8863_s5 + $0x780] sm:$0xff] }
 0x14c   : > { %3926 = vmatprep.subr.bf16.mxu0 %v5555_v36  ;;  %4035 = vmatpush1.bf16.msra.mxu1 %v5572_v1 }
 0x14f   : > { %3927 = vmatpush1.bf16.msra.mxu0 %v5554_v34 }
 0x150   : > { %3928 = vmatprep.subr.bf16.mxu0 %v5571_v57 }
 0x153   : > { %3929 = vmatpush1.bf16.msra.mxu0 %v5570_v35 }
 0x159   : > { %v5728_v10 = vpop.f32.mrb[8].mxu0 }
 0x15a   : > { %v5729_v13 = vpop.f32.mrb[9].mxu0 }
 0x15b   : > { %v5730_v14 = vadd.f32 %v5729_v13, %v5728_v10  ;;  %v5731_v15 = vpop.f32.mrb[10].mxu0 }
 0x15c   : > { %v5732_v18 = vpop.f32.mrb[11].mxu0 }
 0x15d   : > { %v5733_v0 = vadd.f32 %v5732_v18, %v5731_v15  ;;  %v2390_v18 = vld [vmem:[%s8863_s5 + $0x700] sm:$0xff] }
 0x15e   : > { %v5587_v2 = vcombine.high %v2390_v18, %v2398_v62  ;;  %v5586_v58 = vcombine.low %v2390_v18, %v2398_v62 }
 0x160   : > { %3930 = vmatprep.subr.bf16.mxu0 %v5587_v2 }
 0x161   : > { %v5734_v60 = vpop.f32.mrb[12].mxu0  ;;  %3931 = vmatpush1.bf16.msra.mxu0 %v5586_v58 }
 0x162   : > { %v5735_v59 = vpop.f32.mrb[13].mxu0 }
 0x163   : > { %v5736_v3 = vadd.f32 %v5735_v59, %v5734_v60  ;;  %v5737_v25 = vpop.f32.mrb[14].mxu0 }
 0x164   : > { %v5738_v27 = vpop.f32.mrb[15].mxu0 }
 0x165   : > { %v5739_v28 = vadd.f32 %v5738_v27, %v5737_v25  ;;  %v2407_v25 = vld [vmem:[%s8863_s5 + $0x788] sm:$0xff] }
 0x166   : > { %v5605_v34 = vcombine.high %v2407_v25, %v2415_v29 }
 0x169   : > { %v5845_v44 = vpop.f32.mrb[16].mxu0 }
 0x16a   : > { %v7571_v45 = vpop.f32.mrb[12].mxu1  ;;  %v7573_v46 = vadd.f32 %v5845_v44, %v5736_v3  ;;  %v1624_v47 = vpop.f32.mrb[17].mxu0  ;;  %v2414_v3 = vld [vmem:[%s8863_s5 + $0x7c0] sm:$0xff]  ;;  %v5604_v44 = vcombine.low %v2407_v25, %v2415_v29 }
 0x16b   : > { %v7583_v51 = vpop.f32.mrb[13].mxu1  ;;  %v7585_v52 = vadd.f32 %v5730_v14, %v1624_v47  ;;  %v5846_v53 = vpop.f32.mrb[18].mxu0  ;;  %v5602_v40 = vcombine.low %v2406_v24, %v2414_v3  ;;  %v7658_v47 = vld [vmem:[%s8863_s5 + $0x800] sm:$0xff] }
 0x16c   : > { %v7591_v7 = vpop.f32.mrb[14].mxu1  ;;  %v7593_v8 = vadd.f32 %v5846_v53, %v5739_v28  ;;  %v1627_v10 = vpop.f32.mrb[19].mxu0  ;;  %v5603_v28 = vcombine.high %v2406_v24, %v2414_v3  ;;  %v5619_v57 = vcombine.high %v7658_v47, %v7663_v48 }
 0x16d   : > { %v7605_v14 = vpop.f32.mrb[15].mxu1  ;;  %v7607_v15 = vadd.f32 %v5733_v0, %v1627_v10  ;;  %v2391_v0 = vld [vmem:[%s8863_s5 + $0x708] sm:$0xff] }
 0x16e   : > { %v5589_v20 = vcombine.high %v2391_v0, %v2399_v30  ;;  %v5588_v59 = vcombine.low %v2391_v0, %v2399_v30  ;;  %3932 = vmatprep.subr.bf16.mxu0 %v5603_v28  ;;  %v7677_v10 = vld [vmem:[%s8863_s5 + $0x848] sm:$0xff] }
 0x16f   : > { %3933 = vmatpush1.bf16.msra.mxu0 %v5602_v40  ;;  %9060 = vst [vmem:[#allocation7_spill] sm:$0xff] %v7677_v10  ;;  %v5621_v12 = vcombine.high %v7668_v49, %v7677_v10 }
 0x170   : > { %4036 = vmatprep.subr.bf16.mxu1 %v5589_v20  ;;  %3955 = vmatprep.subr.bf16.mxu0 %v5619_v57 }
 0x171   : > { %4037 = vmatpush1.bf16.msra.mxu1 %v5588_v59 }
 0x172   : > { %v7627_v60 = vpop.f32.mrb[16].mxu1  ;;  %4038 = vmatprep.subr.bf16.mxu1 %v5605_v34 }
 0x173   : > { %v7640_v27 = vpop.f32.mrb[17].mxu1 }
 0x174   : > { %v7647_v4 = vpop.f32.mrb[18].mxu1 }
 0x175   : > { %v7651_v38 = vpop.f32.mrb[19].mxu1  ;;  %4039 = vmatpush1.bf16.msra.mxu1 %v5604_v44 }
 0x176   : > { %4061 = vmatprep.subr.bf16.mxu1 %v5621_v12 }
 0x18a   : > { %v5762_v18 = vpop.f32.mrb[20].mxu1 }
 0x18b   : > { %v5763_v62 = vpop.f32.mrb[21].mxu1 }
 0x18c   : > { %v5764_v0 = vadd.f32 %v5763_v62, %v5762_v18  ;;  %v5765_v35 = vpop.f32.mrb[22].mxu1 }
 0x18d   : > { %v5766_v1 = vpop.f32.mrb[23].mxu1 }
 0x18e   : > { %v5767_v19 = vadd.f32 %v5766_v1, %v5765_v35 }
 0x192   : > { %v5768_v30 = vpop.f32.mrb[24].mxu1 }
 0x193   : > { %v5769_v2 = vpop.f32.mrb[25].mxu1 }
 0x194   : > { %v5770_v58 = vadd.f32 %v5769_v2, %v5768_v30  ;;  %v5771_v20 = vpop.f32.mrb[26].mxu1 }
 0x195   : > { %v5772_v59 = vpop.f32.mrb[27].mxu1 }
 0x196   : > { %v5773_v24 = vadd.f32 %v5772_v59, %v5771_v20 }
 0x19a   : > { %v5857_v3 = vpop.f32.mrb[28].mxu1 }
 0x19b   : > { %v1873_v25 = vadd.f32 %v5857_v3, %v5770_v58  ;;  %v1864_v28 = vpop.f32.mrb[29].mxu1 }
 0x19c   : > { %v1865_v29 = vadd.f32 %v5764_v0, %v1864_v28  ;;  %v5858_v34 = vpop.f32.mrb[30].mxu1 }
 0x19d   : > { %v7683_v40 = vadd.f32 %v5858_v34, %v5773_v24  ;;  %v1867_v44 = vpop.f32.mrb[31].mxu1 }
 0x19e   : > { %v7685_v57 = vadd.f32 %v5767_v19, %v1867_v44  ;;  %v2121_v19 = vlaneseq }
 0x1a0   : > { %v2122_v11 = vshrl.u32 %v2121_v19, 7 }
 0x1a2   : > { %v2123_v26 = vsub.s32 0, %v2122_v11  ;;  %v2127_v61 = vsub.s32 1, %v2122_v11  ;;  %v2131_v16 = vsub.s32 2, %v2122_v11 }
 0x1a4   : > { %v7710_v19 = vrot.slane %v2119_v17, %v2127_v61  ;;  %v2132_v11 = vrot.slane %v2119_v17, %v2131_v16  ;;  %v9061_v61 = vmax.f32 %v7411_v32, %v7571_v45  ;;  %v9064_v32 = vmax.f32 %v7391_v21, %v7585_v52 }
 0x1b9   : > { %v1762_v12 = vpop.f32.mrb[20].mxu0 }
 0x1ba   : > { %v1764_v18 = vpop.f32.mrb[21].mxu0 }
 0x1bb   : > { %v1766_v62 = vpop.f32.mrb[22].mxu0 }
 0x1bc   : > { %v1768_v35 = vpop.f32.mrb[23].mxu0 }
 0x1c1   : > { %v7687_v1 = vpop.f32.mrb[24].mxu0 }
 0x1c2   : > { %v7689_v30 = vpop.f32.mrb[25].mxu0 }
 0x1c3   : > { %v7691_v2 = vpop.f32.mrb[26].mxu0 }
 0x1c4   : > { %v7693_v20 = vpop.f32.mrb[27].mxu0 }
 0x1d9   : > { %v5796_v58 = vpop.f32.mrb[28].mxu0 }
 0x1da   : > { %v5797_v0 = vpop.f32.mrb[29].mxu0 }
 0x1db   : > { %v5798_v59 = vadd.f32 %v5797_v0, %v5796_v58  ;;  %v5799_v24 = vpop.f32.mrb[30].mxu0  ;;  %v7701_v58 = vld [vmem:[%s8863_s5 + $0x880] sm:$0xff] }
 0x1dc   : > { %v5800_v3 = vpop.f32.mrb[31].mxu0  ;;  %v5635_v43 = vcombine.high %v7701_v58, %v7701_v58 }
 0x1dd   : > { %v5801_v28 = vadd.f32 %v5800_v3, %v5799_v24  ;;  %v7706_v24 = vld [vmem:[%s8863_s5 + $0x888] sm:$0xff] }
 0x1e1   : > { %v5802_v34 = vpop.f32.mrb[32].mxu0 }
 0x1e2   : > { %v5803_v44 = vpop.f32.mrb[33].mxu0 }
 0x1e3   : > { %v5804_v53 = vadd.f32 %v5803_v44, %v5802_v34  ;;  %v5805_v42 = vpop.f32.mrb[34].mxu0 }
 0x1e4   : > { %v5806_v36 = vpop.f32.mrb[35].mxu0 }
 0x1e5   : > { %v5807_v31 = vadd.f32 %v5806_v36, %v5805_v42  ;;  %v7708_v36 = vrot.slane %v2119_v17, %v2123_v26  ;;  %v5637_v26 = vcombine.high %v7706_v24, %v7706_v24 }
 0x1e9   : > { %v5869_v0 = vpop.f32.mrb[36].mxu0 }
 0x1ea   : > { %v1966_v3 = vpop.f32.mrb[32].mxu1  ;;  %v2077_v42 = vadd.f32 %v5869_v0, %v5804_v53  ;;  %v2068_v34 = vpop.f32.mrb[37].mxu0  ;;  %v9062_v0 = vmax.f32 %v7389_v39, %v7573_v46 }
 0x1eb   : > { %v2095_v44 = vmax.f32 %v1762_v12, %v1966_v3  ;;  %v1968_v63 = vpop.f32.mrb[33].mxu1  ;;  %v2069_v13 = vadd.f32 %v5798_v59, %v2068_v34  ;;  %v5870_v5 = vpop.f32.mrb[38].mxu0 }
 0x1ec   : > { %v2103_v50 = vmax.f32 %v1873_v25, %v2077_v42  ;;  %v2096_v56 = vmax.f32 %v1764_v18, %v1968_v63  ;;  %v1970_v10 = vpop.f32.mrb[34].mxu1  ;;  %v2080_v49 = vadd.f32 %v5870_v5, %v5807_v31  ;;  %v2071_v48 = vpop.f32.mrb[39].mxu0  ;;  %v9063_v63 = vmax.f32 %v7413_v33, %v7583_v51 }
 0x1ed   : > { %v2107_v53 = vmax.f32 %v9061_v61, %v2095_v44  ;;  %v2097_v12 = vmax.f32 %v1865_v29, %v2069_v13  ;;  %v2098_v16 = vmax.f32 %v1766_v62, %v1970_v10  ;;  %v1972_v17 = vpop.f32.mrb[35].mxu1  ;;  %v2072_v59 = vadd.f32 %v5801_v28, %v2071_v48 }
 0x1ee   : > { %v2115_v3 = vmax.f32 %v9062_v0, %v2103_v50  ;;  %v2108_v5 = vmax.f32 %v9063_v63, %v2096_v56  ;;  %v2106_v31 = vmax.f32 %v7683_v40, %v2080_v49  ;;  %v2099_v25 = vmax.f32 %v1768_v35, %v1972_v17 }
 0x1ef   : > { %v2136_v18 = vadd.f32 %v7708_v36, %v2107_v53  ;;  %v2109_v45 = vmax.f32 %v9064_v32, %v2097_v12  ;;  %v9065_v13 = vmax.f32 %v7424_v37, %v7591_v7  ;;  %v2100_v39 = vmax.f32 %v7685_v57, %v2072_v59 }
 0x1f0   : > { %v2144_v46 = vadd.f32 %v2132_v11, %v2115_v3  ;;  %v2137_v33 = vadd.f32 %v7710_v19, %v2108_v5  ;;  %v9066_v56 = vmax.f32 %v7393_v22, %v7593_v8  ;;  %v9067_v51 = vmax.f32 %v7429_v41, %v7605_v14 }
 0x1f1   : > { %v2110_v48 = vmax.f32 %v9065_v13, %v2098_v16  ;;  %v2138_v21 = vadd.f32 %v2132_v11, %v2109_v45  ;;  %v9068_v37 = vmax.f32 %v7395_v23, %v7607_v15  ;;  %v5634_v10 = vcombine.low %v7701_v58, %v7701_v58  ;;  %v9075_v45 = vld [vmem:[#allocation6_spill] sm:$0xff]  ;;  %v9076_v13 = vld [vmem:[#allocation7_spill] sm:$0xff] }
 0x1f2   : > { %v2118_v50 = vmax.f32 %v9066_v56, %v2106_v31  ;;  %v2111_v49 = vmax.f32 %v9067_v51, %v2099_v25  ;;  %v2148_v29 = vmax.f32 %v2136_v18, 0.0  ;;  %v2156_v40 = vmax.f32 %v2144_v46, 0.0  ;;  %v1976_v8 = vpop.f32.mrb[36].mxu1  ;;  %v2168_v31 = vld [vmem:[%s8863_s5 + $0x10] sm:$0xff] }
 0x1f3   : > { %v2139_v52 = vadd.f32 %v7708_v36, %v2110_v48  ;;  %v2112_v7 = vmax.f32 %v9068_v37, %v2100_v39  ;;  %v2149_v62 = vmax.f32 %v2137_v33, 0.0  ;;  %v2101_v14 = vmax.f32 %v7687_v1, %v1976_v8  ;;  %v1978_v28 = vpop.f32.mrb[37].mxu1  ;;  %v2184_v58 = vld [vmem:[%s8863_s5 + $0x90] sm:$0xff] }
 0x1f4   : > { %v2147_v57 = vadd.f32 %v2132_v11, %v2118_v50  ;;  %v2140_v22 = vadd.f32 %v7710_v19, %v2111_v49  ;;  %v2150_v42 = vmax.f32 %v2138_v21, 0.0  ;;  %v2102_v23 = vmax.f32 %v7689_v30, %v1978_v28  ;;  %v1980_v15 = vpop.f32.mrb[38].mxu1  ;;  %v2193_v21 = vld [vmem:[%s8863_s5 + $0xd8] sm:$0xff]  ;;  %v2224_v28 = vld [vmem:[%s8863_s5 + $0x1d0] sm:$0xff] }
 0x1f5   : > { %v2151_v35 = vmax.f32 %v2139_v52, 0.0  ;;  %v2141_v41 = vadd.f32 %v2132_v11, %v2112_v7  ;;  %v9069_v12 = vmax.f32 %v7443_v54, %v7627_v60  ;;  %v2104_v17 = vmax.f32 %v7691_v2, %v1980_v15  ;;  %v1982_v59 = vpop.f32.mrb[39].mxu1  ;;  %v2232_v15 = vld [vmem:[%s8863_s5 + $0x210] sm:$0xff] }
 0x1f6   : > { %v2159_v34 = vmax.f32 %v2147_v57, 0.0  ;;  %v2152_v44 = vmax.f32 %v2140_v22, 0.0  ;;  %v9070_v0 = vmax.f32 %v7445_v55, %v7640_v27  ;;  %v2105_v30 = vmax.f32 %v7693_v20, %v1982_v59  ;;  %v2176_v55 = vld [vmem:[%s8863_s5 + $0x50] sm:$0xff]  ;;  %v2201_v57 = vld [vmem:[%s8863_s5 + $0x118] sm:$0xff] }
 0x1f7   : > { %v7750_v61 = vpack.c.bf16 %v2151_v35, %v2148_v29  ;;  %v2153_v53 = vmax.f32 %v2141_v41, 0.0  ;;  %v2113_v16 = vmax.f32 %v9069_v12, %v2101_v14  ;;  %v9071_v54 = vmax.f32 %v7456_v6, %v7647_v4  ;;  %v2169_v6 = vld [vmem:[%s8863_s5 + $0x18] sm:$0xff]  ;;  %v2200_v29 = vld [vmem:[%s8863_s5 + $0x110] sm:$0xff] }
 0x1f8   : > { %v7756_v11 = vpack.c.bf16 %v2159_v34, %v2156_v40  ;;  %v7758_v1 = vpack.c.bf16 %v2152_v44, %v2149_v62  ;;  %v2114_v3 = vmax.f32 %v9070_v0, %v2102_v23  ;;  %v5636_v2 = vcombine.low %v7706_v24, %v7706_v24  ;;  %v2177_v4 = vld [vmem:[%s8863_s5 + $0x58] sm:$0xff]  ;;  %v2192_v24 = vld [vmem:[%s8863_s5 + $0xd0] sm:$0xff] }
 0x1f9   : > { %v7764_v63 = vpack.c.bf16 %v2153_v53, %v2150_v42  ;;  %v2142_v5 = vadd.f32 %v7708_v36, %v2113_v16  ;;  %v2116_v60 = vmax.f32 %v9071_v54, %v2104_v17  ;;  %v9072_v20 = vmax.f32 %v7461_v9, %v7651_v38  ;;  %v9073_v38 = vld [vmem:[#allocation5_spill] sm:$0xff]  ;;  %v2208_v40 = vld [vmem:[%s8863_s5 + $0x150] sm:$0xff]  ;;  %v2209_v22 = vld [vmem:[%s8863_s5 + $0x158] sm:$0xff] }
 0x1fa   : > { %v2143_v27 = vadd.f32 %v7710_v19, %v2114_v3  ;;  %3934 = vmatprep.mubr.bf16.mxu0 %v7758_v1  ;;  %4040 = vmatprep.mubr.bf16.mxu1 %v7758_v1  ;;  %v9074_v32 = vcombine.low %v7658_v47, %v9073_v38  ;;  %v9077_v48 = vcombine.low %v9075_v45, %v9076_v13  ;;  %v3855_v39 = vsel %vm3853_vm1, %v5634_v10, 0  ;;  %v2216_v14 = vld [vmem:[%s8863_s5 + $0x190] sm:$0xff]  ;;  %v2217_v42 = vld [vmem:[%s8863_s5 + $0x198] sm:$0xff] }
 0x1fb   : > { %v2117_v25 = vmax.f32 %v9072_v20, %v2105_v30  ;;  %v2145_v18 = vadd.f32 %v7708_v36, %v2116_v60  ;;  %3935 = vmatmul.mubr.bf16.vlgmr.msra.gmra.mrb[40].mxu0 %v7750_v61  ;;  %4041 = vmatmul.mubr.bf16.vlgmr.msra.gmra.mrb[40].mxu1 %v7750_v61  ;;  %v5367_v46 = vcombine.high %v2168_v31, %v2176_v55  ;;  %v2154_v33 = vmax.f32 %v2142_v5, 0.0  ;;  %v2225_v34 = vld [vmem:[%s8863_s5 + $0x1d8] sm:$0xff]  ;;  %v2240_v16 = vld [vmem:[%s8863_s5 + $0x250] sm:$0xff] }
 0x1fc   : > { %3956 = vmatpush1.bf16.msra.mxu0 %v9074_v32  ;;  %4062 = vmatpush1.bf16.msra.mxu1 %v9077_v48  ;;  %v3861_v47 = vsel %vm3853_vm1, %v5636_v2, 0  ;;  %v5369_v36 = vcombine.high %v2169_v6, %v2177_v4  ;;  %v5366_v52 = vcombine.low %v2168_v31, %v2176_v55  ;;  %v5368_v37 = vcombine.low %v2169_v6, %v2177_v4  ;;  %v2233_v17 = vld [vmem:[%s8863_s5 + $0x218] sm:$0xff]  ;;  %v2248_v54 = vld [vmem:[%s8863_s5 + $0x290] sm:$0xff] }
 0x1fd   : > { %v2146_v9 = vadd.f32 %v7710_v19, %v2117_v25  ;;  %v2157_v56 = vmax.f32 %v2145_v18, 0.0  ;;  %5650 = vmatprep.subr.msk.bf16.mxu0 %vm3853_vm1, %v5635_v43  ;;  %5653 = vmatprep.subr.msk.bf16.mxu1 %vm3853_vm1, %v5637_v26  ;;  %v2155_v19 = vmax.f32 %v2143_v27, 0.0  ;;  %v9078_v43 = vmov 0   ;;  %v2185_v26 = vld [vmem:[%s8863_s5 + $0x98] sm:$0xff]  ;;  %v2256_v60 = vld [vmem:[%s8863_s5 + $0x2d0] sm:$0xff] }
 0x1fe   : > { %v5383_v7 = vcombine.high %v2184_v58, %v2192_v24  ;;  %v5385_v10 = vcombine.high %v2185_v26, %v2193_v21  ;;  %v5382_v8 = vcombine.low %v2184_v58, %v2192_v24  ;;  %v5384_v62 = vcombine.low %v2185_v26, %v2193_v21  ;;  %v2241_v59 = vld [vmem:[%s8863_s5 + $0x258] sm:$0xff]  ;;  %v2264_v6 = vld [vmem:[%s8863_s5 + $0x310] sm:$0xff] }
 0x1ff   : > { %v2158_v50 = vmax.f32 %v2146_v9, 0.0  ;;  %v7810_v51 = vpack.c.bf16 %v2157_v56, %v2154_v33  ;;  %v5399_v35 = vcombine.high %v2200_v29, %v2208_v40  ;;  %v5401_v41 = vcombine.high %v2201_v57, %v2209_v22  ;;  %v2249_v2 = vld [vmem:[%s8863_s5 + $0x298] sm:$0xff]  ;;  %v2272_v4 = vld [vmem:[%s8863_s5 + $0x350] sm:$0xff] }
 0x200   : > { %3958 = vmatpush1.bf16.msra.mxu0 %v3855_v39  ;;  %4064 = vmatpush1.bf16.msra.mxu1 %v3861_v47  ;;  %v5398_v44 = vcombine.low %v2200_v29, %v2208_v40  ;;  %v5400_v23 = vcombine.low %v2201_v57, %v2209_v22  ;;  %v5415_v53 = vcombine.high %v2216_v14, %v2224_v28  ;;  %v2257_v31 = vld [vmem:[%s8863_s5 + $0x2d8] sm:$0xff]  ;;  %v2280_v48 = vld [vmem:[%s8863_s5 + $0x390] sm:$0xff] }
 0x201   : > { %v7812_v49 = vpack.c.bf16 %v2158_v50, %v2155_v19  ;;  %4114 = vmatprep.subr.bf16.mxu0 %v5367_v46  ;;  %4220 = vmatprep.subr.bf16.mxu1 %v5369_v36  ;;  %v5417_v12 = vcombine.high %v2217_v42, %v2225_v34  ;;  %v5414_v0 = vcombine.low %v2216_v14, %v2224_v28  ;;  %v2265_v18 = vld [vmem:[%s8863_s5 + $0x318] sm:$0xff]  ;;  %v2288_v39 = vld [vmem:[%s8863_s5 + $0x3d0] sm:$0xff] }
 0x202   : > { %v5416_v3 = vcombine.low %v2217_v42, %v2225_v34  ;;  %v5431_v30 = vcombine.high %v2232_v15, %v2240_v16  ;;  %v5433_v5 = vcombine.high %v2233_v17, %v2241_v59  ;;  %v5430_v55 = vcombine.low %v2232_v15, %v2240_v16  ;;  %v2273_v9 = vld [vmem:[%s8863_s5 + $0x358] sm:$0xff]  ;;  %v2296_v50 = vld [vmem:[%s8863_s5 + $0x410] sm:$0xff] }
 0x203   : > { %3944 = vmatprep.mubr.bf16.mxu0 %v7812_v49  ;;  %4050 = vmatprep.mubr.bf16.mxu1 %v7812_v49  ;;  %v5432_v27 = vcombine.low %v2233_v17, %v2241_v59  ;;  %v5447_v20 = vcombine.high %v2248_v54, %v2256_v60  ;;  %v5449_v25 = vcombine.high %v2249_v2, %v2257_v31  ;;  %v2281_v46 = vld [vmem:[%s8863_s5 + $0x398] sm:$0xff]  ;;  %v2304_v58 = vld [vmem:[%s8863_s5 + $0x450] sm:$0xff] }
 0x204   : > { %3945 = vmatmul.mubr.bf16.gmra.mrb[44].mxu0 %v7810_v51  ;;  %4051 = vmatmul.mubr.bf16.gmra.mrb[44].mxu1 %v7810_v51  ;;  %v5446_v38 = vcombine.low %v2248_v54, %v2256_v60  ;;  %v5448_v32 = vcombine.low %v2249_v2, %v2257_v31  ;;  %v5463_v45 = vcombine.high %v2264_v6, %v2272_v4  ;;  %v2289_v33 = vld [vmem:[%s8863_s5 + $0x3d8] sm:$0xff]  ;;  %v2320_v29 = vld [vmem:[%s8863_s5 + $0x4d0] sm:$0xff] }
 0x205   : > { %3987 = vmatprep.mubr.bf16.mxu0 %v9078_v43  ;;  %4093 = vmatprep.mubr.bf16.mxu1 %v9078_v43  ;;  %v5465_v13 = vcombine.high %v2265_v18, %v2273_v9  ;;  %v5462_v56 = vcombine.low %v2264_v6, %v2272_v4  ;;  %v5464_v47 = vcombine.low %v2265_v18, %v2273_v9  ;;  %v2297_v24 = vld [vmem:[%s8863_s5 + $0x418] sm:$0xff]  ;;  %v2336_v14 = vld [vmem:[%s8863_s5 + $0x550] sm:$0xff] }
 0x206   : > { %v5479_v36 = vcombine.high %v2280_v48, %v2288_v39  ;;  %v5481_v19 = vcombine.high %v2281_v46, %v2289_v33  ;;  %v2305_v26 = vld [vmem:[%s8863_s5 + $0x458] sm:$0xff]  ;;  %v5478_v21 = vcombine.low %v2280_v48, %v2288_v39  ;;  %v5494_v22 = vcombine.low %v2296_v50, %v2304_v58  ;;  %v2368_v54 = vld [vmem:[%s8863_s5 + $0x650] sm:$0xff] }
 0x207   : > { %v2313_v40 = vld [vmem:[%s8863_s5 + $0x498] sm:$0xff]  ;;  %v2384_v6 = vld [vmem:[%s8863_s5 + $0x6d0] sm:$0xff] }
 0x208   : > { %v2321_v57 = vld [vmem:[%s8863_s5 + $0x4d8] sm:$0xff]  ;;  %v2400_v48 = vld [vmem:[%s8863_s5 + $0x750] sm:$0xff] }
 0x209   : > { %v2329_v28 = vld [vmem:[%s8863_s5 + $0x518] sm:$0xff] }
 0x20a   : > { %v2337_v42 = vld [vmem:[%s8863_s5 + $0x558] sm:$0xff] }
 0x20b   : > { %v5529_v15 = vcombine.high %v2329_v28, %v2337_v42  ;;  %v2345_v16 = vld [vmem:[%s8863_s5 + $0x598] sm:$0xff] }
 0x20c   : > { %5651 = vmatmul.mubr.msk.bf16.vlgmr.msra.gmra.mrb[40].mxu0 %vm3846_vm2, %v7764_v63  ;;  %5654 = vmatmul.mubr.msk.bf16.vlgmr.msra.gmra.mrb[40].mxu1 %vm3846_vm2, %v7764_v63  ;;  %v2353_v17 = vld [vmem:[%s8863_s5 + $0x5d8] sm:$0xff] }
 0x20d   : > { %4115 = vmatpush1.bf16.msra.mxu0 %v5366_v52  ;;  %4221 = vmatpush1.bf16.msra.mxu1 %v5368_v37  ;;  %v5480_v52 = vcombine.low %v2281_v46, %v2289_v33  ;;  %v5495_v37 = vcombine.high %v2296_v50, %v2304_v58  ;;  %v2361_v60 = vld [vmem:[%s8863_s5 + $0x618] sm:$0xff]  ;;  %v2416_v50 = vld [vmem:[%s8863_s5 + $0x7d0] sm:$0xff] }
 0x20e   : > { %4116 = vmatprep.subr.bf16.mxu0 %v5383_v7  ;;  %4222 = vmatprep.subr.bf16.mxu1 %v5385_v10  ;;  %v5497_v7 = vcombine.high %v2297_v24, %v2305_v26  ;;  %v2312_v10 = vld [vmem:[%s8863_s5 + $0x490] sm:$0xff]  ;;  %v2369_v2 = vld [vmem:[%s8863_s5 + $0x658] sm:$0xff] }
 0x20f   : > { %3997 = vmatprep.mubr.bf16.mxu0 %v9078_v43  ;;  %4103 = vmatprep.mubr.bf16.mxu1 %v9078_v43  ;;  %v5510_v34 = vcombine.low %v2312_v10, %v2320_v29  ;;  %v2377_v4 = vld [vmem:[%s8863_s5 + $0x698] sm:$0xff] }
 0x210   : > { %v2385_v18 = vld [vmem:[%s8863_s5 + $0x6d8] sm:$0xff] }
 0x211   : > { %4117 = vmatpush1.bf16.msra.mxu0 %v5382_v8  ;;  %4223 = vmatpush1.bf16.msra.mxu1 %v5384_v62  ;;  %v5496_v8 = vcombine.low %v2297_v24, %v2305_v26  ;;  %v5511_v62 = vcombine.high %v2312_v10, %v2320_v29  ;;  %v2393_v39 = vld [vmem:[%s8863_s5 + $0x718] sm:$0xff]  ;;  %v2432_v10 = vld [vmem:[%s8863_s5 + $0x850] sm:$0xff] }
 0x212   : > { %4118 = vmatprep.subr.bf16.mxu0 %v5399_v35  ;;  %4224 = vmatprep.subr.bf16.mxu1 %v5401_v41  ;;  %v5513_v35 = vcombine.high %v2313_v40, %v2321_v57  ;;  %v2328_v41 = vld [vmem:[%s8863_s5 + $0x510] sm:$0xff]  ;;  %v2401_v46 = vld [vmem:[%s8863_s5 + $0x758] sm:$0xff] }
 0x213   : > { %v5526_v59 = vcombine.low %v2328_v41, %v2336_v14  ;;  %v2409_v58 = vld [vmem:[%s8863_s5 + $0x798] sm:$0xff] }
 0x214   : > { %5652 = vmatmul.mubr.msk.bf16.gmra.mrb[44].mxu0 %vm3846_vm2, %v7756_v11  ;;  %5655 = vmatmul.mubr.msk.bf16.gmra.mrb[44].mxu1 %vm3846_vm2, %v7756_v11  ;;  %v2417_v24 = vld [vmem:[%s8863_s5 + $0x7d8] sm:$0xff] }
 0x215   : > { %4119 = vmatpush1.bf16.msra.mxu0 %v5398_v44  ;;  %4225 = vmatpush1.bf16.msra.mxu1 %v5400_v23  ;;  %v5512_v44 = vcombine.low %v2313_v40, %v2321_v57  ;;  %v5527_v23 = vcombine.high %v2328_v41, %v2336_v14  ;;  %v2425_v29 = vld [vmem:[%s8863_s5 + $0x818] sm:$0xff] }
 0x216   : > { %4146 = vmatprep.mubr.bf16.mxu0 %v7758_v1  ;;  %4252 = vmatprep.mubr.bf16.mxu1 %v7758_v1  ;;  %v2433_v40 = vld [vmem:[%s8863_s5 + $0x858] sm:$0xff] }
 0x217   : > { %4120 = vmatprep.subr.bf16.mxu0 %v5415_v53  ;;  %4226 = vmatprep.subr.bf16.mxu1 %v5417_v12  ;;  %v2344_v53 = vld [vmem:[%s8863_s5 + $0x590] sm:$0xff]  ;;  %v2441_v41 = vld [vmem:[%s8863_s5 + $0x898] sm:$0xff] }
 0x218   : > { %v2352_v12 = vld [vmem:[%s8863_s5 + $0x5d0] sm:$0xff] }
 0x219   : > { %4121 = vmatpush1.bf16.msra.mxu0 %v5414_v0  ;;  %4227 = vmatpush1.bf16.msra.mxu1 %v5416_v3  ;;  %v5528_v0 = vcombine.low %v2329_v28, %v2337_v42  ;;  %v5543_v3 = vcombine.high %v2344_v53, %v2352_v12  ;;  %v5542_v31 = vcombine.low %v2344_v53, %v2352_v12  ;;  %v2178_v53 = vld [vmem:[%s8863_s5 + $0x60] sm:$0xff]  ;;  %v2171_v12 = vld [vmem:[%s8863_s5 + $0x28] sm:$0xff] }
 0x21a   : > { %4122 = vmatprep.subr.bf16.mxu0 %v5431_v30  ;;  %4228 = vmatprep.subr.bf16.mxu1 %v5433_v5  ;;  %v5545_v30 = vcombine.high %v2345_v16, %v2353_v17  ;;  %v2360_v5 = vld [vmem:[%s8863_s5 + $0x610] sm:$0xff]  ;;  %v5624_v28 = vcombine.low %v2425_v29, %v2433_v40 }
 0x21b   : > { %v5558_v9 = vcombine.low %v2360_v5, %v2368_v54 }
 0x21d   : > { %4123 = vmatpush1.bf16.msra.mxu0 %v5430_v55  ;;  %4229 = vmatpush1.bf16.msra.mxu1 %v5432_v27  ;;  %v5544_v55 = vcombine.low %v2345_v16, %v2353_v17  ;;  %v5559_v27 = vcombine.high %v2360_v5, %v2368_v54  ;;  %v2179_v16 = vld [vmem:[%s8863_s5 + $0x68] sm:$0xff]  ;;  %v2194_v5 = vld [vmem:[%s8863_s5 + $0xe0] sm:$0xff] }
 0x21e   : > { %4124 = vmatprep.subr.bf16.mxu0 %v5447_v20  ;;  %4230 = vmatprep.subr.bf16.mxu1 %v5449_v25  ;;  %v5561_v20 = vcombine.high %v2361_v60, %v2369_v2  ;;  %v2376_v25 = vld [vmem:[%s8863_s5 + $0x690] sm:$0xff]  ;;  %v2187_v54 = vld [vmem:[%s8863_s5 + $0xa8] sm:$0xff] }
 0x21f   : > { %v5574_v33 = vcombine.low %v2376_v25, %v2384_v6 }
 0x221   : > { %4125 = vmatpush1.bf16.msra.mxu0 %v5446_v38  ;;  %4231 = vmatpush1.bf16.msra.mxu1 %v5448_v32  ;;  %v5560_v38 = vcombine.low %v2361_v60, %v2369_v2  ;;  %v5575_v32 = vcombine.high %v2376_v25, %v2384_v6  ;;  %v2195_v60 = vld [vmem:[%s8863_s5 + $0xe8] sm:$0xff]  ;;  %v2210_v25 = vld [vmem:[%s8863_s5 + $0x160] sm:$0xff] }
 0x222   : > { %4126 = vmatprep.subr.bf16.mxu0 %v5463_v45  ;;  %4232 = vmatprep.subr.bf16.mxu1 %v5465_v13  ;;  %v5577_v45 = vcombine.high %v2377_v4, %v2385_v18  ;;  %v2392_v13 = vld [vmem:[%s8863_s5 + $0x710] sm:$0xff]  ;;  %v2203_v6 = vld [vmem:[%s8863_s5 + $0x128] sm:$0xff] }
 0x223   : > { %v5590_v26 = vcombine.low %v2392_v13, %v2400_v48 }
 0x225   : > { %4127 = vmatpush1.bf16.msra.mxu0 %v5462_v56  ;;  %4233 = vmatpush1.bf16.msra.mxu1 %v5464_v47  ;;  %v5576_v56 = vcombine.low %v2377_v4, %v2385_v18  ;;  %v5591_v47 = vcombine.high %v2392_v13, %v2400_v48  ;;  %v2211_v4 = vld [vmem:[%s8863_s5 + $0x168] sm:$0xff]  ;;  %v2226_v13 = vld [vmem:[%s8863_s5 + $0x1e0] sm:$0xff] }
 0x226   : > { %4128 = vmatprep.subr.bf16.mxu0 %v5479_v36  ;;  %4234 = vmatprep.subr.bf16.mxu1 %v5481_v19  ;;  %v5593_v36 = vcombine.high %v2393_v39, %v2401_v46  ;;  %v2408_v19 = vld [vmem:[%s8863_s5 + $0x790] sm:$0xff]  ;;  %v2219_v48 = vld [vmem:[%s8863_s5 + $0x1a8] sm:$0xff] }
 0x227   : > { %v5606_v57 = vcombine.low %v2408_v19, %v2416_v50 }
 0x229   : > { %4129 = vmatpush1.bf16.msra.mxu0 %v5478_v21  ;;  %4235 = vmatpush1.bf16.msra.mxu1 %v5480_v52  ;;  %v5592_v21 = vcombine.low %v2393_v39, %v2401_v46  ;;  %v5607_v52 = vcombine.high %v2408_v19, %v2416_v50  ;;  %v2227_v39 = vld [vmem:[%s8863_s5 + $0x1e8] sm:$0xff]  ;;  %v2242_v19 = vld [vmem:[%s8863_s5 + $0x260] sm:$0xff] }
 0x22a   : > { %4130 = vmatprep.subr.bf16.mxu0 %v5495_v37  ;;  %4236 = vmatprep.subr.bf16.mxu1 %v5497_v7  ;;  %v5609_v37 = vcombine.high %v2409_v58, %v2417_v24  ;;  %v2424_v7 = vld [vmem:[%s8863_s5 + $0x810] sm:$0xff]  ;;  %v2235_v50 = vld [vmem:[%s8863_s5 + $0x228] sm:$0xff] }
 0x22b   : > { %v5622_v14 = vcombine.low %v2424_v7, %v2432_v10 }
 0x22d   : > { %4131 = vmatpush1.bf16.msra.mxu0 %v5494_v22  ;;  %4237 = vmatpush1.bf16.msra.mxu1 %v5496_v8  ;;  %v5608_v22 = vcombine.low %v2409_v58, %v2417_v24  ;;  %v5623_v8 = vcombine.high %v2424_v7, %v2432_v10  ;;  %v2243_v58 = vld [vmem:[%s8863_s5 + $0x268] sm:$0xff]  ;;  %v2258_v7 = vld [vmem:[%s8863_s5 + $0x2e0] sm:$0xff] }
 0x22e   : > { %4132 = vmatprep.subr.bf16.mxu0 %v5511_v62  ;;  %4238 = vmatprep.subr.bf16.mxu1 %v5513_v35  ;;  %v5625_v62 = vcombine.high %v2425_v29, %v2433_v40  ;;  %v2440_v35 = vld [vmem:[%s8863_s5 + $0x890] sm:$0xff]  ;;  %v2251_v10 = vld [vmem:[%s8863_s5 + $0x2a8] sm:$0xff] }
 0x22f   : > { %v5638_v42 = vcombine.low %v2440_v35, %v2440_v35  ;;  %v2259_v29 = vld [vmem:[%s8863_s5 + $0x2e8] sm:$0xff] }
 0x231   : > { %4133 = vmatpush1.bf16.msra.mxu0 %v5510_v34  ;;  %4239 = vmatpush1.bf16.msra.mxu1 %v5512_v44  ;;  %v5639_v34 = vcombine.high %v2440_v35, %v2440_v35  ;;  %v5641_v44 = vcombine.high %v2441_v41, %v2441_v41  ;;  %v3867_v17 = vsel %vm3853_vm1, %v5638_v42, 0  ;;  %v2274_v35 = vld [vmem:[%s8863_s5 + $0x360] sm:$0xff]  ;;  %v5452_v42 = vcombine.low %v2251_v10, %v2259_v29 }
 0x232   : > { %4134 = vmatprep.subr.bf16.mxu0 %v5527_v23  ;;  %4240 = vmatprep.subr.bf16.mxu1 %v5529_v15  ;;  %v5640_v23 = vcombine.low %v2441_v41, %v2441_v41  ;;  %v2170_v15 = vld [vmem:[%s8863_s5 + $0x20] sm:$0xff]  ;;  %v2267_v41 = vld [vmem:[%s8863_s5 + $0x328] sm:$0xff] }
 0x233   : > { %v5370_v2 = vcombine.low %v2170_v15, %v2178_v53 }
 0x235   : > { %4135 = vmatpush1.bf16.msra.mxu0 %v5526_v59  ;;  %4241 = vmatpush1.bf16.msra.mxu1 %v5528_v0  ;;  %v5371_v59 = vcombine.high %v2170_v15, %v2178_v53  ;;  %v3873_v0 = vsel %vm3853_vm1, %v5640_v23, 0  ;;  %v2282_v23 = vld [vmem:[%s8863_s5 + $0x3a0] sm:$0xff]  ;;  %v2283_v53 = vld [vmem:[%s8863_s5 + $0x3a8] sm:$0xff] }
 0x236   : > { %4136 = vmatprep.subr.bf16.mxu0 %v5543_v3  ;;  %4242 = vmatprep.subr.bf16.mxu1 %v5545_v30  ;;  %v5373_v3 = vcombine.high %v2171_v12, %v2179_v16  ;;  %v2186_v30 = vld [vmem:[%s8863_s5 + $0xa0] sm:$0xff] }
 0x237   : > { %v5386_v18 = vcombine.low %v2186_v30, %v2194_v5  ;;  %v2290_v15 = vld [vmem:[%s8863_s5 + $0x3e0] sm:$0xff] }
 0x239   : > { %4137 = vmatpush1.bf16.msra.mxu0 %v5542_v31  ;;  %4243 = vmatpush1.bf16.msra.mxu1 %v5544_v55  ;;  %v5372_v31 = vcombine.low %v2171_v12, %v2179_v16  ;;  %v5387_v55 = vcombine.high %v2186_v30, %v2194_v5  ;;  %v2291_v12 = vld [vmem:[%s8863_s5 + $0x3e8] sm:$0xff]  ;;  %v2306_v30 = vld [vmem:[%s8863_s5 + $0x460] sm:$0xff] }
 0x23a   : > { %4138 = vmatprep.subr.bf16.mxu0 %v5559_v27  ;;  %4244 = vmatprep.subr.bf16.mxu1 %v5561_v20  ;;  %v5389_v27 = vcombine.high %v2187_v54, %v2195_v60  ;;  %v2202_v20 = vld [vmem:[%s8863_s5 + $0x120] sm:$0xff]  ;;  %v2299_v5 = vld [vmem:[%s8863_s5 + $0x428] sm:$0xff] }
 0x23b   : > { %v5402_v46 = vcombine.low %v2202_v20, %v2210_v25 }
 0x23d   : > { %4139 = vmatpush1.bf16.msra.mxu0 %v5558_v9  ;;  %4245 = vmatpush1.bf16.msra.mxu1 %v5560_v38  ;;  %v5388_v9 = vcombine.low %v2187_v54, %v2195_v60  ;;  %v5403_v38 = vcombine.high %v2202_v20, %v2210_v25  ;;  %v2307_v54 = vld [vmem:[%s8863_s5 + $0x468] sm:$0xff]  ;;  %v5482_v60 = vcombine.low %v2282_v23, %v2290_v15  ;;  %v2322_v20 = vld [vmem:[%s8863_s5 + $0x4e0] sm:$0xff] }
 0x23e   : > { %4140 = vmatprep.subr.bf16.mxu0 %v5575_v32  ;;  %4246 = vmatprep.subr.bf16.mxu1 %v5577_v45  ;;  %v5405_v32 = vcombine.high %v2203_v6, %v2211_v4  ;;  %v2218_v45 = vld [vmem:[%s8863_s5 + $0x1a0] sm:$0xff]  ;;  %v2315_v25 = vld [vmem:[%s8863_s5 + $0x4a8] sm:$0xff] }
 0x23f   : > { %v5418_v24 = vcombine.low %v2218_v45, %v2226_v13 }
 0x241   : > { %4141 = vmatpush1.bf16.msra.mxu0 %v5574_v33  ;;  %4247 = vmatpush1.bf16.msra.mxu1 %v5576_v56  ;;  %v5404_v33 = vcombine.low %v2203_v6, %v2211_v4  ;;  %v2234_v56 = vld [vmem:[%s8863_s5 + $0x220] sm:$0xff]  ;;  %v2323_v6 = vld [vmem:[%s8863_s5 + $0x4e8] sm:$0xff] }
 0x242   : > { %4142 = vmatprep.subr.bf16.mxu0 %v5591_v47  ;;  %4248 = vmatprep.subr.bf16.mxu1 %v5593_v36  ;;  %v5419_v47 = vcombine.high %v2218_v45, %v2226_v13  ;;  %v5421_v36 = vcombine.high %v2219_v48, %v2227_v39  ;;  %v5434_v40 = vcombine.low %v2234_v56, %v2242_v19  ;;  %v2338_v45 = vld [vmem:[%s8863_s5 + $0x560] sm:$0xff]  ;;  %v2331_v13 = vld [vmem:[%s8863_s5 + $0x528] sm:$0xff] }
 0x245   : > { %4143 = vmatpush1.bf16.msra.mxu0 %v5590_v26  ;;  %4249 = vmatpush1.bf16.msra.mxu1 %v5592_v21  ;;  %v5420_v26 = vcombine.low %v2219_v48, %v2227_v39  ;;  %v5435_v21 = vcombine.high %v2234_v56, %v2242_v19  ;;  %v2339_v48 = vld [vmem:[%s8863_s5 + $0x568] sm:$0xff] }
 0x246   : > { %4144 = vmatprep.subr.bf16.mxu0 %v5607_v52  ;;  %4250 = vmatprep.subr.bf16.mxu1 %v5609_v37  ;;  %v5437_v52 = vcombine.high %v2235_v50, %v2243_v58  ;;  %v2250_v37 = vld [vmem:[%s8863_s5 + $0x2a0] sm:$0xff]  ;;  %v5533_v56 = vcombine.high %v2331_v13, %v2339_v48  ;;  %v2347_v19 = vld [vmem:[%s8863_s5 + $0x5a8] sm:$0xff] }
 0x249   : > { %4145 = vmatpush1.bf16.msra.mxu0 %v5606_v57  ;;  %4251 = vmatpush1.bf16.msra.mxu1 %v5608_v22  ;;  %v5436_v57 = vcombine.low %v2235_v50, %v2243_v58  ;;  %v5451_v22 = vcombine.high %v2250_v37, %v2258_v7  ;;  %v2355_v50 = vld [vmem:[%s8863_s5 + $0x5e8] sm:$0xff] }
 0x24a   : > { %4167 = vmatprep.subr.bf16.mxu0 %v5623_v8  ;;  %4273 = vmatprep.subr.bf16.mxu1 %v5625_v62  ;;  %v5453_v8 = vcombine.high %v2251_v10, %v2259_v29  ;;  %v2266_v62 = vld [vmem:[%s8863_s5 + $0x320] sm:$0xff]  ;;  %v2371_v10 = vld [vmem:[%s8863_s5 + $0x668] sm:$0xff] }
 0x24b   : > { %v5466_v16 = vcombine.low %v2266_v62, %v2274_v35 }
 0x24c   : > { %4147 = vmatmul.mubr.bf16.vlgmr.msra.gmra.mrb[48].mxu0 %v7750_v61  ;;  %4253 = vmatmul.mubr.bf16.vlgmr.msra.gmra.mrb[48].mxu1 %v7750_v61 }
 0x24d   : > { %4156 = vmatprep.mubr.bf16.mxu0 %v7812_v49  ;;  %4168 = vmatpush1.bf16.msra.mxu0 %v5622_v14  ;;  %v2275_v14 = vld [vmem:[%s8863_s5 + $0x368] sm:$0xff] }
 0x24e   : > { %4262 = vmatprep.mubr.bf16.mxu1 %v7812_v49  ;;  %4274 = vmatpush1.bf16.msra.mxu1 %v5624_v28  ;;  %v5450_v28 = vcombine.low %v2250_v37, %v2258_v7  ;;  %v2370_v37 = vld [vmem:[%s8863_s5 + $0x660] sm:$0xff]  ;;  %v2363_v7 = vld [vmem:[%s8863_s5 + $0x628] sm:$0xff] }
 0x24f   : > { %5656 = vmatprep.subr.msk.bf16.mxu0 %vm3853_vm1, %v5639_v34  ;;  %5659 = vmatprep.subr.msk.bf16.mxu1 %vm3853_vm1, %v5641_v44  ;;  %v5467_v34 = vcombine.high %v2266_v62, %v2274_v35  ;;  %v5469_v44 = vcombine.high %v2267_v41, %v2275_v14  ;;  %v2386_v62 = vld [vmem:[%s8863_s5 + $0x6e0] sm:$0xff]  ;;  %v2379_v35 = vld [vmem:[%s8863_s5 + $0x6a8] sm:$0xff] }
 0x251   : > { %4170 = vmatpush1.bf16.msra.mxu0 %v3867_v17  ;;  %v5468_v17 = vcombine.low %v2267_v41, %v2275_v14  ;;  %v2387_v41 = vld [vmem:[%s8863_s5 + $0x6e8] sm:$0xff] }
 0x252   : > { %4276 = vmatpush1.bf16.msra.mxu1 %v3873_v0  ;;  %4326 = vmatprep.subr.bf16.mxu0 %v5371_v59  ;;  %v5483_v59 = vcombine.high %v2282_v23, %v2290_v15  ;;  %v5485_v0 = vcombine.high %v2283_v53, %v2291_v12  ;;  %v2402_v23 = vld [vmem:[%s8863_s5 + $0x760] sm:$0xff]  ;;  %v2395_v15 = vld [vmem:[%s8863_s5 + $0x728] sm:$0xff] }
 0x253   : > { %4432 = vmatprep.subr.bf16.mxu1 %v5373_v3  ;;  %v2298_v3 = vld [vmem:[%s8863_s5 + $0x420] sm:$0xff] }
 0x254   : > { %4157 = vmatmul.mubr.bf16.gmra.mrb[52].mxu0 %v7810_v51  ;;  %4263 = vmatmul.mubr.bf16.gmra.mrb[52].mxu1 %v7810_v51  ;;  %v5498_v4 = vcombine.low %v2298_v3, %v2306_v30 }
 0x255   : > { %4199 = vmatprep.mubr.bf16.mxu0 %v9078_v43  ;;  %4305 = vmatprep.mubr.bf16.mxu1 %v9078_v43 }
 0x25c   : > { %5657 = vmatmul.mubr.msk.bf16.vlgmr.msra.gmra.mrb[48].mxu0 %vm3846_vm2, %v7764_v63  ;;  %5660 = vmatmul.mubr.msk.bf16.vlgmr.msra.gmra.mrb[48].mxu1 %vm3846_vm2, %v7764_v63 }
 0x25d   : > { %4327 = vmatpush1.bf16.msra.mxu0 %v5370_v2  ;;  %4433 = vmatpush1.bf16.msra.mxu1 %v5372_v31  ;;  %v5484_v2 = vcombine.low %v2283_v53, %v2291_v12  ;;  %v5499_v31 = vcombine.high %v2298_v3, %v2306_v30  ;;  %v2403_v53 = vld [vmem:[%s8863_s5 + $0x768] sm:$0xff]  ;;  %v2418_v3 = vld [vmem:[%s8863_s5 + $0x7e0] sm:$0xff] }
 0x25e   : > { %4328 = vmatprep.subr.bf16.mxu0 %v5387_v55  ;;  %4434 = vmatprep.subr.bf16.mxu1 %v5389_v27  ;;  %v5501_v55 = vcombine.high %v2299_v5, %v2307_v54  ;;  %v2314_v27 = vld [vmem:[%s8863_s5 + $0x4a0] sm:$0xff]  ;;  %v2411_v30 = vld [vmem:[%s8863_s5 + $0x7a8] sm:$0xff] }
 0x25f   : > { %4209 = vmatprep.mubr.bf16.mxu0 %v9078_v43  ;;  %4315 = vmatprep.mubr.bf16.mxu1 %v9078_v43  ;;  %v5514_v39 = vcombine.low %v2314_v27, %v2322_v20 }
 0x261   : > { %4329 = vmatpush1.bf16.msra.mxu0 %v5386_v18  ;;  %4435 = vmatpush1.bf16.msra.mxu1 %v5388_v9  ;;  %v5500_v18 = vcombine.low %v2299_v5, %v2307_v54  ;;  %v5515_v9 = vcombine.high %v2314_v27, %v2322_v20  ;;  %v2419_v5 = vld [vmem:[%s8863_s5 + $0x7e8] sm:$0xff]  ;;  %v2434_v27 = vld [vmem:[%s8863_s5 + $0x860] sm:$0xff] }
 0x262   : > { %4330 = vmatprep.subr.bf16.mxu0 %v5403_v38  ;;  %4436 = vmatprep.subr.bf16.mxu1 %v5405_v32  ;;  %v5517_v38 = vcombine.high %v2315_v25, %v2323_v6  ;;  %v2330_v32 = vld [vmem:[%s8863_s5 + $0x520] sm:$0xff]  ;;  %v2427_v20 = vld [vmem:[%s8863_s5 + $0x828] sm:$0xff] }
 0x263   : > { %v5530_v58 = vcombine.low %v2330_v32, %v2338_v45 }
 0x264   : > { %5658 = vmatmul.mubr.msk.bf16.gmra.mrb[52].mxu0 %vm3846_vm2, %v7756_v11  ;;  %5661 = vmatmul.mubr.msk.bf16.gmra.mrb[52].mxu1 %vm3846_vm2, %v7756_v11 }
 0x265   : > { %4331 = vmatpush1.bf16.msra.mxu0 %v5402_v46  ;;  %4437 = vmatpush1.bf16.msra.mxu1 %v5404_v33  ;;  %v5516_v46 = vcombine.low %v2315_v25, %v2323_v6  ;;  %v5531_v33 = vcombine.high %v2330_v32, %v2338_v45  ;;  %v2435_v25 = vld [vmem:[%s8863_s5 + $0x868] sm:$0xff] }
 0x266   : > { %4358 = vmatprep.mubr.bf16.mxu0 %v7758_v1  ;;  %4464 = vmatprep.mubr.bf16.mxu1 %v7758_v1  ;;  %v2443_v32 = vld [vmem:[%s8863_s5 + $0x8a8] sm:$0xff] }
 0x267   : > { %4332 = vmatprep.subr.bf16.mxu0 %v5419_v47  ;;  %4438 = vmatprep.subr.bf16.mxu1 %v5421_v36  ;;  %v2346_v47 = vld [vmem:[%s8863_s5 + $0x5a0] sm:$0xff] }
 0x268   : > { %v2354_v36 = vld [vmem:[%s8863_s5 + $0x5e0] sm:$0xff] }
 0x269   : > { %4333 = vmatpush1.bf16.msra.mxu0 %v5418_v24  ;;  %4439 = vmatpush1.bf16.msra.mxu1 %v5420_v26  ;;  %v5532_v24 = vcombine.low %v2331_v13, %v2339_v48  ;;  %v5547_v26 = vcombine.high %v2346_v47, %v2354_v36  ;;  %v5546_v29 = vcombine.low %v2346_v47, %v2354_v36  ;;  %v2180_v47 = vld [vmem:[%s8863_s5 + $0x70] sm:$0xff]  ;;  %v2173_v36 = vld [vmem:[%s8863_s5 + $0x38] sm:$0xff] }
 0x26a   : > { %4334 = vmatprep.subr.bf16.mxu0 %v5435_v21  ;;  %4440 = vmatprep.subr.bf16.mxu1 %v5437_v52  ;;  %v5549_v21 = vcombine.high %v2347_v19, %v2355_v50  ;;  %v2362_v52 = vld [vmem:[%s8863_s5 + $0x620] sm:$0xff]  ;;  %v5628_v13 = vcombine.low %v2427_v20, %v2435_v25 }
 0x26b   : > { %v5562_v14 = vcombine.low %v2362_v52, %v2370_v37 }
 0x26d   : > { %4335 = vmatpush1.bf16.msra.mxu0 %v5434_v40  ;;  %4441 = vmatpush1.bf16.msra.mxu1 %v5436_v57  ;;  %v5548_v40 = vcombine.low %v2347_v19, %v2355_v50  ;;  %v5563_v57 = vcombine.high %v2362_v52, %v2370_v37  ;;  %v2181_v19 = vld [vmem:[%s8863_s5 + $0x78] sm:$0xff]  ;;  %v2196_v52 = vld [vmem:[%s8863_s5 + $0xf0] sm:$0xff] }
 0x26e   : > { %4336 = vmatprep.subr.bf16.mxu0 %v5451_v22  ;;  %4442 = vmatprep.subr.bf16.mxu1 %v5453_v8  ;;  %v5565_v22 = vcombine.high %v2363_v7, %v2371_v10  ;;  %v2378_v8 = vld [vmem:[%s8863_s5 + $0x6a0] sm:$0xff]  ;;  %v2189_v37 = vld [vmem:[%s8863_s5 + $0xb8] sm:$0xff] }
 0x26f   : > { %v5578_v12 = vcombine.low %v2378_v8, %v2386_v62 }
 0x271   : > { %4337 = vmatpush1.bf16.msra.mxu0 %v5450_v28  ;;  %4443 = vmatpush1.bf16.msra.mxu1 %v5452_v42  ;;  %v5564_v28 = vcombine.low %v2363_v7, %v2371_v10  ;;  %v5579_v42 = vcombine.high %v2378_v8, %v2386_v62  ;;  %v2197_v7 = vld [vmem:[%s8863_s5 + $0xf8] sm:$0xff]  ;;  %v2212_v8 = vld [vmem:[%s8863_s5 + $0x170] sm:$0xff] }
 0x272   : > { %4338 = vmatprep.subr.bf16.mxu0 %v5467_v34  ;;  %4444 = vmatprep.subr.bf16.mxu1 %v5469_v44  ;;  %v5581_v34 = vcombine.high %v2379_v35, %v2387_v41  ;;  %v2394_v44 = vld [vmem:[%s8863_s5 + $0x720] sm:$0xff]  ;;  %v2205_v62 = vld [vmem:[%s8863_s5 + $0x138] sm:$0xff] }
 0x273   : > { %v5594_v54 = vcombine.low %v2394_v44, %v2402_v23 }
 0x275   : > { %4339 = vmatpush1.bf16.msra.mxu0 %v5466_v16  ;;  %4445 = vmatpush1.bf16.msra.mxu1 %v5468_v17  ;;  %v5580_v16 = vcombine.low %v2379_v35, %v2387_v41  ;;  %v5595_v17 = vcombine.high %v2394_v44, %v2402_v23  ;;  %v2213_v35 = vld [vmem:[%s8863_s5 + $0x178] sm:$0xff]  ;;  %v2228_v44 = vld [vmem:[%s8863_s5 + $0x1f0] sm:$0xff] }
 0x276   : > { %4340 = vmatprep.subr.bf16.mxu0 %v5483_v59  ;;  %4446 = vmatprep.subr.bf16.mxu1 %v5485_v0  ;;  %v5597_v59 = vcombine.high %v2395_v15, %v2403_v53  ;;  %v2410_v0 = vld [vmem:[%s8863_s5 + $0x7a0] sm:$0xff]  ;;  %v2221_v23 = vld [vmem:[%s8863_s5 + $0x1b8] sm:$0xff] }
 0x277   : > { %v5610_v6 = vcombine.low %v2410_v0, %v2418_v3 }
 0x279   : > { %4341 = vmatpush1.bf16.msra.mxu0 %v5482_v60  ;;  %4447 = vmatpush1.bf16.msra.mxu1 %v5484_v2  ;;  %v5596_v60 = vcombine.low %v2395_v15, %v2403_v53  ;;  %v5611_v2 = vcombine.high %v2410_v0, %v2418_v3  ;;  %v2229_v15 = vld [vmem:[%s8863_s5 + $0x1f8] sm:$0xff]  ;;  %v2244_v0 = vld [vmem:[%s8863_s5 + $0x270] sm:$0xff] }
 0x27a   : > { %4342 = vmatprep.subr.bf16.mxu0 %v5499_v31  ;;  %4448 = vmatprep.subr.bf16.mxu1 %v5501_v55  ;;  %v5613_v31 = vcombine.high %v2411_v30, %v2419_v5  ;;  %v2426_v55 = vld [vmem:[%s8863_s5 + $0x820] sm:$0xff]  ;;  %v2237_v3 = vld [vmem:[%s8863_s5 + $0x238] sm:$0xff] }
 0x27b   : > { %v5626_v45 = vcombine.low %v2426_v55, %v2434_v27 }
 0x27d   : > { %4343 = vmatpush1.bf16.msra.mxu0 %v5498_v4  ;;  %4449 = vmatpush1.bf16.msra.mxu1 %v5500_v18  ;;  %v5612_v4 = vcombine.low %v2411_v30, %v2419_v5  ;;  %v5627_v18 = vcombine.high %v2426_v55, %v2434_v27  ;;  %v2245_v30 = vld [vmem:[%s8863_s5 + $0x278] sm:$0xff]  ;;  %v2260_v55 = vld [vmem:[%s8863_s5 + $0x2f0] sm:$0xff] }
 0x27e   : > { %4344 = vmatprep.subr.bf16.mxu0 %v5515_v9  ;;  %4450 = vmatprep.subr.bf16.mxu1 %v5517_v38  ;;  %v5629_v9 = vcombine.high %v2427_v20, %v2435_v25  ;;  %v2442_v38 = vld [vmem:[%s8863_s5 + $0x8a0] sm:$0xff]  ;;  %v2253_v27 = vld [vmem:[%s8863_s5 + $0x2b8] sm:$0xff]  ;;  %v5440_v25 = vcombine.low %v2237_v3, %v2245_v30 }
 0x27f   : > { %v5642_v48 = vcombine.low %v2442_v38, %v2442_v38 }
 0x281   : > { %4345 = vmatpush1.bf16.msra.mxu0 %v5514_v39  ;;  %4451 = vmatpush1.bf16.msra.mxu1 %v5516_v46  ;;  %v5643_v39 = vcombine.high %v2442_v38, %v2442_v38  ;;  %v5645_v46 = vcombine.high %v2443_v32, %v2443_v32  ;;  %v3879_v50 = vsel %vm3853_vm1, %v5642_v48, 0  ;;  %v2269_v38 = vld [vmem:[%s8863_s5 + $0x338] sm:$0xff] }
 0x282   : > { %4346 = vmatprep.subr.bf16.mxu0 %v5531_v33  ;;  %4452 = vmatprep.subr.bf16.mxu1 %v5533_v56  ;;  %v5644_v33 = vcombine.low %v2443_v32, %v2443_v32  ;;  %v2172_v56 = vld [vmem:[%s8863_s5 + $0x30] sm:$0xff]  ;;  %v2277_v32 = vld [vmem:[%s8863_s5 + $0x378] sm:$0xff] }
 0x283   : > { %v5374_v10 = vcombine.low %v2172_v56, %v2180_v47 }
 0x285   : > { %4347 = vmatpush1.bf16.msra.mxu0 %v5530_v58  ;;  %4453 = vmatpush1.bf16.msra.mxu1 %v5532_v24  ;;  %v5375_v58 = vcombine.high %v2172_v56, %v2180_v47  ;;  %v3885_v24 = vsel %vm3853_vm1, %v5644_v33, 0  ;;  %v2292_v33 = vld [vmem:[%s8863_s5 + $0x3f0] sm:$0xff]  ;;  %v2285_v56 = vld [vmem:[%s8863_s5 + $0x3b8] sm:$0xff] }
 0x286   : > { %4348 = vmatprep.subr.bf16.mxu0 %v5547_v26  ;;  %4454 = vmatprep.subr.bf16.mxu1 %v5549_v21  ;;  %v5377_v26 = vcombine.high %v2173_v36, %v2181_v19  ;;  %v2188_v21 = vld [vmem:[%s8863_s5 + $0xb0] sm:$0xff]  ;;  %v2293_v47 = vld [vmem:[%s8863_s5 + $0x3f8] sm:$0xff] }
 0x287   : > { %v5390_v41 = vcombine.low %v2188_v21, %v2196_v52 }
 0x289   : > { %4349 = vmatpush1.bf16.msra.mxu0 %v5546_v29  ;;  %4455 = vmatpush1.bf16.msra.mxu1 %v5548_v40  ;;  %v5376_v29 = vcombine.low %v2173_v36, %v2181_v19  ;;  %v5391_v40 = vcombine.high %v2188_v21, %v2196_v52  ;;  %v5472_v19 = vcombine.low %v2269_v38, %v2277_v32  ;;  %v2301_v21 = vld [vmem:[%s8863_s5 + $0x438] sm:$0xff] }
 0x28a   : > { %4350 = vmatprep.subr.bf16.mxu0 %v5563_v57  ;;  %4456 = vmatprep.subr.bf16.mxu1 %v5565_v22  ;;  %v5393_v57 = vcombine.high %v2189_v37, %v2197_v7  ;;  %v2204_v22 = vld [vmem:[%s8863_s5 + $0x130] sm:$0xff]  ;;  %v2309_v52 = vld [vmem:[%s8863_s5 + $0x478] sm:$0xff] }
 0x28b   : > { %v5406_v53 = vcombine.low %v2204_v22, %v2212_v8 }
 0x28d   : > { %4351 = vmatpush1.bf16.msra.mxu0 %v5562_v14  ;;  %4457 = vmatpush1.bf16.msra.mxu1 %v5564_v28  ;;  %v5392_v14 = vcombine.low %v2189_v37, %v2197_v7  ;;  %v5407_v28 = vcombine.high %v2204_v22, %v2212_v8  ;;  %v5488_v7 = vcombine.low %v2285_v56, %v2293_v47  ;;  %v2317_v22 = vld [vmem:[%s8863_s5 + $0x4b8] sm:$0xff] }
 0x28e   : > { %4352 = vmatprep.subr.bf16.mxu0 %v5579_v42  ;;  %4458 = vmatprep.subr.bf16.mxu1 %v5581_v34  ;;  %v5409_v42 = vcombine.high %v2205_v62, %v2213_v35  ;;  %v2220_v34 = vld [vmem:[%s8863_s5 + $0x1b0] sm:$0xff]  ;;  %v2325_v8 = vld [vmem:[%s8863_s5 + $0x4f8] sm:$0xff] }
 0x28f   : > { %v5422_v5 = vcombine.low %v2220_v34, %v2228_v44 }
 0x291   : > { %4353 = vmatpush1.bf16.msra.mxu0 %v5578_v12  ;;  %4459 = vmatpush1.bf16.msra.mxu1 %v5580_v16  ;;  %v5408_v12 = vcombine.low %v2205_v62, %v2213_v35  ;;  %v2236_v16 = vld [vmem:[%s8863_s5 + $0x230] sm:$0xff]  ;;  %v5504_v35 = vcombine.low %v2301_v21, %v2309_v52 }
 0x292   : > { %4354 = vmatprep.subr.bf16.mxu0 %v5595_v17  ;;  %4460 = vmatprep.subr.bf16.mxu1 %v5597_v59  ;;  %v5423_v17 = vcombine.high %v2220_v34, %v2228_v44  ;;  %v5425_v59 = vcombine.high %v2221_v23, %v2229_v15  ;;  %v5438_v20 = vcombine.low %v2236_v16, %v2244_v0  ;;  %v2333_v34 = vld [vmem:[%s8863_s5 + $0x538] sm:$0xff] }
 0x293   : > { %v2341_v44 = vld [vmem:[%s8863_s5 + $0x578] sm:$0xff] }
 0x295   : > { %4355 = vmatpush1.bf16.msra.mxu0 %v5594_v54  ;;  %4461 = vmatpush1.bf16.msra.mxu1 %v5596_v60  ;;  %v5424_v54 = vcombine.low %v2221_v23, %v2229_v15  ;;  %v5439_v60 = vcombine.high %v2236_v16, %v2244_v0  ;;  %v5520_v15 = vcombine.low %v2317_v22, %v2325_v8  ;;  %v2348_v16 = vld [vmem:[%s8863_s5 + $0x5b0] sm:$0xff]  ;;  %v2357_v0 = vld [vmem:[%s8863_s5 + $0x5f8] sm:$0xff] }
 0x296   : > { %4356 = vmatprep.subr.bf16.mxu0 %v5611_v2  ;;  %4462 = vmatprep.subr.bf16.mxu1 %v5613_v31  ;;  %v5441_v2 = vcombine.high %v2237_v3, %v2245_v30  ;;  %v2252_v31 = vld [vmem:[%s8863_s5 + $0x2b0] sm:$0xff]  ;;  %v5536_v30 = vcombine.low %v2333_v34, %v2341_v44 }
 0x299   : > { %4357 = vmatpush1.bf16.msra.mxu0 %v5610_v6  ;;  %4463 = vmatpush1.bf16.msra.mxu1 %v5612_v4  ;;  %v5455_v6 = vcombine.high %v2252_v31, %v2260_v55 }
 0x29a   : > { %4379 = vmatprep.subr.bf16.mxu0 %v5627_v18  ;;  %4485 = vmatprep.subr.bf16.mxu1 %v5629_v9  ;;  %v2268_v18 = vld [vmem:[%s8863_s5 + $0x330] sm:$0xff] }
 0x29b   : > { %v2276_v9 = vld [vmem:[%s8863_s5 + $0x370] sm:$0xff] }
 0x29c   : > { %4359 = vmatmul.mubr.bf16.vlgmr.msra.gmra.mrb[56].mxu0 %v7750_v61  ;;  %4465 = vmatmul.mubr.bf16.vlgmr.msra.gmra.mrb[56].mxu1 %v7750_v61  ;;  %v5471_v48 = vcombine.high %v2268_v18, %v2276_v9  ;;  %v5470_v36 = vcombine.low %v2268_v18, %v2276_v9  ;;  %v2381_v18 = vld [vmem:[%s8863_s5 + $0x6b8] sm:$0xff] }
 0x29d   : > { %4368 = vmatprep.mubr.bf16.mxu0 %v7812_v49  ;;  %4380 = vmatpush1.bf16.msra.mxu0 %v5626_v45  ;;  %v5454_v45 = vcombine.low %v2252_v31, %v2260_v55  ;;  %v2365_v31 = vld [vmem:[%s8863_s5 + $0x638] sm:$0xff] }
 0x29e   : > { %4474 = vmatprep.mubr.bf16.mxu1 %v7812_v49  ;;  %4486 = vmatpush1.bf16.msra.mxu1 %v5628_v13  ;;  %v2373_v55 = vld [vmem:[%s8863_s5 + $0x678] sm:$0xff] }
 0x29f   : > { %5662 = vmatprep.subr.msk.bf16.mxu0 %vm3853_vm1, %v5643_v39  ;;  %5665 = vmatprep.subr.msk.bf16.mxu1 %vm3853_vm1, %v5645_v46  ;;  %v5473_v39 = vcombine.high %v2269_v38, %v2277_v32  ;;  %v2284_v46 = vld [vmem:[%s8863_s5 + $0x3b0] sm:$0xff]  ;;  %v2389_v9 = vld [vmem:[%s8863_s5 + $0x6f8] sm:$0xff]  ;;  %v5568_v32 = vcombine.low %v2365_v31, %v2373_v55 }
 0x2a0   : > { %v5486_v37 = vcombine.low %v2284_v46, %v2292_v33 }
 0x2a1   : > { %4382 = vmatpush1.bf16.msra.mxu0 %v3879_v50  ;;  %v5487_v50 = vcombine.high %v2284_v46, %v2292_v33  ;;  %v2397_v46 = vld [vmem:[%s8863_s5 + $0x738] sm:$0xff] }
 0x2a2   : > { %4488 = vmatpush1.bf16.msra.mxu1 %v3885_v24  ;;  %4538 = vmatprep.subr.bf16.mxu0 %v5375_v58  ;;  %v5489_v58 = vcombine.high %v2285_v56, %v2293_v47  ;;  %v2300_v24 = vld [vmem:[%s8863_s5 + $0x430] sm:$0xff]  ;;  %v2405_v33 = vld [vmem:[%s8863_s5 + $0x778] sm:$0xff]  ;;  %v5584_v47 = vcombine.low %v2381_v18, %v2389_v9 }
 0x2a3   : > { %4644 = vmatprep.subr.bf16.mxu1 %v5377_v26  ;;  %v2308_v26 = vld [vmem:[%s8863_s5 + $0x470] sm:$0xff] }
 0x2a4   : > { %4369 = vmatmul.mubr.bf16.gmra.mrb[60].mxu0 %v7810_v51  ;;  %4475 = vmatmul.mubr.bf16.gmra.mrb[60].mxu1 %v7810_v51  ;;  %v5502_v62 = vcombine.low %v2300_v24, %v2308_v26 }
 0x2a5   : > { %4411 = vmatprep.mubr.bf16.mxu0 %v9078_v43  ;;  %4517 = vmatprep.mubr.bf16.mxu1 %v9078_v43 }
 0x2ac   : > { %5663 = vmatmul.mubr.msk.bf16.vlgmr.msra.gmra.mrb[56].mxu0 %vm3846_vm2, %v7764_v63  ;;  %5666 = vmatmul.mubr.msk.bf16.vlgmr.msra.gmra.mrb[56].mxu1 %vm3846_vm2, %v7764_v63 }
 0x2ad   : > { %4539 = vmatpush1.bf16.msra.mxu0 %v5374_v10  ;;  %4645 = vmatpush1.bf16.msra.mxu1 %v5376_v29  ;;  %v5503_v10 = vcombine.high %v2300_v24, %v2308_v26  ;;  %v5505_v29 = vcombine.high %v2301_v21, %v2309_v52  ;;  %v5601_v24 = vcombine.high %v2397_v46, %v2405_v33  ;;  %v8482_v26 = vld [vmem:[%s8863_s5 + $0x7f0] sm:$0xff]  ;;  %v8487_v21 = vld [vmem:[%s8863_s5 + $0x7b8] sm:$0xff] }
 0x2ae   : > { %4540 = vmatprep.subr.bf16.mxu0 %v5391_v40  ;;  %4646 = vmatprep.subr.bf16.mxu1 %v5393_v57  ;;  %v2316_v40 = vld [vmem:[%s8863_s5 + $0x4b0] sm:$0xff]  ;;  %v8492_v52 = vld [vmem:[%s8863_s5 + $0x7f8] sm:$0xff] }
 0x2af   : > { %4421 = vmatprep.mubr.bf16.mxu0 %v9078_v43  ;;  %4527 = vmatprep.mubr.bf16.mxu1 %v9078_v43  ;;  %v2324_v57 = vld [vmem:[%s8863_s5 + $0x4f0] sm:$0xff] }
 0x2b0   : > { %v5518_v23 = vcombine.low %v2316_v40, %v2324_v57 }
 0x2b1   : > { %4541 = vmatpush1.bf16.msra.mxu0 %v5390_v41  ;;  %4647 = vmatpush1.bf16.msra.mxu1 %v5392_v14  ;;  %v5519_v41 = vcombine.high %v2316_v40, %v2324_v57  ;;  %v5521_v14 = vcombine.high %v2317_v22, %v2325_v8  ;;  %v4768_v40 = vld [vmem:[%s8864_s6 + $0x90] sm:$0xff]  ;;  %v4753_v8 = vld [vmem:[%s8864_s6 + $0x18] sm:$0xff] }
 0x2b2   : > { %4542 = vmatprep.subr.bf16.mxu0 %v5407_v28  ;;  %4648 = vmatprep.subr.bf16.mxu1 %v5409_v42  ;;  %v2332_v28 = vld [vmem:[%s8863_s5 + $0x530] sm:$0xff] }
 0x2b3   : > { %v2340_v42 = vld [vmem:[%s8863_s5 + $0x570] sm:$0xff] }
 0x2b4   : > { %5664 = vmatmul.mubr.msk.bf16.gmra.mrb[60].mxu0 %vm3846_vm2, %v7756_v11  ;;  %5667 = vmatmul.mubr.msk.bf16.gmra.mrb[60].mxu1 %vm3846_vm2, %v7756_v11  ;;  %v5534_v3 = vcombine.low %v2332_v28, %v2340_v42 }
 0x2b5   : > { %4543 = vmatpush1.bf16.msra.mxu0 %v5406_v53  ;;  %4649 = vmatpush1.bf16.msra.mxu1 %v5408_v12  ;;  %v5535_v53 = vcombine.high %v2332_v28, %v2340_v42  ;;  %v5537_v12 = vcombine.high %v2333_v34, %v2341_v44 }
 0x2b6   : > { %4570 = vmatprep.mubr.bf16.mxu0 %v7758_v1  ;;  %4676 = vmatprep.mubr.bf16.mxu1 %v7758_v1  ;;  %v2261_v1 = vld [vmem:[%s8863_s5 + $0x2f8] sm:$0xff] }
 0x2b7   : > { %4544 = vmatprep.subr.bf16.mxu0 %v5423_v17  ;;  %4650 = vmatprep.subr.bf16.mxu1 %v5425_v59  ;;  %v5457_v4 = vcombine.high %v2253_v27, %v2261_v1  ;;  %v5456_v13 = vcombine.low %v2253_v27, %v2261_v1  ;;  %v2356_v17 = vld [vmem:[%s8863_s5 + $0x5f0] sm:$0xff]  ;;  %v2349_v59 = vld [vmem:[%s8863_s5 + $0x5b8] sm:$0xff] }
 0x2b8   : > { %v5550_v27 = vcombine.low %v2348_v16, %v2356_v17  ;;  %v5552_v1 = vcombine.low %v2349_v59, %v2357_v0 }
 0x2b9   : > { %4545 = vmatpush1.bf16.msra.mxu0 %v5422_v5  ;;  %4651 = vmatpush1.bf16.msra.mxu1 %v5424_v54  ;;  %v5551_v5 = vcombine.high %v2348_v16, %v2356_v17  ;;  %v5553_v54 = vcombine.high %v2349_v59, %v2357_v0 }
 0x2ba   : > { %4546 = vmatprep.subr.bf16.mxu0 %v5439_v60  ;;  %4652 = vmatprep.subr.bf16.mxu1 %v5441_v2  ;;  %v2364_v60 = vld [vmem:[%s8863_s5 + $0x630] sm:$0xff] }
 0x2bb   : > { %v2372_v2 = vld [vmem:[%s8863_s5 + $0x670] sm:$0xff] }
 0x2bc   : > { %v5566_v38 = vcombine.low %v2364_v60, %v2372_v2 }
 0x2bd   : > { %4547 = vmatpush1.bf16.msra.mxu0 %v5438_v20  ;;  %4653 = vmatpush1.bf16.msra.mxu1 %v5440_v25  ;;  %v5567_v20 = vcombine.high %v2364_v60, %v2372_v2  ;;  %v5569_v25 = vcombine.high %v2365_v31, %v2373_v55  ;;  %v2429_v55 = vld [vmem:[%s8863_s5 + $0x838] sm:$0xff] }
 0x2be   : > { %4548 = vmatprep.subr.bf16.mxu0 %v5455_v6  ;;  %4654 = vmatprep.subr.bf16.mxu1 %v5457_v4  ;;  %v2380_v6 = vld [vmem:[%s8863_s5 + $0x6b0] sm:$0xff] }
 0x2bf   : > { %v2388_v4 = vld [vmem:[%s8863_s5 + $0x6f0] sm:$0xff] }
 0x2c0   : > { %v5582_v56 = vcombine.low %v2380_v6, %v2388_v4 }
 0x2c1   : > { %4549 = vmatpush1.bf16.msra.mxu0 %v5454_v45  ;;  %4655 = vmatpush1.bf16.msra.mxu1 %v5456_v13  ;;  %v5583_v45 = vcombine.high %v2380_v6, %v2388_v4  ;;  %v5585_v13 = vcombine.high %v2381_v18, %v2389_v9  ;;  %v5616_v6 = vcombine.low %v8487_v21, %v8492_v52  ;;  %v4782_v4 = vld [vmem:[%s8864_s6 + $0x100] sm:$0xff]  ;;  %v4784_v18 = vld [vmem:[%s8864_s6 + $0x110] sm:$0xff]  ;;  %v2445_v9 = vld [vmem:[%s8863_s5 + $0x8b8] sm:$0xff] }
 0x2c2   : > { %4550 = vmatprep.subr.bf16.mxu0 %v5471_v48  ;;  %4656 = vmatprep.subr.bf16.mxu1 %v5473_v39  ;;  %v2396_v48 = vld [vmem:[%s8863_s5 + $0x730] sm:$0xff] }
 0x2c3   : > { %v2404_v39 = vld [vmem:[%s8863_s5 + $0x770] sm:$0xff] }
 0x2c5   : > { %4551 = vmatpush1.bf16.msra.mxu0 %v5470_v36  ;;  %4657 = vmatpush1.bf16.msra.mxu1 %v5472_v19  ;;  %v4750_v36 = vld [vmem:[%s8864_s6] sm:$0xff]  ;;  %v4752_v19 = vld [vmem:[%s8864_s6 + $0x10] sm:$0xff] }
 0x2c6   : > { %4552 = vmatprep.subr.bf16.mxu0 %v5487_v50  ;;  %4658 = vmatprep.subr.bf16.mxu1 %v5489_v58  ;;  %v8477_v50 = vld [vmem:[%s8863_s5 + $0x7b0] sm:$0xff]  ;;  %v5599_v58 = vcombine.high %v2396_v48, %v2404_v39 }
 0x2c7   : > { %v5615_v44 = vcombine.high %v8477_v50, %v8482_v26  ;;  %v5614_v31 = vcombine.low %v8477_v50, %v8482_v26  ;;  %v4799_v26 = vld [vmem:[%s8864_s6 + $0x188] sm:$0xff] }
 0x2c9   : > { %4553 = vmatpush1.bf16.msra.mxu0 %v5486_v37  ;;  %4659 = vmatpush1.bf16.msra.mxu1 %v5488_v7 }
 0x2ca   : > { %4554 = vmatprep.subr.bf16.mxu0 %v5503_v10  ;;  %4660 = vmatprep.subr.bf16.mxu1 %v5505_v29  ;;  %v4751_v10 = vld [vmem:[%s8864_s6 + $0x8] sm:$0xff]  ;;  %v4766_v29 = vld [vmem:[%s8864_s6 + $0x80] sm:$0xff] }
 0x2cd   : > { %4555 = vmatpush1.bf16.msra.mxu0 %v5502_v62  ;;  %4661 = vmatpush1.bf16.msra.mxu1 %v5504_v35  ;;  %v5598_v62 = vcombine.low %v2396_v48, %v2404_v39  ;;  %v5600_v35 = vcombine.low %v2397_v46, %v2405_v33  ;;  %v4798_v39 = vld [vmem:[%s8864_s6 + $0x180] sm:$0xff]  ;;  %v4800_v46 = vld [vmem:[%s8864_s6 + $0x190] sm:$0xff] }
 0x2ce   : > { %4556 = vmatprep.subr.bf16.mxu0 %v5519_v41  ;;  %4662 = vmatprep.subr.bf16.mxu1 %v5521_v14  ;;  %v4767_v41 = vld [vmem:[%s8864_s6 + $0x88] sm:$0xff]  ;;  %v4769_v14 = vld [vmem:[%s8864_s6 + $0x98] sm:$0xff] }
 0x2d1   : > { %4557 = vmatpush1.bf16.msra.mxu0 %v5518_v23  ;;  %4663 = vmatpush1.bf16.msra.mxu1 %v5520_v15  ;;  %v5617_v23 = vcombine.high %v8487_v21, %v8492_v52  ;;  %v4801_v21 = vld [vmem:[%s8864_s6 + $0x198] sm:$0xff]  ;;  %v5649_v52 = vcombine.high %v2445_v9, %v2445_v9 }
 0x2d2   : > { %4558 = vmatprep.subr.bf16.mxu0 %v5535_v53  ;;  %4664 = vmatprep.subr.bf16.mxu1 %v5537_v12 }
 0x2d5   : > { %4559 = vmatpush1.bf16.msra.mxu0 %v5534_v3  ;;  %4665 = vmatpush1.bf16.msra.mxu1 %v5536_v30 }
 0x2d6   : > { %4560 = vmatprep.subr.bf16.mxu0 %v5551_v5  ;;  %4666 = vmatprep.subr.bf16.mxu1 %v5553_v54  ;;  %v8519_v5 = vld [vmem:[%s8863_s5 + $0x830] sm:$0xff] }
 0x2d7   : > { %v2436_v54 = vld [vmem:[%s8863_s5 + $0x870] sm:$0xff] }
 0x2d8   : > { %v5630_v33 = vcombine.low %v8519_v5, %v2436_v54 }
 0x2d9   : > { %4561 = vmatpush1.bf16.msra.mxu0 %v5550_v27  ;;  %4667 = vmatpush1.bf16.msra.mxu1 %v5552_v1  ;;  %v2437_v27 = vld [vmem:[%s8863_s5 + $0x878] sm:$0xff]  ;;  %v2444_v1 = vld [vmem:[%s8863_s5 + $0x8b0] sm:$0xff] }
 0x2da   : > { %4562 = vmatprep.subr.bf16.mxu0 %v5567_v20  ;;  %4668 = vmatprep.subr.bf16.mxu1 %v5569_v25 }
 0x2dd   : > { %4563 = vmatpush1.bf16.msra.mxu0 %v5566_v38  ;;  %4669 = vmatpush1.bf16.msra.mxu1 %v5568_v32  ;;  %v4783_v38 = vld [vmem:[%s8864_s6 + $0x108] sm:$0xff]  ;;  %v4785_v32 = vld [vmem:[%s8864_s6 + $0x118] sm:$0xff] }
 0x2de   : > { %4564 = vmatprep.subr.bf16.mxu0 %v5583_v45  ;;  %4670 = vmatprep.subr.bf16.mxu1 %v5585_v13  ;;  %v5631_v45 = vcombine.high %v8519_v5, %v2436_v54  ;;  %v4771_v5 = vld [vmem:[%s8864_s6 + $0xa8] sm:$0xff]  ;;  %v4773_v54 = vld [vmem:[%s8864_s6 + $0xb8] sm:$0xff] }
 0x2df   : > { %v3989_v37 = vpop.f32.mrb[40].mxu0  ;;  %v4095_v7 = vpop.f32.mrb[40].mxu1 }
 0x2e0   : > { %v3991_v57 = vpop.f32.mrb[41].mxu0  ;;  %v4097_v22 = vpop.f32.mrb[41].mxu1  ;;  %v4814_v28 = vmul.f32 %v4750_v36, %v3989_v37  ;;  %v4816_v15 = vmul.f32 %v4752_v19, %v4095_v7  ;;  %v5647_v36 = vcombine.high %v2444_v1, %v2444_v1  ;;  %v5646_v37 = vcombine.low %v2444_v1, %v2444_v1 }
 0x2e1   : > { %4565 = vmatpush1.bf16.msra.mxu0 %v5582_v56  ;;  %4671 = vmatpush1.bf16.msra.mxu1 %v5584_v47  ;;  %v3993_v42 = vpop.f32.mrb[42].mxu0  ;;  %v4099_v34 = vpop.f32.mrb[42].mxu1  ;;  %v4815_v59 = vmul.f32 %v4751_v10, %v3991_v57  ;;  %v4817_v0 = vmul.f32 %v4753_v8, %v4097_v22  ;;  %v5632_v56 = vcombine.low %v2429_v55, %v2437_v27 }
 0x2e2   : > { %v4830_v53 = vmul.f32 %v4766_v29, %v3993_v42  ;;  %v4832_v12 = vmul.f32 %v4768_v40, %v4099_v34  ;;  %4566 = vmatprep.subr.bf16.mxu0 %v5599_v58  ;;  %4672 = vmatprep.subr.bf16.mxu1 %v5601_v24  ;;  %v3995_v16 = vpop.f32.mrb[43].mxu0  ;;  %v4101_v17 = vpop.f32.mrb[43].mxu1  ;;  %v5633_v47 = vcombine.high %v2429_v55, %v2437_v27 }
 0x2e3   : > { %v4831_v3 = vmul.f32 %v4767_v41, %v3995_v16  ;;  %v4833_v30 = vmul.f32 %v4769_v14, %v4101_v17  ;;  %v5648_v57 = vcombine.low %v2445_v9, %v2445_v9  ;;  %v3891_v16 = vsel %vm3853_vm1, %v5646_v37, 0 }
 0x2e4   : > { %v4878_v60 = vadd.f32 %v4830_v53, %v4814_v28  ;;  %v4896_v2 = vadd.f32 %v4832_v12, %v4816_v15 }
 0x2e5   : > { %v4887_v20 = vadd.f32 %v4831_v3, %v4815_v59  ;;  %v4905_v25 = vadd.f32 %v4833_v30, %v4817_v0  ;;  %4567 = vmatpush1.bf16.msra.mxu0 %v5598_v62  ;;  %4673 = vmatpush1.bf16.msra.mxu1 %v5600_v35  ;;  %v3897_v17 = vsel %vm3853_vm1, %v5648_v57, 0  ;;  %v4770_v59 = vld [vmem:[%s8864_s6 + $0xa0] sm:$0xff]  ;;  %v4757_v30 = vld [vmem:[%s8864_s6 + $0x38] sm:$0xff] }
 0x2e6   : > { %4568 = vmatprep.subr.bf16.mxu0 %v5615_v44  ;;  %4674 = vmatprep.subr.bf16.mxu1 %v5617_v23 }
 0x2e7   : > { %v3999_v13 = vpop.f32.mrb[44].mxu0  ;;  %v4105_v48 = vpop.f32.mrb[44].mxu1 }
 0x2e8   : > { %v4846_v19 = vmul.f32 %v4782_v4, %v3999_v13  ;;  %v4848_v50 = vmul.f32 %v4784_v18, %v4105_v48  ;;  %v4001_v58 = vpop.f32.mrb[45].mxu0  ;;  %v4107_v24 = vpop.f32.mrb[45].mxu1  ;;  %v4786_v48 = vld [vmem:[%s8864_s6 + $0x120] sm:$0xff] }
 0x2e9   : > { %4569 = vmatpush1.bf16.msra.mxu0 %v5614_v31  ;;  %4675 = vmatpush1.bf16.msra.mxu1 %v5616_v6  ;;  %v4847_v7 = vmul.f32 %v4783_v38, %v4001_v58  ;;  %v4849_v10 = vmul.f32 %v4785_v32, %v4107_v24  ;;  %v4003_v29 = vpop.f32.mrb[46].mxu0  ;;  %v4109_v40 = vpop.f32.mrb[46].mxu1 }
 0x2ea   : > { %v4879_v22 = vadd.f32 %v4878_v60, %v4846_v19  ;;  %v4897_v8 = vadd.f32 %v4896_v2, %v4848_v50  ;;  %v4862_v62 = vmul.f32 %v4798_v39, %v4003_v29  ;;  %v4864_v35 = vmul.f32 %v4800_v46, %v4109_v40  ;;  %4591 = vmatprep.subr.bf16.mxu0 %v5631_v45  ;;  %v4005_v41 = vpop.f32.mrb[47].mxu0  ;;  %v4111_v14 = vpop.f32.mrb[47].mxu1  ;;  %v4788_v39 = vld [vmem:[%s8864_s6 + $0x130] sm:$0xff]  ;;  %v4787_v46 = vld [vmem:[%s8864_s6 + $0x128] sm:$0xff] }
 0x2eb   : > { %v4888_v28 = vadd.f32 %v4887_v20, %v4847_v7  ;;  %v4906_v42 = vadd.f32 %v4905_v25, %v4849_v10  ;;  %4697 = vmatprep.subr.bf16.mxu1 %v5633_v47  ;;  %v4863_v34 = vmul.f32 %v4799_v26, %v4005_v41  ;;  %v4865_v44 = vmul.f32 %v4801_v21, %v4111_v14  ;;  %v4804_v19 = vld [vmem:[%s8864_s6 + $0x1b0] sm:$0xff]  ;;  %v4803_v21 = vld [vmem:[%s8864_s6 + $0x1a8] sm:$0xff] }
 0x2ec   : > { %v8566_v23 = vadd.f32 %v4879_v22, %v4862_v62  ;;  %v8568_v15 = vadd.f32 %v4897_v8, %v4864_v35  ;;  %4571 = vmatmul.mubr.bf16.vlgmr.msra.gmra.mrb[64].mxu0 %v7750_v61  ;;  %4677 = vmatmul.mubr.bf16.vlgmr.msra.gmra.mrb[64].mxu1 %v7750_v61  ;;  %v4754_v61 = vld [vmem:[%s8864_s6 + $0x20] sm:$0xff] }
 0x2ed   : > { %v8572_v53 = vadd.f32 %v4888_v28, %v4863_v34  ;;  %v8574_v12 = vadd.f32 %v4906_v42, %v4865_v44  ;;  %4580 = vmatprep.mubr.bf16.mxu0 %v7812_v49  ;;  %4592 = vmatpush1.bf16.msra.mxu0 %v5630_v33  ;;  %v4789_v33 = vld [vmem:[%s8864_s6 + $0x138] sm:$0xff] }
 0x2ee   : > { %4686 = vmatprep.mubr.bf16.mxu1 %v7812_v49  ;;  %4698 = vmatpush1.bf16.msra.mxu1 %v5632_v56 }
 0x2ef   : > { %5668 = vmatprep.subr.msk.bf16.mxu0 %vm3853_vm1, %v5647_v36  ;;  %5671 = vmatprep.subr.msk.bf16.mxu1 %vm3853_vm1, %v5649_v52  ;;  %v4802_v36 = vld [vmem:[%s8864_s6 + $0x1a0] sm:$0xff]  ;;  %v4805_v52 = vld [vmem:[%s8864_s6 + $0x1b8] sm:$0xff] }
 0x2f1   : > { %4594 = vmatpush1.bf16.msra.mxu0 %v3891_v16 }
 0x2f2   : > { %4700 = vmatpush1.bf16.msra.mxu1 %v3897_v17 }
 0x2f4   : > { %4581 = vmatmul.mubr.bf16.gmra.mrb[68].mxu0 %v7810_v51  ;;  %4687 = vmatmul.mubr.bf16.gmra.mrb[68].mxu1 %v7810_v51  ;;  %v4756_v51 = vld [vmem:[%s8864_s6 + $0x30] sm:$0xff] }
 0x2f5   : > { %4623 = vmatprep.mubr.bf16.mxu0 %v9078_v43  ;;  %4729 = vmatprep.mubr.bf16.mxu1 %v9078_v43 }
 0x2fc   : > { %5669 = vmatmul.mubr.msk.bf16.vlgmr.msra.gmra.mrb[64].mxu0 %vm3846_vm2, %v7764_v63  ;;  %5672 = vmatmul.mubr.msk.bf16.vlgmr.msra.gmra.mrb[64].mxu1 %vm3846_vm2, %v7764_v63 }
 0x2fd   : > { %4633 = vmatprep.mubr.bf16.mxu0 %v9078_v43  ;;  %4739 = vmatprep.mubr.bf16.mxu1 %v9078_v43  ;;  %v4755_v43 = vld [vmem:[%s8864_s6 + $0x28] sm:$0xff] }
 0x304   : > { %5670 = vmatmul.mubr.msk.bf16.gmra.mrb[68].mxu0 %vm3846_vm2, %v7756_v11  ;;  %5673 = vmatmul.mubr.msk.bf16.gmra.mrb[68].mxu1 %vm3846_vm2, %v7756_v11  ;;  %v4772_v11 = vld [vmem:[%s8864_s6 + $0xb0] sm:$0xff] }
 0x32f   : > { %v4201_v49 = vpop.f32.mrb[48].mxu0  ;;  %v4307_v63 = vpop.f32.mrb[48].mxu1 }
 0x330   : > { %v4203_v0 = vpop.f32.mrb[49].mxu0  ;;  %v4309_v3 = vpop.f32.mrb[49].mxu1  ;;  %v4818_v31 = vmul.f32 %v4754_v61, %v4201_v49  ;;  %v4820_v55 = vmul.f32 %v4756_v51, %v4307_v63  ;;  %v5045_v61 = vld [vmem:[%s8866_s8] sm:$0xff]  ;;  %v5046_v51 = vld [vmem:[%s8866_s8 + $0x8] sm:$0xff]  ;;  %v5047_v49 = vld [vmem:[%s8866_s8 + $0x10] sm:$0xff]  ;;  %v6300_v63 = vmov 0.0|0.0  }
 0x331   : > { %v4205_v60 = vpop.f32.mrb[50].mxu0  ;;  %v4311_v2 = vpop.f32.mrb[50].mxu1  ;;  %v4819_v6 = vmul.f32 %v4755_v43, %v4203_v0  ;;  %v4821_v4 = vmul.f32 %v4757_v30, %v4309_v3  ;;  %5890 = vmatprep.subr.bf16.mxu0 %v6300_v63  ;;  %v5891_v43 = vpack.c.bf16 %v5046_v51, %v5045_v61  ;;  %v4758_v0 = vld [vmem:[%s8864_s6 + $0x40] sm:$0xff]  ;;  %v4760_v3 = vld [vmem:[%s8864_s6 + $0x50] sm:$0xff] }
 0x332   : > { %v4834_v27 = vmul.f32 %v4770_v59, %v4205_v60  ;;  %v4836_v1 = vmul.f32 %v4772_v11, %v4311_v2  ;;  %v4207_v20 = vpop.f32.mrb[51].mxu0  ;;  %v4313_v25 = vpop.f32.mrb[51].mxu1  ;;  %v5048_v59 = vld [vmem:[%s8866_s8 + $0x18] sm:$0xff]  ;;  %v4774_v60 = vld [vmem:[%s8864_s6 + $0xc0] sm:$0xff]  ;;  %v4776_v2 = vld [vmem:[%s8864_s6 + $0xd0] sm:$0xff] }
 0x333   : > { %v4835_v18 = vmul.f32 %v4771_v5, %v4207_v20  ;;  %v4837_v9 = vmul.f32 %v4773_v54, %v4313_v25  ;;  %5892 = vmatpush3.bf16.msra.mxu0 %v5891_v43  ;;  %v5894_v11 = vpack.c.bf16 %v5048_v59, %v5047_v49  ;;  %v4759_v54 = vld [vmem:[%s8864_s6 + $0x48] sm:$0xff]  ;;  %v4777_v20 = vld [vmem:[%s8864_s6 + $0xd8] sm:$0xff] }
 0x334   : > { %v4914_v38 = vadd.f32 %v4834_v27, %v4818_v31  ;;  %v4932_v32 = vadd.f32 %v4836_v1, %v4820_v55  ;;  %5893 = vmatprep.subr.bf16.mxu0 %v6300_v63  ;;  %v4761_v27 = vld [vmem:[%s8864_s6 + $0x58] sm:$0xff]  ;;  %v4775_v1 = vld [vmem:[%s8864_s6 + $0xc8] sm:$0xff] }
 0x335   : > { %v4923_v45 = vadd.f32 %v4835_v18, %v4819_v6  ;;  %v4941_v13 = vadd.f32 %v4837_v9, %v4821_v4 }
 0x337   : > { %v4211_v56 = vpop.f32.mrb[52].mxu0  ;;  %v4317_v47 = vpop.f32.mrb[52].mxu1  ;;  %5895 = vmatpush3.bf16.msra.mxu0 %v5894_v11 }
 0x338   : > { %v4850_v50 = vmul.f32 %v4786_v48, %v4211_v56  ;;  %v4852_v58 = vmul.f32 %v4788_v39, %v4317_v47  ;;  %v4213_v24 = vpop.f32.mrb[53].mxu0  ;;  %v4319_v26 = vpop.f32.mrb[53].mxu1  ;;  %5896 = vmatprep.subr.bf16.mxu0 %v6300_v63  ;;  %v4899_v56 = vrot.slane %v8568_v15, 4 }
 0x339   : > { %v4851_v37 = vmul.f32 %v4787_v46, %v4213_v24  ;;  %v4853_v7 = vmul.f32 %v4789_v33, %v4319_v26  ;;  %v4215_v10 = vpop.f32.mrb[54].mxu0  ;;  %v4321_v29 = vpop.f32.mrb[54].mxu1  ;;  %v4881_v33 = vrot.slane %v8566_v23, 4  ;;  %v4790_v26 = vld [vmem:[%s8864_s6 + $0x140] sm:$0xff] }
 0x33a   : > { %v4915_v40 = vadd.f32 %v4914_v38, %v4850_v50  ;;  %v4933_v57 = vadd.f32 %v4932_v32, %v4852_v58  ;;  %v4866_v22 = vmul.f32 %v4802_v36, %v4215_v10  ;;  %v4868_v8 = vmul.f32 %v4804_v19, %v4321_v29  ;;  %v4217_v62 = vpop.f32.mrb[55].mxu0  ;;  %v4323_v35 = vpop.f32.mrb[55].mxu1  ;;  %v4806_v29 = vld [vmem:[%s8864_s6 + $0x1c0] sm:$0xff] }
 0x33b   : > { %v4924_v41 = vadd.f32 %v4923_v45, %v4851_v37  ;;  %v4942_v14 = vadd.f32 %v4941_v13, %v4853_v7  ;;  %v4867_v28 = vmul.f32 %v4803_v21, %v4217_v62  ;;  %v4869_v42 = vmul.f32 %v4805_v52, %v4323_v35  ;;  %v4792_v21 = vld [vmem:[%s8864_s6 + $0x150] sm:$0xff]  ;;  %v4791_v52 = vld [vmem:[%s8864_s6 + $0x148] sm:$0xff]  ;;  %v4793_v37 = vld [vmem:[%s8864_s6 + $0x158] sm:$0xff] }
 0x33c   : > { %v8644_v34 = vadd.f32 %v4915_v40, %v4866_v22  ;;  %v8646_v44 = vadd.f32 %v4933_v57, %v4868_v8  ;;  %v4890_v19 = vrot.slane %v8572_v53, 4  ;;  %v4908_v50 = vrot.slane %v8574_v12, 4  ;;  %v4808_v40 = vld [vmem:[%s8864_s6 + $0x1d0] sm:$0xff] }
 0x33d   : > { %v8648_v16 = vadd.f32 %v4924_v41, %v4867_v28  ;;  %v8650_v17 = vadd.f32 %v4942_v14, %v4869_v42  ;;  %v4882_v57 = vadd.f32 %v4881_v33, %v8566_v23  ;;  %v4900_v22 = vadd.f32 %v4899_v56, %v8568_v15  ;;  %v4807_v14 = vld [vmem:[%s8864_s6 + $0x1c8] sm:$0xff]  ;;  %v4809_v28 = vld [vmem:[%s8864_s6 + $0x1d8] sm:$0xff] }
 0x33e   : > { %v4891_v42 = vadd.f32 %v4890_v19, %v8572_v53  ;;  %v4909_v61 = vadd.f32 %v4908_v50, %v8574_v12 }
 0x340   : > { %v4910_v12 = vrot.slane %v4909_v61, 2 }
 0x37f   : > { %v4413_v30 = vpop.f32.mrb[56].mxu0  ;;  %v4519_v5 = vpop.f32.mrb[56].mxu1 }
 0x380   : > { %v4415_v31 = vpop.f32.mrb[57].mxu0  ;;  %v4521_v55 = vpop.f32.mrb[57].mxu1  ;;  %v4822_v4 = vmul.f32 %v4758_v0, %v4413_v30  ;;  %v4824_v18 = vmul.f32 %v4760_v3, %v4519_v5 }
 0x381   : > { %v4417_v25 = vpop.f32.mrb[58].mxu0  ;;  %v4523_v6 = vpop.f32.mrb[58].mxu1  ;;  %v4823_v13 = vmul.f32 %v4759_v54, %v4415_v31  ;;  %v4825_v48 = vmul.f32 %v4761_v27, %v4521_v55  ;;  %v4883_v31 = vrot.slane %v4882_v57, 2  ;;  %v4901_v55 = vrot.slane %v4900_v22, 2 }
 0x382   : > { %v4838_v9 = vmul.f32 %v4774_v60, %v4417_v25  ;;  %v4840_v38 = vmul.f32 %v4776_v2, %v4523_v6  ;;  %v4419_v32 = vpop.f32.mrb[59].mxu0  ;;  %v4525_v45 = vpop.f32.mrb[59].mxu1 }
 0x383   : > { %v4839_v39 = vmul.f32 %v4775_v1, %v4419_v32  ;;  %v4841_v46 = vmul.f32 %v4777_v20, %v4525_v45  ;;  %v4892_v1 = vrot.slane %v4891_v42, 2  ;;  %v4902_v32 = vadd.f32 %v4901_v55, %v4900_v22 }
 0x384   : > { %v4950_v47 = vadd.f32 %v4838_v9, %v4822_v4  ;;  %v4968_v36 = vadd.f32 %v4840_v38, %v4824_v18  ;;  %v4884_v38 = vadd.f32 %v4883_v31, %v4882_v57  ;;  %v4781_v31 = vld [vmem:[%s8864_s6 + $0xf8] sm:$0xff]  ;;  %v4917_v55 = vrot.slane %v8644_v34, 4 }
 0x385   : > { %v4959_v58 = vadd.f32 %v4839_v39, %v4823_v13  ;;  %v4977_v24 = vadd.f32 %v4841_v46, %v4825_v48  ;;  %v4893_v48 = vadd.f32 %v4892_v1, %v4891_v42  ;;  %v4911_v39 = vadd.f32 %v4910_v12, %v4909_v61 }
 0x386   : > { %v4885_v50 = vrot.slane %v4884_v38, 1 }
 0x387   : > { %v4423_v7 = vpop.f32.mrb[60].mxu0  ;;  %v4529_v10 = vpop.f32.mrb[60].mxu1 }
 0x388   : > { %v4854_v8 = vmul.f32 %v4790_v26, %v4423_v7  ;;  %v4856_v62 = vmul.f32 %v4792_v21, %v4529_v10  ;;  %v4425_v35 = vpop.f32.mrb[61].mxu0  ;;  %v4531_v41 = vpop.f32.mrb[61].mxu1  ;;  %v4894_v21 = vrot.slane %v4893_v48, 1  ;;  %v4886_v22 = vadd.f32 %v4885_v50, %v4884_v38  ;;  %v4795_v50 = vld [vmem:[%s8864_s6 + $0x168] sm:$0xff] }
 0x389   : > { %v4855_v51 = vmul.f32 %v4791_v52, %v4425_v35  ;;  %v4857_v23 = vmul.f32 %v4793_v37, %v4531_v41  ;;  %v4427_v49 = vpop.f32.mrb[62].mxu0  ;;  %v4533_v15 = vpop.f32.mrb[62].mxu1  ;;  %v4912_v52 = vrot.slane %v4911_v39, 1 }
 0x38a   : > { %v4951_v43 = vadd.f32 %v4950_v47, %v4854_v8  ;;  %v4969_v59 = vadd.f32 %v4968_v36, %v4856_v62  ;;  %v4870_v11 = vmul.f32 %v4806_v29, %v4427_v49  ;;  %v4872_v0 = vmul.f32 %v4808_v40, %v4533_v15  ;;  %v4429_v3 = vpop.f32.mrb[63].mxu0  ;;  %v4535_v30 = vpop.f32.mrb[63].mxu1  ;;  %v4762_v15 = vld [vmem:[%s8864_s6 + $0x60] sm:$0xff] }
 0x38b   : > { %v4960_v5 = vadd.f32 %v4959_v58, %v4855_v51  ;;  %v4978_v54 = vadd.f32 %v4977_v24, %v4857_v23  ;;  %v4871_v60 = vmul.f32 %v4807_v14, %v4429_v3  ;;  %v4873_v2 = vmul.f32 %v4809_v28, %v4535_v30  ;;  %v4778_v3 = vld [vmem:[%s8864_s6 + $0xe0] sm:$0xff]  ;;  %v4780_v30 = vld [vmem:[%s8864_s6 + $0xf0] sm:$0xff] }
 0x38c   : > { %v4952_v27 = vadd.f32 %v4951_v43, %v4870_v11  ;;  %v4970_v53 = vadd.f32 %v4969_v59, %v4872_v0  ;;  %v4903_v58 = vrot.slane %v4902_v32, 1  ;;  %v4895_v41 = vadd.f32 %v4894_v21, %v4893_v48  ;;  %v4764_v43 = vld [vmem:[%s8864_s6 + $0x70] sm:$0xff]  ;;  %v4763_v0 = vld [vmem:[%s8864_s6 + $0x68] sm:$0xff] }
 0x38d   : > { %v4961_v20 = vadd.f32 %v4960_v5, %v4871_v60  ;;  %v4979_v25 = vadd.f32 %v4978_v54, %v4873_v2  ;;  %v4913_v14 = vadd.f32 %v4912_v52, %v4911_v39  ;;  %v4765_v60 = vld [vmem:[%s8864_s6 + $0x78] sm:$0xff]  ;;  %v4779_v2 = vld [vmem:[%s8864_s6 + $0xe8] sm:$0xff]  ;;  %v4812_v21 = vld [vmem:[%s8864_s6 + $0x1f0] sm:$0xff] }
 0x38e   : > { %v4953_v6 = vrot.slane %v4952_v27, 4  ;;  %v4971_v4 = vrot.slane %v4970_v53, 4  ;;  %v4904_v8 = vadd.f32 %v4903_v58, %v4902_v32 }
 0x38f   : > { %v4962_v18 = vrot.slane %v4961_v20, 4  ;;  %v4980_v9 = vrot.slane %v4979_v25, 4 }
 0x390   : > { %v4954_v45 = vadd.f32 %v4953_v6, %v4952_v27  ;;  %v4972_v13 = vadd.f32 %v4971_v4, %v4970_v53 }
 0x391   : > { %v4963_v46 = vadd.f32 %v4962_v18, %v4961_v20  ;;  %v4981_v33 = vadd.f32 %v4980_v9, %v4979_v25 }
 0x392   : > { %v4955_v56 = vrot.slane %v4954_v45, 2  ;;  %v4973_v47 = vrot.slane %v4972_v13, 2 }
 0x393   : > { %v4964_v36 = vrot.slane %v4963_v46, 2  ;;  %v4982_v19 = vrot.slane %v4981_v33, 2 }
 0x394   : > { %v4956_v24 = vadd.f32 %v4955_v56, %v4954_v45  ;;  %v4974_v26 = vadd.f32 %v4973_v47, %v4972_v13  ;;  %v4935_v45 = vrot.slane %v8646_v44, 4  ;;  %v4926_v13 = vrot.slane %v8648_v16, 4 }
 0x395   : > { %v4965_v37 = vadd.f32 %v4964_v36, %v4963_v46  ;;  %v4983_v7 = vadd.f32 %v4982_v19, %v4981_v33  ;;  %v4918_v46 = vadd.f32 %v4917_v55, %v8644_v34  ;;  %v4944_v33 = vrot.slane %v8650_v17, 4  ;;  %v4794_v36 = vld [vmem:[%s8864_s6 + $0x160] sm:$0xff]  ;;  %v4796_v19 = vld [vmem:[%s8864_s6 + $0x170] sm:$0xff]  ;;  %v4797_v34 = vld [vmem:[%s8864_s6 + $0x178] sm:$0xff] }
 0x396   : > { %v4957_v10 = vrot.slane %v4956_v24, 1  ;;  %v4975_v29 = vrot.slane %v4974_v26, 1  ;;  %v4936_v52 = vadd.f32 %v4935_v45, %v8646_v44 }
 0x397   : > { %v4966_v40 = vrot.slane %v4965_v37, 1  ;;  %v4984_v57 = vrot.slane %v4983_v7, 1 }
 0x398   : > { %v4958_v62 = vadd.f32 %v4957_v10, %v4956_v24  ;;  %v4976_v35 = vadd.f32 %v4975_v29, %v4974_v26  ;;  %v4810_v26 = vld [vmem:[%s8864_s6 + $0x1e0] sm:$0xff] }
 0x399   : > { %v4967_v28 = vadd.f32 %v4966_v40, %v4965_v37  ;;  %v4985_v42 = vadd.f32 %v4984_v57, %v4983_v7  ;;  %v4927_v37 = vadd.f32 %v4926_v13, %v8648_v16  ;;  %v4811_v57 = vld [vmem:[%s8864_s6 + $0x1e8] sm:$0xff] }
 0x39a   : > { %v8723_v61 = vadd.f32 %v4958_v62, %v4886_v22  ;;  %v8725_v51 = vadd.f32 %v4976_v35, %v4904_v8  ;;  %v4813_v22 = vld [vmem:[%s8864_s6 + $0x1f8] sm:$0xff]  ;;  %v4919_v8 = vrot.slane %v4918_v46, 2  ;;  %v4945_v62 = vadd.f32 %v4944_v33, %v8650_v17 }
 0x39b   : > { %v8727_v23 = vadd.f32 %v4967_v28, %v4895_v41  ;;  %v8729_v49 = vadd.f32 %v4985_v42, %v4913_v14 }
 0x3cf   : > { %v4625_v59 = vpop.f32.mrb[64].mxu0  ;;  %v4731_v11 = vpop.f32.mrb[64].mxu1 }
 0x3d0   : > { %v4627_v5 = vpop.f32.mrb[65].mxu0  ;;  %v4733_v54 = vpop.f32.mrb[65].mxu1  ;;  %v4826_v1 = vmul.f32 %v4762_v15, %v4625_v59  ;;  %v4828_v12 = vmul.f32 %v4764_v43, %v4731_v11 }
 0x3d1   : > { %v4629_v27 = vpop.f32.mrb[66].mxu0  ;;  %v4735_v53 = vpop.f32.mrb[66].mxu1  ;;  %v4827_v18 = vmul.f32 %v4763_v0, %v4627_v5  ;;  %v4829_v9 = vmul.f32 %v4765_v60, %v4733_v54  ;;  %v4937_v5 = vrot.slane %v4936_v52, 2 }
 0x3d2   : > { %v4842_v20 = vmul.f32 %v4778_v3, %v4629_v27  ;;  %v4844_v25 = vmul.f32 %v4780_v30, %v4735_v53  ;;  %v4631_v6 = vpop.f32.mrb[67].mxu0  ;;  %v4737_v4 = vpop.f32.mrb[67].mxu1 }
 0x3d3   : > { %v4843_v38 = vmul.f32 %v4779_v2, %v4631_v6  ;;  %v4845_v32 = vmul.f32 %v4781_v31, %v4737_v4  ;;  %v4928_v2 = vrot.slane %v4927_v37, 2  ;;  %v4946_v31 = vrot.slane %v4945_v62, 2 }
 0x3d4   : > { %v4986_v48 = vadd.f32 %v4842_v20, %v4826_v1  ;;  %v5004_v39 = vadd.f32 %v4844_v25, %v4828_v12  ;;  %v4920_v1 = vadd.f32 %v4919_v8, %v4918_v46  ;;  %v4938_v25 = vadd.f32 %v4937_v5, %v4936_v52  ;;  %v5050_v46 = vld [vmem:[%s8866_s8 + $0x28] sm:$0xff] }
 0x3d5   : > { %v4995_v56 = vadd.f32 %v4843_v38, %v4827_v18  ;;  %v5013_v47 = vadd.f32 %v4845_v32, %v4829_v9  ;;  %v4929_v18 = vadd.f32 %v4928_v2, %v4927_v37  ;;  %v4947_v9 = vadd.f32 %v4946_v31, %v4945_v62 }
 0x3d7   : > { %v4635_v58 = vpop.f32.mrb[68].mxu0  ;;  %v4741_v24 = vpop.f32.mrb[68].mxu1 }
 0x3d8   : > { %v4858_v7 = vmul.f32 %v4794_v36, %v4635_v58  ;;  %v4860_v10 = vmul.f32 %v4796_v19, %v4741_v24  ;;  %v4637_v29 = vpop.f32.mrb[69].mxu0  ;;  %v4743_v40 = vpop.f32.mrb[69].mxu1  ;;  %v4948_v58 = vrot.slane %v4947_v9, 1 }
 0x3d9   : > { %v4859_v35 = vmul.f32 %v4795_v50, %v4637_v29  ;;  %v4861_v41 = vmul.f32 %v4797_v34, %v4743_v40  ;;  %v4639_v44 = vpop.f32.mrb[70].mxu0  ;;  %v4745_v14 = vpop.f32.mrb[70].mxu1  ;;  %v4930_v34 = vrot.slane %v4929_v18, 1  ;;  %v5051_v29 = vld [vmem:[%s8866_s8 + $0x30] sm:$0xff]  ;;  %v5052_v40 = vld [vmem:[%s8866_s8 + $0x38] sm:$0xff] }
 0x3da   : > { %v4987_v16 = vadd.f32 %v4986_v48, %v4858_v7  ;;  %v5005_v28 = vadd.f32 %v5004_v39, %v4860_v10  ;;  %v4874_v42 = vmul.f32 %v4810_v26, %v4639_v44  ;;  %v4876_v15 = vmul.f32 %v4812_v21, %v4745_v14  ;;  %v4641_v43 = vpop.f32.mrb[71].mxu0  ;;  %v4747_v59 = vpop.f32.mrb[71].mxu1 }
 0x3db   : > { %v4996_v11 = vadd.f32 %v4995_v56, %v4859_v35  ;;  %v5014_v0 = vadd.f32 %v5013_v47, %v4861_v41  ;;  %v4875_v3 = vmul.f32 %v4811_v57, %v4641_v43  ;;  %v4877_v30 = vmul.f32 %v4813_v22, %v4747_v59  ;;  %v5049_v56 = vld [vmem:[%s8866_s8 + $0x20] sm:$0xff] }
 0x3dc   : > { %v4988_v54 = vadd.f32 %v4987_v16, %v4874_v42  ;;  %v5006_v60 = vadd.f32 %v5005_v28, %v4876_v15  ;;  %v4921_v48 = vrot.slane %v4920_v1, 1  ;;  %v4939_v47 = vrot.slane %v4938_v25, 1 }
 0x3dd   : > { %v4997_v17 = vadd.f32 %v4996_v11, %v4875_v3  ;;  %v5015_v55 = vadd.f32 %v5014_v0, %v4877_v30  ;;  %v5897_v50 = vpack.c.bf16 %v5050_v46, %v5049_v56  ;;  %v5900_v62 = vpack.c.bf16 %v5052_v40, %v5051_v29 }
 0x3de   : > { %v4989_v27 = vrot.slane %v4988_v54, 4  ;;  %v5007_v53 = vrot.slane %v5006_v60, 4  ;;  %v4922_v37 = vadd.f32 %v4921_v48, %v4920_v1  ;;  %v4940_v57 = vadd.f32 %v4939_v47, %v4938_v25 }
 0x3df   : > { %v4998_v12 = vrot.slane %v4997_v17, 4  ;;  %v5016_v20 = vrot.slane %v5015_v55, 4  ;;  %5898 = vmatpush3.bf16.msra.mxu0 %v5897_v50  ;;  %v4931_v35 = vadd.f32 %v4930_v34, %v4929_v18  ;;  %v4949_v41 = vadd.f32 %v4948_v58, %v4947_v9 }
 0x3e0   : > { %v4990_v6 = vadd.f32 %v4989_v27, %v4988_v54  ;;  %v5008_v4 = vadd.f32 %v5007_v53, %v5006_v60  ;;  %5899 = vmatprep.subr.bf16.mxu0 %v6300_v63  ;;  %v6302_v15 = vmov 0.0   ;;  %v5042_v60 = vld [vmem:[%s8865_s7] sm:$0x1] }
 0x3e1   : > { %v4999_v38 = vadd.f32 %v4998_v12, %v4997_v17  ;;  %v5017_v32 = vadd.f32 %v5016_v20, %v5015_v55  ;;  %5887 = vmatprep.mubr.msk.f32.mxu0 %vm6301_vm3, %v6302_v15 }
 0x3e2   : > { %v4991_v45 = vrot.slane %v4990_v6, 2  ;;  %v5009_v13 = vrot.slane %v5008_v4, 2 }
 0x3e3   : > { %v5000_v39 = vrot.slane %v4999_v38, 2  ;;  %v5018_v33 = vrot.slane %v5017_v32, 2  ;;  %5901 = vmatpush3.bf16.msra.mxu0 %v5900_v62 }
 0x3e4   : > { %v4992_v36 = vadd.f32 %v4991_v45, %v4990_v6  ;;  %v5010_v19 = vadd.f32 %v5009_v13, %v5008_v4 }
 0x3e5   : > { %v5001_v24 = vadd.f32 %v5000_v39, %v4999_v38  ;;  %v5019_v26 = vadd.f32 %v5018_v33, %v5017_v32 }
 0x3e6   : > { %v4993_v21 = vrot.slane %v4992_v36, 1  ;;  %v5011_v52 = vrot.slane %v5010_v19, 1 }
 0x3e7   : > { %v5002_v7 = vrot.slane %v5001_v24, 1  ;;  %v5020_v10 = vrot.slane %v5019_v26, 1 }
 0x3e8   : > { %v4994_v22 = vadd.f32 %v4993_v21, %v4992_v36  ;;  %v5012_v8 = vadd.f32 %v5011_v52, %v5010_v19 }
 0x3e9   : > { %v5003_v44 = vadd.f32 %v5002_v7, %v5001_v24  ;;  %v5021_v14 = vadd.f32 %v5020_v10, %v5019_v26 }
 0x3ea   : > { %v5026_v16 = vadd.f32 %v4994_v22, %v4922_v37  ;;  %v5028_v28 = vadd.f32 %v5012_v8, %v4940_v57 }
 0x3eb   : > { %v5027_v63 = vadd.f32 %v5003_v44, %v4931_v35  ;;  %v5029_v42 = vadd.f32 %v5021_v14, %v4949_v41 }
 0x3ec   : > { %v5030_v43 = vadd.f32 %v5026_v16, %v8723_v61  ;;  %v5032_v59 = vadd.f32 %v5028_v28, %v8725_v51  ;;  %v5053_v51 = vld [vmem:[%s8867_s9] sm:$0x1] }
 0x3ed   : > { %v5031_v11 = vadd.f32 %v5027_v63, %v8727_v23  ;;  %v5033_v0 = vadd.f32 %v5029_v42, %v8729_v49 }
 0x3ee   : > { %v5034_v3 = vadd.f32 %v5032_v59, %v5030_v43 }
 0x3ef   : > { %v5035_v30 = vadd.f32 %v5033_v0, %v5031_v11 }
 0x3f1   : > { %v5036_v5 = vadd.f32 %v5035_v30, %v5034_v3 }
 0x3f3   : > { %5037 = vrot.lane.b32.xlu0 %v5036_v5, %s6303_s11  ;;  %s8816_s11 = scalar_lea.hbm %s8868_s10, %s5675_s27 }
 0x465   : > { %v5038_v54 = vpop.permute.xlu0 %5037 }
 0x466   : > { %v5041_v2 = vadd.f32 %v5038_v54, %v5036_v5 }
 0x468   : > { %v5043_v31 = vadd.f32 %v5042_v60, %v5041_v2 }
 0x46a   : > { %v5044_v61 = vmax.f32 %v5043_v31, 0.0 }
 0x46c   : > { %5888 = vmatmul.mubr.msk.f32.vlgmr.msra.gmra.mrb[72].mxu0 %vm904_vm0, %v5044_v61 }
 0x53f   : > { %v5123_v23 = vpop.f32.mrb[72].mxu0 }
 0x540   : > { %v5124_v49 = vadd.f32 %v5123_v23, %v5053_v51  ;;  %v5889_v17 = vpop.f32.mrb[73].mxu0 }
 0x542   : > { %5127 = vst [vmem:[%s366_s12] sm:$0x1] %v5124_v49 }
 0x543   : > { %6248 = shalt.err (!%p6245_p3)
}
 0x544   : > { %s6249_s29 = scalar_lea.hbm %s8816_s11, 16  ;;  %s6253_s21 = scalar_lea.hbm %s8868_s10, 32 }
 0x545   : > { %p6250_p4 = scmp.ne.s32.totalorder %s8816_s11, %s6249_s29  ;;  %p6254_p9 = scmp.lt.u32.totalorder %s8816_s11, %s8868_s10 }
 0x546   : > { %p6255_p10 = scmp.lt.u32.totalorder %s6253_s21, %s6249_s29  ;;  %p6257_p12 = scmp.lt.u32.totalorder %s6249_s29, %s8816_s11 }
 0x547   : > { %p6251_p7 = pnand %p6250_p4, %p6398_p5 }
 0x548   : > { %p6256_p11 = por %p6255_p10, %p6254_p9 }
 0x549   : > { %p6252_p8 = pneg %p6251_p7 }
 0x54a   : > { %p6258_p13 = por %p6257_p12, %p6256_p11 }
 0x54c   : > { %p6259_p0 = pnand %p6258_p13, %p6252_p8 }
 0x54e   : > { %6262 = shalt.err (!%p6259_p0)
}
 0x54f   : > { %5999 = dma.vmem_to_hbm [thread:$0]  (%p6398_p5), %s8818_s28, 16, %s8816_s11, %s5129_s18  }
 0x550 PF: > { %p6005_p1 = scmp.ge.s32.totalorder %s6297_s16, 2  ;;  %s5153_s20 = sand.u32 1, %s6285_s13  }
 0x551   : > { %s5154_s25 = scalar_lea.sflag [#allocation3], %s5153_s20 }
 0x552   : > { %p6002_p2 = pnand %p6005_p1, %p6402_p6 }
 0x554   : > { %6280 = dma.done.wait (!%p6002_p2), %s5154_s25, 16  }
 0x555   : > { %6282 = vsyncadd (!%p6002_p2), %s5154_s25, 4294967280  ;;  %p20_p3 = scmp.ge.s32.totalorder %s6385_s19, 4   ;;  %s9079_s13 = smov %s6289_s14 }
 0x556   : > { %s9080_s14 = smov %s6293_s15  ;;  %s9081_s15 = smov %s6396_s22 }
 0x557   : > { %s9082_s16 = smov %s6385_s19  ;;  %22 = sbr.rel (!%p20_p3) target bundleno = 3 (0x3), region = 98 }
 0x55e   :  { %5158 = vsyncpa [#allocation3], 1 }
 0x55f   :  { %5160 = vsyncpa [#allocation3 + $0x1], 1 }

</bundles_post_ra>
